<compile_context>
chip_gen: v5e
topology: v5e:2x2
jax: 0.10.0
libtpu: 0.0.40
codegen_flags: <defaults>
</compile_context>

<pallas_src>
import functools
import math

import jax
import jax.numpy as jnp
from jax.experimental import pallas as pl
from jax.experimental.pallas import tpu as pltpu


def _hsigmoid(x):
    # torch: F.relu6(x + 3) / 6
    return jnp.clip(x + 3.0, 0.0, 6.0) * (1.0 / 6.0)


# ---------------------------------------------------------------------------
# One conv_dy block (+ its outer BatchNorm2d + ReLU) on in-register values.
# ---------------------------------------------------------------------------
def _conv_dy_block(x4, pad_ref, patch_ref, wcq_ref, wfc_ref, wse_ref,
                   wps_ref, wp_ref, bn_ref, *, H, W):
    """x4: (Bt, H, W, C) f32 value.  Returns (Bt*H*W, Cout) f32 value.

    wcq_ref : (9*C, Cout+dim) bf16   fused [conv3x3 | lifted Q] weight
    wps_ref : (squeeze, dim*dim+Cout) fused [fc_phi | fc_scale] weight
    bn_ref  : (2, 2*dim+Cout)        packed [BN1 | BN2 | outer BN] affines (rows a; b)
    """
    Bt, _, _, C = x4.shape
    HW = H * W
    M = Bt * HW
    dim, cout = wp_ref.shape
    dd = dim * dim

    # ---- attention branch (per image): avg-pool -> fc -> SE -> [phi | scale] ----
    pooled = jnp.sum(x4, axis=(1, 2)) * (1.0 / HW)                        # (Bt, C)
    y = jnp.dot(pooled, wfc_ref[...], preferred_element_type=jnp.float32)  # (Bt, sq)
    y = y * _hsigmoid(jnp.dot(y, wse_ref[...], preferred_element_type=jnp.float32))
    ps = jnp.dot(y, wps_ref[...], preferred_element_type=jnp.float32)      # (Bt, dd+cout)
    # phi rows from static lane slices (avoids a lane->sublane reshape in-kernel)
    phi = jnp.concatenate(
        [ps[:, None, i * dim:(i + 1) * dim] for i in range(dim)], axis=1)  # (Bt, dim, dim)
    scale = _hsigmoid(ps[:, None, dd:dd + cout])                           # (Bt, 1, cout)

    # ---- halo buffer: zero ONLY the 1-px border strips, write interior directly ----
    pad_ref[:, 0:1, :, :] = jnp.zeros((Bt, 1, W + 2, C), jnp.float32)
    pad_ref[:, H + 1:H + 2, :, :] = jnp.zeros((Bt, 1, W + 2, C), jnp.float32)
    pad_ref[:, :, 0:1, :] = jnp.zeros((Bt, H + 2, 1, C), jnp.float32)
    pad_ref[:, :, W + 1:W + 2, :] = jnp.zeros((Bt, H + 2, 1, C), jnp.float32)
    pad_ref[:, 1:H + 1, 1:W + 1, :] = x4

    # ---- im2col (bf16 staging) + ONE fused MXU matmul: conv3x3 and Q together ----
    # Each tap is a REF slice of the halo buffer (no full padded-value materialization);
    # the (Bt,H,W,C)->(M,C) merge is done on the f32 value (sublane-aligned -> free) and
    # cast to bf16 once at store time.
    for tap in range(9):
        dy, dx = tap // 3, tap % 3
        patch_ref[:, tap * C:(tap + 1) * C] = (
            pad_ref[:, dy:dy + H, dx:dx + W, :].reshape(M, C).astype(jnp.bfloat16))
    rq = jnp.dot(patch_ref[...], wcq_ref[...],
                 preferred_element_type=jnp.float32)                       # (M, cout+dim)
    rq3 = rq.reshape(Bt, HW, cout + dim)

    r = rq3[..., :cout] * scale                                            # dynamic gate
    xq = rq3[..., cout:] * bn_ref[0:1, 0:dim] + bn_ref[1:2, 0:dim]         # BN1 (folded)

    # ---- dynamic branch: t = BN2(xq @ phi^T) + xq ; out = P(t) + r ----------------
    t = jnp.einsum('bmd,bed->bme', xq, phi, preferred_element_type=jnp.float32)
    t = t * bn_ref[0:1, dim:2 * dim] + bn_ref[1:2, dim:2 * dim] + xq       # BN2 + residual
    p = jnp.dot(t.reshape(M, dim).astype(jnp.bfloat16), wp_ref[...],
                preferred_element_type=jnp.float32)                        # (M, cout)

    out = (p + r.reshape(M, cout)) * bn_ref[0:1, 2 * dim:] + bn_ref[1:2, 2 * dim:]
    return jnp.maximum(out, 0.0)                                           # ReLU, (M, cout)


# ---------------------------------------------------------------------------
# Fused DCW kernel: both conv_dy blocks per grid step (one step = Bt images).
# ---------------------------------------------------------------------------
def _dcw_kernel(x_ref,
                wcq1, wfc1, wse1, wps1, wp1, bnp1,
                wcq2, wfc2, wse2, wps2, wp2, bnp2,
                o_ref,
                pad1, patch1, pad2, patch2,
                *, H, W):
    x4 = x_ref[...]                                           # (Bt, H, W, Cin) f32
    Bt = x4.shape[0]
    c_mid = pad2.shape[-1]

    h = _conv_dy_block(x4, pad1, patch1, wcq1, wfc1, wse1, wps1, wp1, bnp1,
                       H=H, W=W)                              # (Bt*HW, Cmid)
    h4 = h.reshape(Bt, H, W, c_mid)                           # sublane-aligned split (free)
    out = _conv_dy_block(h4, pad2, patch2, wcq2, wfc2, wse2, wps2, wp2, bnp2,
                         H=H, W=W)                            # (Bt*HW, Cout)
    o_ref[...] = out.astype(o_ref.dtype)


# ---------------------------------------------------------------------------
# Host-side weight packing / tiling heuristics
# ---------------------------------------------------------------------------
def _pack_conv_dy(p):
    """Fuse conv3x3 with Q (lifted to the im2col K axis) and fc_phi with fc_scale."""
    k9, _ = p["w_conv9"].shape
    cin = k9 // 9
    dim = p["w_q"].shape[-1]
    # Only the centre tap (dy=1, dx=1 -> tap 4) of the im2col patches equals x, so a
    # (9*Cin, dim) weight that is zero outside rows [4*Cin, 5*Cin) reproduces x @ w_q.
    wq_lift = jnp.zeros((9 * cin, dim), jnp.bfloat16)
    wq_lift = wq_lift.at[4 * cin:5 * cin, :].set(p["w_q"].astype(jnp.bfloat16))
    w_convq = jnp.concatenate([p["w_conv9"].astype(jnp.bfloat16), wq_lift], axis=1)
    w_phisc = jnp.concatenate([p["w_phi"], p["w_scale"]], axis=1)
    return w_convq, p["w_fc"], p["w_se"], w_phisc, p["w_p"]


def _pick_batch_tile(N, H, W, cin, c_mid, budget_bytes=24 << 20):
    """Largest divisor of N that keeps the grid >= 2 (megacore) and scratch in budget."""
    HW = H * W

    def scratch_bytes(bt):
        pad = bt * (H + 2) * (W + 2) * (cin + c_mid) * 4      # f32 halo buffers
        patch = bt * HW * 9 * (cin + c_mid) * 2               # bf16 im2col patches
        return pad + patch

    for bt in range(N, 0, -1):
        if N % bt:
            continue
        if N >= 2 and N // bt < 2:
            continue                                           # keep >=2 grid steps (v7x 2 TCs)
        if scratch_bytes(bt) <= budget_bytes:
            return bt
    return 1


def dcw_forward(x_nhwc, params):
    N, H, W, Cin = x_nhwc.shape
    p1, p2 = params["conv1"], params["conv2"]
    c_mid = p1["w_p"].shape[-1]
    c_out = p2["w_p"].shape[-1]
    HW = H * W

    bnp1 = jnp.concatenate([p1["bn1"], p1["bn2"], params["bn_mid"]], axis=1)  # (2, 2*dim1+Cmid)
    bnp2 = jnp.concatenate([p2["bn1"], p2["bn2"], params["bn_out"]], axis=1)  # (2, 2*dim2+Cout)
    weights1 = (*_pack_conv_dy(p1), bnp1)
    weights2 = (*_pack_conv_dy(p2), bnp2)
    weights = weights1 + weights2

    Bt = _pick_batch_tile(N, H, W, Cin, c_mid)
    BtHW = Bt * HW

    # VMEM budget with headroom (v7x has only 64 MiB physical per TC).
    scratch_b = (Bt * (H + 2) * (W + 2) * (Cin + c_mid) * 4
                 + BtHW * 9 * (Cin + c_mid) * 2)
    io_b = 2 * BtHW * (Cin + c_out) * 4                       # double-buffered in/out blocks
    w_b = 2 * sum(int(w.size) * w.dtype.itemsize for w in weights)
    vmem_limit = int(min(64 << 20, max(16 << 20, 2 * (scratch_b + io_b + w_b) + (4 << 20))))

    def w_spec(arr):
        return pl.BlockSpec(arr.shape, lambda n: (0, 0))      # all packed weights are 2-D

    kern = functools.partial(_dcw_kernel, H=H, W=W)
    out = pl.pallas_call(
        kern,
        out_shape=jax.ShapeDtypeStruct((N * HW, c_out), x_nhwc.dtype),
        grid=(N // Bt,),
        in_specs=([pl.BlockSpec((Bt, H, W, Cin), lambda n: (n, 0, 0, 0))]
                  + [w_spec(w) for w in weights]),
        out_specs=pl.BlockSpec((BtHW, c_out), lambda n: (n, 0)),
        scratch_shapes=[
            pltpu.VMEM((Bt, H + 2, W + 2, Cin), jnp.float32),   # halo buffer, block 1 (f32)
            pltpu.VMEM((BtHW, 9 * Cin), jnp.bfloat16),          # im2col patches, block 1 (bf16)
            pltpu.VMEM((Bt, H + 2, W + 2, c_mid), jnp.float32), # halo buffer, block 2
            pltpu.VMEM((BtHW, 9 * c_mid), jnp.bfloat16),        # im2col patches, block 2
        ],
        compiler_params=pltpu.CompilerParams(
            dimension_semantics=("parallel",),                  # megacore-shard over batch
            vmem_limit_bytes=vmem_limit),
    )(x_nhwc, *weights)
    return out.reshape(N, H, W, c_out)                          # free metadata reshape


# ---------------------------------------------------------------------------
# Pure-JAX reference (mirrors the kernel math, incl. bf16 matmul operands)
# ---------------------------------------------------------------------------
def _conv_dy_block_ref(x, p, bn_outer):
    N, H, W, C = x.shape
    dim = p["w_q"].shape[-1]
    cout = p["w_p"].shape[-1]
    HW = H * W
    hi = jax.lax.Precision.HIGHEST
    x2 = x.reshape(N, HW, C)

    pooled = jnp.mean(x2, axis=1)                                       # (N, C)
    y = jnp.dot(pooled, p["w_fc"], precision=hi)
    y = y * _hsigmoid(jnp.dot(y, p["w_se"], precision=hi))
    phi = jnp.dot(y, p["w_phi"], precision=hi).reshape(N, dim, dim)
    scale = _hsigmoid(jnp.dot(y, p["w_scale"], precision=hi))[:, None, :]

    xp = jnp.pad(x, ((0, 0), (1, 1), (1, 1), (0, 0)))
    taps = [xp[:, dy:dy + H, dx:dx + W, :] for dy in range(3) for dx in range(3)]
    patches = jnp.concatenate(taps, axis=-1).reshape(N, HW, 9 * C).astype(jnp.bfloat16)
    r = jnp.einsum("nmk,ko->nmo", patches, p["w_conv9"],
                   preferred_element_type=jnp.float32) * scale

    xq = jnp.einsum("nmc,cd->nmd", x2.astype(jnp.bfloat16), p["w_q"],
                    preferred_element_type=jnp.float32)
    xq = xq * p["bn1"][0] + p["bn1"][1]
    t = jnp.einsum("nmd,ned->nme", xq, phi,
                   preferred_element_type=jnp.float32, precision=hi)
    t = t * p["bn2"][0] + p["bn2"][1] + xq
    out = jnp.einsum("nmd,do->nmo", t.astype(jnp.bfloat16), p["w_p"],
                     preferred_element_type=jnp.float32) + r
    out = out * bn_outer[0] + bn_outer[1]
    return jnp.maximum(out, 0.0).reshape(N, H, W, cout)


def dcw_reference(x, params):
    h = _conv_dy_block_ref(x, params["conv1"], params["bn_mid"])
    return _conv_dy_block_ref(h, params["conv2"], params["bn_out"])


# ---------------------------------------------------------------------------
# Deterministic synthetic parameters
# ---------------------------------------------------------------------------
def make_bn_affine(key, c, eps=1e-5):
    # eval-mode BatchNorm folded to y = a*x + b, packed as rows [a; b] -> (2, c)
    k1, k2, k3, k4 = jax.random.split(key, 4)
    gamma = 1.0 + 0.1 * jax.random.normal(k1, (c,), jnp.float32)
    beta = 0.1 * jax.random.normal(k2, (c,), jnp.float32)
    mean = 0.1 * jax.random.normal(k3, (c,), jnp.float32)
    var = 1.0 + 0.1 * jnp.abs(jax.random.normal(k4, (c,), jnp.float32))
    a = gamma / jnp.sqrt(var + eps)
    b = beta - mean * a
    return jnp.stack([a, b]).astype(jnp.float32)


def init_conv_dy_params(key, cin, cout):
    dim = int(math.sqrt(cin))
    squeeze = max(cin, dim * dim) // 16
    squeeze = max(squeeze, 4)
    ks = jax.random.split(key, 9)
    s = 0.1
    w_conv = s * jax.random.normal(ks[0], (3, 3, cin, cout), jnp.float32)
    return {
        # conv weight pre-reshaped for im2col (tap-major, channel-minor), bf16 for MXU
        "w_conv9": w_conv.reshape(9 * cin, cout).astype(jnp.bfloat16),
        "w_q": (s * jax.random.normal(ks[1], (cin, dim), jnp.float32)).astype(jnp.bfloat16),
        "w_p": (s * jax.random.normal(ks[2], (dim, cout), jnp.float32)).astype(jnp.bfloat16),
        "w_fc": s * jax.random.normal(ks[3], (cin, squeeze), jnp.float32),
        "w_se": s * jax.random.normal(ks[4], (squeeze, squeeze), jnp.float32),
        "w_phi": s * jax.random.normal(ks[5], (squeeze, dim * dim), jnp.float32),
        "w_scale": s * jax.random.normal(ks[6], (squeeze, cout), jnp.float32),
        "bn1": make_bn_affine(ks[7], dim),
        "bn2": make_bn_affine(ks[8], dim),
    }


def init_dcw_params(key, in_channels, out_channels, mid_channels=None):
    if not mid_channels:
        mid_channels = out_channels
    k1, k2, k3, k4 = jax.random.split(key, 4)
    return {
        "conv1": init_conv_dy_params(k1, in_channels, mid_channels),
        "bn_mid": make_bn_affine(k2, mid_channels),
        "conv2": init_conv_dy_params(k3, mid_channels, out_channels),
        "bn_out": make_bn_affine(k4, out_channels),
    }


if __name__ == "__main__":
    key = jax.random.PRNGKey(0)
    kx, kp = jax.random.split(key)

    B, C_in, C_out, H, W = 4, 16, 16, 8, 8
    # layout: NHWC (the PyTorch reference input would be NCHW [B, C_in, H, W])
    x = jax.random.normal(kx, (B, H, W, C_in), jnp.float32)
    params = init_dcw_params(kp, C_in, C_out)

    y = jax.jit(dcw_forward)(x, params)
    jax.block_until_ready(y)

    y_ref = jax.jit(dcw_reference)(x, params)
    jax.block_until_ready(y_ref)

    assert y.shape == (B, H, W, C_out)
    assert bool(jnp.all(jnp.isfinite(y)))
    max_err = float(jnp.max(jnp.abs(y - y_ref)))
    assert max_err < 1e-2, f"mismatch vs reference: max abs err = {max_err}"
    print("KERNEL_OK")
</pallas_src>

<mosaic_0001>
module attributes {stable_mosaic.version = 11 : i64} {
  func.func @_dcw_kernel(%arg0: i32, %arg1: memref<2x8x8x16xf32, #tpu.memory_space<vmem>>, %arg2: memref<144x20xbf16, #tpu.memory_space<vmem>>, %arg3: memref<16x4xf32, #tpu.memory_space<vmem>>, %arg4: memref<4x4xf32, #tpu.memory_space<vmem>>, %arg5: memref<4x32xf32, #tpu.memory_space<vmem>>, %arg6: memref<4x16xbf16, #tpu.memory_space<vmem>>, %arg7: memref<2x24xf32, #tpu.memory_space<vmem>>, %arg8: memref<144x20xbf16, #tpu.memory_space<vmem>>, %arg9: memref<16x4xf32, #tpu.memory_space<vmem>>, %arg10: memref<4x4xf32, #tpu.memory_space<vmem>>, %arg11: memref<4x32xf32, #tpu.memory_space<vmem>>, %arg12: memref<4x16xbf16, #tpu.memory_space<vmem>>, %arg13: memref<2x24xf32, #tpu.memory_space<vmem>>, %arg14: memref<128x16xf32, #tpu.memory_space<vmem>>, %arg15: memref<2x10x10x16xf32, #tpu.memory_space<vmem>>, %arg16: memref<128x144xbf16, #tpu.memory_space<vmem>>, %arg17: memref<2x10x10x16xf32, #tpu.memory_space<vmem>>, %arg18: memref<128x144xbf16, #tpu.memory_space<vmem>>) attributes {dimension_semantics = [#tpu.dimension_semantics<parallel>], iteration_bounds = array<i64: 2>, scalar_prefetch = 0 : i64, scratch_operands = 4 : i64, tpu.core_type = #tpu.core_type<tc>, window_params = [{transform_indices = @transform_0, window_bounds = array<i64: 2, 8, 8, 16>}, {pipeline_mode = #tpu.pipeline_mode<synchronous>, transform_indices = @transform_1, window_bounds = array<i64: 144, 20>}, {pipeline_mode = #tpu.pipeline_mode<synchronous>, transform_indices = @transform_2, window_bounds = array<i64: 16, 4>}, {pipeline_mode = #tpu.pipeline_mode<synchronous>, transform_indices = @transform_3, window_bounds = array<i64: 4, 4>}, {pipeline_mode = #tpu.pipeline_mode<synchronous>, transform_indices = @transform_4, window_bounds = array<i64: 4, 32>}, {pipeline_mode = #tpu.pipeline_mode<synchronous>, transform_indices = @transform_5, window_bounds = array<i64: 4, 16>}, {pipeline_mode = #tpu.pipeline_mode<synchronous>, transform_indices = @transform_6, window_bounds = array<i64: 2, 24>}, {pipeline_mode = #tpu.pipeline_mode<synchronous>, transform_indices = @transform_7, window_bounds = array<i64: 144, 20>}, {pipeline_mode = #tpu.pipeline_mode<synchronous>, transform_indices = @transform_8, window_bounds = array<i64: 16, 4>}, {pipeline_mode = #tpu.pipeline_mode<synchronous>, transform_indices = @transform_9, window_bounds = array<i64: 4, 4>}, {pipeline_mode = #tpu.pipeline_mode<synchronous>, transform_indices = @transform_10, window_bounds = array<i64: 4, 32>}, {pipeline_mode = #tpu.pipeline_mode<synchronous>, transform_indices = @transform_11, window_bounds = array<i64: 4, 16>}, {pipeline_mode = #tpu.pipeline_mode<synchronous>, transform_indices = @transform_12, window_bounds = array<i64: 2, 24>}, {transform_indices = @transform_13, window_bounds = array<i64: 128, 16>}]} {
    %c0 = arith.constant 0 : index
    %c0_0 = arith.constant 0 : index
    %c0_1 = arith.constant 0 : index
    %c0_2 = arith.constant 0 : index
    %0 = vector.load %arg1[%c0, %c0_0, %c0_1, %c0_2] : memref<2x8x8x16xf32, #tpu.memory_space<vmem>>, vector<2x8x8x16xf32>
    %cst = arith.constant dense<0.000000e+00> : vector<2x16xf32>
    %1 = vector.multi_reduction <add>, %0, %cst [1, 2] : vector<2x8x8x16xf32> to vector<2x16xf32>
    %cst_3 = arith.constant 1.562500e-02 : f32
    %2 = vector.broadcast %cst_3 : f32 to vector<2x16xf32>
    %3 = arith.mulf %1, %2 : vector<2x16xf32>
    %c0_4 = arith.constant 0 : index
    %c0_5 = arith.constant 0 : index
    %4 = vector.load %arg3[%c0_4, %c0_5] : memref<16x4xf32, #tpu.memory_space<vmem>>, vector<16x4xf32>
    %cst_6 = arith.constant dense<0.000000e+00> : vector<2x4xf32>
    %5 = tpu.matmul %3, %4, %cst_6 {dimension_numbers = #tpu.dot_dimension_numbers<[1], [0], [0], [1], [0, 0, 1, 1], [], []>} : vector<2x16xf32>, vector<16x4xf32>, vector<2x4xf32> -> vector<2x4xf32>
    %c0_7 = arith.constant 0 : index
    %c0_8 = arith.constant 0 : index
    %6 = vector.load %arg4[%c0_7, %c0_8] : memref<4x4xf32, #tpu.memory_space<vmem>>, vector<4x4xf32>
    %cst_9 = arith.constant dense<0.000000e+00> : vector<2x4xf32>
    %7 = tpu.matmul %5, %6, %cst_9 {dimension_numbers = #tpu.dot_dimension_numbers<[1], [0], [0], [1], [0, 0, 1, 1], [], []>} : vector<2x4xf32>, vector<4x4xf32>, vector<2x4xf32> -> vector<2x4xf32>
    %cst_10 = arith.constant 3.000000e+00 : f32
    %8 = vector.broadcast %cst_10 : f32 to vector<2x4xf32>
    %9 = arith.addf %7, %8 : vector<2x4xf32>
    %cst_11 = arith.constant 0.000000e+00 : f32
    %cst_12 = arith.constant 6.000000e+00 : f32
    %10 = vector.broadcast %cst_11 : f32 to vector<2x4xf32>
    %11 = arith.maximumf %10, %9 : vector<2x4xf32>
    %12 = vector.broadcast %cst_12 : f32 to vector<2x4xf32>
    %13 = arith.minimumf %12, %11 : vector<2x4xf32>
    %cst_13 = arith.constant 0.166666672 : f32
    %14 = vector.broadcast %cst_13 : f32 to vector<2x4xf32>
    %15 = arith.mulf %13, %14 : vector<2x4xf32>
    %16 = arith.mulf %5, %15 : vector<2x4xf32>
    %c0_14 = arith.constant 0 : index
    %c0_15 = arith.constant 0 : index
    %17 = vector.load %arg5[%c0_14, %c0_15] : memref<4x32xf32, #tpu.memory_space<vmem>>, vector<4x32xf32>
    %cst_16 = arith.constant dense<0.000000e+00> : vector<2x32xf32>
    %18 = tpu.matmul %16, %17, %cst_16 {dimension_numbers = #tpu.dot_dimension_numbers<[1], [0], [0], [1], [0, 0, 1, 1], [], []>} : vector<2x4xf32>, vector<4x32xf32>, vector<2x32xf32> -> vector<2x32xf32>
    %19 = vector.extract_strided_slice %18 {offsets = [0, 0], sizes = [2, 4], strides = [1, 1]} : vector<2x32xf32> to vector<2x4xf32>
    %20 = vector.shape_cast %19 : vector<2x4xf32> to vector<2x1x4xf32>
    %21 = vector.extract_strided_slice %18 {offsets = [0, 4], sizes = [2, 4], strides = [1, 1]} : vector<2x32xf32> to vector<2x4xf32>
    %22 = vector.shape_cast %21 : vector<2x4xf32> to vector<2x1x4xf32>
    %23 = vector.extract_strided_slice %18 {offsets = [0, 8], sizes = [2, 4], strides = [1, 1]} : vector<2x32xf32> to vector<2x4xf32>
    %24 = vector.shape_cast %23 : vector<2x4xf32> to vector<2x1x4xf32>
    %25 = vector.extract_strided_slice %18 {offsets = [0, 12], sizes = [2, 4], strides = [1, 1]} : vector<2x32xf32> to vector<2x4xf32>
    %26 = vector.shape_cast %25 : vector<2x4xf32> to vector<2x1x4xf32>
    %27 = tpu.concatenate %20, %22, %24, %26 in 1 : vector<2x1x4xf32>, vector<2x1x4xf32>, vector<2x1x4xf32>, vector<2x1x4xf32> -> vector<2x4x4xf32>
    %28 = vector.extract_strided_slice %18 {offsets = [0, 16], sizes = [2, 16], strides = [1, 1]} : vector<2x32xf32> to vector<2x16xf32>
    %29 = vector.shape_cast %28 : vector<2x16xf32> to vector<2x1x16xf32>
    %cst_17 = arith.constant 3.000000e+00 : f32
    %30 = vector.broadcast %cst_17 : f32 to vector<2x1x16xf32>
    %31 = arith.addf %29, %30 : vector<2x1x16xf32>
    %cst_18 = arith.constant 0.000000e+00 : f32
    %cst_19 = arith.constant 6.000000e+00 : f32
    %32 = vector.broadcast %cst_18 : f32 to vector<2x1x16xf32>
    %33 = arith.maximumf %32, %31 : vector<2x1x16xf32>
    %34 = vector.broadcast %cst_19 : f32 to vector<2x1x16xf32>
    %35 = arith.minimumf %34, %33 : vector<2x1x16xf32>
    %cst_20 = arith.constant 0.166666672 : f32
    %36 = vector.broadcast %cst_20 : f32 to vector<2x1x16xf32>
    %37 = arith.mulf %35, %36 : vector<2x1x16xf32>
    %cst_21 = arith.constant 0.000000e+00 : f32
    %38 = vector.broadcast %cst_21 : f32 to vector<2x1x10x16xf32>
    %c0_22 = arith.constant 0 : index
    %c0_23 = arith.constant 0 : index
    %c0_24 = arith.constant 0 : index
    %c0_25 = arith.constant 0 : index
    %39 = vector.load %arg15[%c0_22, %c0_23, %c0_24, %c0_25] : memref<2x10x10x16xf32, #tpu.memory_space<vmem>>, vector<2x1x10x16xf32>
    tpu.vector_store %arg15[%c0_22, %c0_23, %c0_24, %c0_25], %38 {strides = array<i32>} : memref<2x10x10x16xf32, #tpu.memory_space<vmem>>, vector<2x1x10x16xf32>,
    %cst_26 = arith.constant 0.000000e+00 : f32
    %40 = vector.broadcast %cst_26 : f32 to vector<2x1x10x16xf32>
    %c0_27 = arith.constant 0 : index
    %c9 = arith.constant 9 : index
    %c0_28 = arith.constant 0 : index
    %c0_29 = arith.constant 0 : index
    %41 = vector.load %arg15[%c0_27, %c9, %c0_28, %c0_29] : memref<2x10x10x16xf32, #tpu.memory_space<vmem>>, vector<2x1x10x16xf32>
    tpu.vector_store %arg15[%c0_27, %c9, %c0_28, %c0_29], %40 {strides = array<i32>} : memref<2x10x10x16xf32, #tpu.memory_space<vmem>>, vector<2x1x10x16xf32>,
    %cst_30 = arith.constant 0.000000e+00 : f32
    %42 = vector.broadcast %cst_30 : f32 to vector<2x10x1x16xf32>
    %c0_31 = arith.constant 0 : index
    %c0_32 = arith.constant 0 : index
    %c0_33 = arith.constant 0 : index
    %c0_34 = arith.constant 0 : index
    %43 = vector.load %arg15[%c0_31, %c0_32, %c0_33, %c0_34] : memref<2x10x10x16xf32, #tpu.memory_space<vmem>>, vector<2x10x1x16xf32>
    tpu.vector_store %arg15[%c0_31, %c0_32, %c0_33, %c0_34], %42 {strides = array<i32>} : memref<2x10x10x16xf32, #tpu.memory_space<vmem>>, vector<2x10x1x16xf32>,
    %cst_35 = arith.constant 0.000000e+00 : f32
    %44 = vector.broadcast %cst_35 : f32 to vector<2x10x1x16xf32>
    %c0_36 = arith.constant 0 : index
    %c0_37 = arith.constant 0 : index
    %c9_38 = arith.constant 9 : index
    %c0_39 = arith.constant 0 : index
    %45 = vector.load %arg15[%c0_36, %c0_37, %c9_38, %c0_39] : memref<2x10x10x16xf32, #tpu.memory_space<vmem>>, vector<2x10x1x16xf32>
    tpu.vector_store %arg15[%c0_36, %c0_37, %c9_38, %c0_39], %44 {strides = array<i32>} : memref<2x10x10x16xf32, #tpu.memory_space<vmem>>, vector<2x10x1x16xf32>,
    %c0_40 = arith.constant 0 : index
    %c1 = arith.constant 1 : index
    %c1_41 = arith.constant 1 : index
    %c0_42 = arith.constant 0 : index
    %46 = vector.load %arg15[%c0_40, %c1, %c1_41, %c0_42] : memref<2x10x10x16xf32, #tpu.memory_space<vmem>>, vector<2x8x8x16xf32>
    tpu.vector_store %arg15[%c0_40, %c1, %c1_41, %c0_42], %0 {strides = array<i32>} : memref<2x10x10x16xf32, #tpu.memory_space<vmem>>, vector<2x8x8x16xf32>,
    %c0_43 = arith.constant 0 : index
    %c0_44 = arith.constant 0 : index
    %c0_45 = arith.constant 0 : index
    %c0_46 = arith.constant 0 : index
    %47 = vector.load %arg15[%c0_43, %c0_44, %c0_45, %c0_46] : memref<2x10x10x16xf32, #tpu.memory_space<vmem>>, vector<2x8x8x16xf32>
    %48 = vector.shape_cast %47 : vector<2x8x8x16xf32> to vector<128x16xf32>
    %49 = arith.truncf %48 : vector<128x16xf32> to vector<128x16xbf16>
    %c0_47 = arith.constant 0 : index
    %c0_48 = arith.constant 0 : index
    %50 = vector.load %arg16[%c0_47, %c0_48] : memref<128x144xbf16, #tpu.memory_space<vmem>>, vector<128x16xbf16>
    tpu.vector_store %arg16[%c0_47, %c0_48], %49 {strides = array<i32>} : memref<128x144xbf16, #tpu.memory_space<vmem>>, vector<128x16xbf16>,
    %c0_49 = arith.constant 0 : index
    %c0_50 = arith.constant 0 : index
    %c1_51 = arith.constant 1 : index
    %c0_52 = arith.constant 0 : index
    %51 = vector.load %arg15[%c0_49, %c0_50, %c1_51, %c0_52] : memref<2x10x10x16xf32, #tpu.memory_space<vmem>>, vector<2x8x8x16xf32>
    %52 = vector.shape_cast %51 : vector<2x8x8x16xf32> to vector<128x16xf32>
    %53 = arith.truncf %52 : vector<128x16xf32> to vector<128x16xbf16>
    %c0_53 = arith.constant 0 : index
    %c16 = arith.constant 16 : index
    %54 = vector.load %arg16[%c0_53, %c16] : memref<128x144xbf16, #tpu.memory_space<vmem>>, vector<128x16xbf16>
    tpu.vector_store %arg16[%c0_53, %c16], %53 {strides = array<i32>} : memref<128x144xbf16, #tpu.memory_space<vmem>>, vector<128x16xbf16>,
    %c0_54 = arith.constant 0 : index
    %c0_55 = arith.constant 0 : index
    %c2 = arith.constant 2 : index
    %c0_56 = arith.constant 0 : index
    %55 = vector.load %arg15[%c0_54, %c0_55, %c2, %c0_56] : memref<2x10x10x16xf32, #tpu.memory_space<vmem>>, vector<2x8x8x16xf32>
    %56 = vector.shape_cast %55 : vector<2x8x8x16xf32> to vector<128x16xf32>
    %57 = arith.truncf %56 : vector<128x16xf32> to vector<128x16xbf16>
    %c0_57 = arith.constant 0 : index
    %c32 = arith.constant 32 : index
    %58 = vector.load %arg16[%c0_57, %c32] : memref<128x144xbf16, #tpu.memory_space<vmem>>, vector<128x16xbf16>
    tpu.vector_store %arg16[%c0_57, %c32], %57 {strides = array<i32>} : memref<128x144xbf16, #tpu.memory_space<vmem>>, vector<128x16xbf16>,
    %c0_58 = arith.constant 0 : index
    %c1_59 = arith.constant 1 : index
    %c0_60 = arith.constant 0 : index
    %c0_61 = arith.constant 0 : index
    %59 = vector.load %arg15[%c0_58, %c1_59, %c0_60, %c0_61] : memref<2x10x10x16xf32, #tpu.memory_space<vmem>>, vector<2x8x8x16xf32>
    %60 = vector.shape_cast %59 : vector<2x8x8x16xf32> to vector<128x16xf32>
    %61 = arith.truncf %60 : vector<128x16xf32> to vector<128x16xbf16>
    %c0_62 = arith.constant 0 : index
    %c48 = arith.constant 48 : index
    %62 = vector.load %arg16[%c0_62, %c48] : memref<128x144xbf16, #tpu.memory_space<vmem>>, vector<128x16xbf16>
    tpu.vector_store %arg16[%c0_62, %c48], %61 {strides = array<i32>} : memref<128x144xbf16, #tpu.memory_space<vmem>>, vector<128x16xbf16>,
    %c0_63 = arith.constant 0 : index
    %c1_64 = arith.constant 1 : index
    %c1_65 = arith.constant 1 : index
    %c0_66 = arith.constant 0 : index
    %63 = vector.load %arg15[%c0_63, %c1_64, %c1_65, %c0_66] : memref<2x10x10x16xf32, #tpu.memory_space<vmem>>, vector<2x8x8x16xf32>
    %64 = vector.shape_cast %63 : vector<2x8x8x16xf32> to vector<128x16xf32>
    %65 = arith.truncf %64 : vector<128x16xf32> to vector<128x16xbf16>
    %c0_67 = arith.constant 0 : index
    %c64 = arith.constant 64 : index
    %66 = vector.load %arg16[%c0_67, %c64] : memref<128x144xbf16, #tpu.memory_space<vmem>>, vector<128x16xbf16>
    tpu.vector_store %arg16[%c0_67, %c64], %65 {strides = array<i32>} : memref<128x144xbf16, #tpu.memory_space<vmem>>, vector<128x16xbf16>,
    %c0_68 = arith.constant 0 : index
    %c1_69 = arith.constant 1 : index
    %c2_70 = arith.constant 2 : index
    %c0_71 = arith.constant 0 : index
    %67 = vector.load %arg15[%c0_68, %c1_69, %c2_70, %c0_71] : memref<2x10x10x16xf32, #tpu.memory_space<vmem>>, vector<2x8x8x16xf32>
    %68 = vector.shape_cast %67 : vector<2x8x8x16xf32> to vector<128x16xf32>
    %69 = arith.truncf %68 : vector<128x16xf32> to vector<128x16xbf16>
    %c0_72 = arith.constant 0 : index
    %c80 = arith.constant 80 : index
    %70 = vector.load %arg16[%c0_72, %c80] : memref<128x144xbf16, #tpu.memory_space<vmem>>, vector<128x16xbf16>
    tpu.vector_store %arg16[%c0_72, %c80], %69 {strides = array<i32>} : memref<128x144xbf16, #tpu.memory_space<vmem>>, vector<128x16xbf16>,
    %c0_73 = arith.constant 0 : index
    %c2_74 = arith.constant 2 : index
    %c0_75 = arith.constant 0 : index
    %c0_76 = arith.constant 0 : index
    %71 = vector.load %arg15[%c0_73, %c2_74, %c0_75, %c0_76] : memref<2x10x10x16xf32, #tpu.memory_space<vmem>>, vector<2x8x8x16xf32>
    %72 = vector.shape_cast %71 : vector<2x8x8x16xf32> to vector<128x16xf32>
    %73 = arith.truncf %72 : vector<128x16xf32> to vector<128x16xbf16>
    %c0_77 = arith.constant 0 : index
    %c96 = arith.constant 96 : index
    %74 = vector.load %arg16[%c0_77, %c96] : memref<128x144xbf16, #tpu.memory_space<vmem>>, vector<128x16xbf16>
    tpu.vector_store %arg16[%c0_77, %c96], %73 {strides = array<i32>} : memref<128x144xbf16, #tpu.memory_space<vmem>>, vector<128x16xbf16>,
    %c0_78 = arith.constant 0 : index
    %c2_79 = arith.constant 2 : index
    %c1_80 = arith.constant 1 : index
    %c0_81 = arith.constant 0 : index
    %75 = vector.load %arg15[%c0_78, %c2_79, %c1_80, %c0_81] : memref<2x10x10x16xf32, #tpu.memory_space<vmem>>, vector<2x8x8x16xf32>
    %76 = vector.shape_cast %75 : vector<2x8x8x16xf32> to vector<128x16xf32>
    %77 = arith.truncf %76 : vector<128x16xf32> to vector<128x16xbf16>
    %c0_82 = arith.constant 0 : index
    %c112 = arith.constant 112 : index
    %78 = vector.load %arg16[%c0_82, %c112] : memref<128x144xbf16, #tpu.memory_space<vmem>>, vector<128x16xbf16>
    tpu.vector_store %arg16[%c0_82, %c112], %77 {strides = array<i32>} : memref<128x144xbf16, #tpu.memory_space<vmem>>, vector<128x16xbf16>,
    %c0_83 = arith.constant 0 : index
    %c2_84 = arith.constant 2 : index
    %c2_85 = arith.constant 2 : index
    %c0_86 = arith.constant 0 : index
    %79 = vector.load %arg15[%c0_83, %c2_84, %c2_85, %c0_86] : memref<2x10x10x16xf32, #tpu.memory_space<vmem>>, vector<2x8x8x16xf32>
    %80 = vector.shape_cast %79 : vector<2x8x8x16xf32> to vector<128x16xf32>
    %81 = arith.truncf %80 : vector<128x16xf32> to vector<128x16xbf16>
    %c0_87 = arith.constant 0 : index
    %c128 = arith.constant 128 : index
    %82 = vector.load %arg16[%c0_87, %c128] : memref<128x144xbf16, #tpu.memory_space<vmem>>, vector<128x16xbf16>
    tpu.vector_store %arg16[%c0_87, %c128], %81 {strides = array<i32>} : memref<128x144xbf16, #tpu.memory_space<vmem>>, vector<128x16xbf16>,
    %c0_88 = arith.constant 0 : index
    %c0_89 = arith.constant 0 : index
    %83 = vector.load %arg16[%c0_88, %c0_89] : memref<128x144xbf16, #tpu.memory_space<vmem>>, vector<128x144xbf16>
    %c0_90 = arith.constant 0 : index
    %c0_91 = arith.constant 0 : index
    %84 = vector.load %arg2[%c0_90, %c0_91] : memref<144x20xbf16, #tpu.memory_space<vmem>>, vector<144x20xbf16>
    %cst_92 = arith.constant dense<0.000000e+00> : vector<128x20xf32>
    %85 = tpu.matmul %83, %84, %cst_92 {dimension_numbers = #tpu.dot_dimension_numbers<[1], [0], [0], [1], [0, 0, 1, 1], [], []>} : vector<128x144xbf16>, vector<144x20xbf16>, vector<128x20xf32> -> vector<128x20xf32>
    %86 = vector.shape_cast %85 : vector<128x20xf32> to vector<2x64x20xf32>
    %87 = vector.extract_strided_slice %86 {offsets = [0, 0, 0], sizes = [2, 64, 16], strides = [1, 1, 1]} : vector<2x64x20xf32> to vector<2x64x16xf32>
    %88 = vector.broadcast %37 : vector<2x1x16xf32> to vector<2x64x16xf32>
    %89 = arith.mulf %87, %88 : vector<2x64x16xf32>
    %90 = vector.extract_strided_slice %86 {offsets = [0, 0, 16], sizes = [2, 64, 4], strides = [1, 1, 1]} : vector<2x64x20xf32> to vector<2x64x4xf32>
    %c0_93 = arith.constant 0 : index
    %c0_94 = arith.constant 0 : index
    %91 = vector.load %arg7[%c0_93, %c0_94] : memref<2x24xf32, #tpu.memory_space<vmem>>, vector<1x4xf32>
    %92 = vector.shape_cast %91 : vector<1x4xf32> to vector<1x1x4xf32>
    %93 = vector.broadcast %92 : vector<1x1x4xf32> to vector<2x64x4xf32>
    %94 = arith.mulf %90, %93 : vector<2x64x4xf32>
    %c1_95 = arith.constant 1 : index
    %c0_96 = arith.constant 0 : index
    %95 = vector.load %arg7[%c1_95, %c0_96] : memref<2x24xf32, #tpu.memory_space<vmem>>, vector<1x4xf32>
    %96 = vector.shape_cast %95 : vector<1x4xf32> to vector<1x1x4xf32>
    %97 = vector.broadcast %96 : vector<1x1x4xf32> to vector<2x64x4xf32>
    %98 = arith.addf %94, %97 : vector<2x64x4xf32>
    "tpu.trace_start"() <{level = 10 : i32, message = "bmd,bed->bme"}> : () -> ()
    %cst_97 = arith.constant dense<0.000000e+00> : vector<2x64x4xf32>
    %99 = tpu.matmul %98, %27, %cst_97 {dimension_numbers = #tpu.dot_dimension_numbers<[2], [2], [1], [1], [0, 0, 0, 1, 1, 1], [0], [0]>} : vector<2x64x4xf32>, vector<2x4x4xf32>, vector<2x64x4xf32> -> vector<2x64x4xf32>
    "tpu.trace_stop"() : () -> ()
    %c0_98 = arith.constant 0 : index
    %c4 = arith.constant 4 : index
    %100 = vector.load %arg7[%c0_98, %c4] : memref<2x24xf32, #tpu.memory_space<vmem>>, vector<1x4xf32>
    %101 = vector.shape_cast %100 : vector<1x4xf32> to vector<1x1x4xf32>
    %102 = vector.broadcast %101 : vector<1x1x4xf32> to vector<2x64x4xf32>
    %103 = arith.mulf %99, %102 : vector<2x64x4xf32>
    %c1_99 = arith.constant 1 : index
    %c4_100 = arith.constant 4 : index
    %104 = vector.load %arg7[%c1_99, %c4_100] : memref<2x24xf32, #tpu.memory_space<vmem>>, vector<1x4xf32>
    %105 = vector.shape_cast %104 : vector<1x4xf32> to vector<1x1x4xf32>
    %106 = vector.broadcast %105 : vector<1x1x4xf32> to vector<2x64x4xf32>
    %107 = arith.addf %103, %106 : vector<2x64x4xf32>
    %108 = arith.addf %107, %98 : vector<2x64x4xf32>
    %109 = vector.shape_cast %108 : vector<2x64x4xf32> to vector<128x4xf32>
    %110 = arith.truncf %109 : vector<128x4xf32> to vector<128x4xbf16>
    %c0_101 = arith.constant 0 : index
    %c0_102 = arith.constant 0 : index
    %111 = vector.load %arg6[%c0_101, %c0_102] : memref<4x16xbf16, #tpu.memory_space<vmem>>, vector<4x16xbf16>
    %cst_103 = arith.constant dense<0.000000e+00> : vector<128x16xf32>
    %112 = tpu.matmul %110, %111, %cst_103 {dimension_numbers = #tpu.dot_dimension_numbers<[1], [0], [0], [1], [0, 0, 1, 1], [], []>} : vector<128x4xbf16>, vector<4x16xbf16>, vector<128x16xf32> -> vector<128x16xf32>
    %113 = vector.shape_cast %89 : vector<2x64x16xf32> to vector<128x16xf32>
    %114 = arith.addf %112, %113 : vector<128x16xf32>
    %c0_104 = arith.constant 0 : index
    %c8 = arith.constant 8 : index
    %115 = vector.load %arg7[%c0_104, %c8] : memref<2x24xf32, #tpu.memory_space<vmem>>, vector<1x16xf32>
    %116 = vector.broadcast %115 : vector<1x16xf32> to vector<128x16xf32>
    %117 = arith.mulf %114, %116 : vector<128x16xf32>
    %c1_105 = arith.constant 1 : index
    %c8_106 = arith.constant 8 : index
    %118 = vector.load %arg7[%c1_105, %c8_106] : memref<2x24xf32, #tpu.memory_space<vmem>>, vector<1x16xf32>
    %119 = vector.broadcast %118 : vector<1x16xf32> to vector<128x16xf32>
    %120 = arith.addf %117, %119 : vector<128x16xf32>
    %cst_107 = arith.constant 0.000000e+00 : f32
    %121 = vector.broadcast %cst_107 : f32 to vector<128x16xf32>
    %122 = arith.maximumf %120, %121 : vector<128x16xf32>
    %123 = vector.shape_cast %122 : vector<128x16xf32> to vector<2x8x8x16xf32>
    %cst_108 = arith.constant dense<0.000000e+00> : vector<2x16xf32>
    %124 = vector.multi_reduction <add>, %123, %cst_108 [1, 2] : vector<2x8x8x16xf32> to vector<2x16xf32>
    %cst_109 = arith.constant 1.562500e-02 : f32
    %125 = vector.broadcast %cst_109 : f32 to vector<2x16xf32>
    %126 = arith.mulf %124, %125 : vector<2x16xf32>
    %c0_110 = arith.constant 0 : index
    %c0_111 = arith.constant 0 : index
    %127 = vector.load %arg9[%c0_110, %c0_111] : memref<16x4xf32, #tpu.memory_space<vmem>>, vector<16x4xf32>
    %cst_112 = arith.constant dense<0.000000e+00> : vector<2x4xf32>
    %128 = tpu.matmul %126, %127, %cst_112 {dimension_numbers = #tpu.dot_dimension_numbers<[1], [0], [0], [1], [0, 0, 1, 1], [], []>} : vector<2x16xf32>, vector<16x4xf32>, vector<2x4xf32> -> vector<2x4xf32>
    %c0_113 = arith.constant 0 : index
    %c0_114 = arith.constant 0 : index
    %129 = vector.load %arg10[%c0_113, %c0_114] : memref<4x4xf32, #tpu.memory_space<vmem>>, vector<4x4xf32>
    %cst_115 = arith.constant dense<0.000000e+00> : vector<2x4xf32>
    %130 = tpu.matmul %128, %129, %cst_115 {dimension_numbers = #tpu.dot_dimension_numbers<[1], [0], [0], [1], [0, 0, 1, 1], [], []>} : vector<2x4xf32>, vector<4x4xf32>, vector<2x4xf32> -> vector<2x4xf32>
    %cst_116 = arith.constant 3.000000e+00 : f32
    %131 = vector.broadcast %cst_116 : f32 to vector<2x4xf32>
    %132 = arith.addf %130, %131 : vector<2x4xf32>
    %cst_117 = arith.constant 0.000000e+00 : f32
    %cst_118 = arith.constant 6.000000e+00 : f32
    %133 = vector.broadcast %cst_117 : f32 to vector<2x4xf32>
    %134 = arith.maximumf %133, %132 : vector<2x4xf32>
    %135 = vector.broadcast %cst_118 : f32 to vector<2x4xf32>
    %136 = arith.minimumf %135, %134 : vector<2x4xf32>
    %cst_119 = arith.constant 0.166666672 : f32
    %137 = vector.broadcast %cst_119 : f32 to vector<2x4xf32>
    %138 = arith.mulf %136, %137 : vector<2x4xf32>
    %139 = arith.mulf %128, %138 : vector<2x4xf32>
    %c0_120 = arith.constant 0 : index
    %c0_121 = arith.constant 0 : index
    %140 = vector.load %arg11[%c0_120, %c0_121] : memref<4x32xf32, #tpu.memory_space<vmem>>, vector<4x32xf32>
    %cst_122 = arith.constant dense<0.000000e+00> : vector<2x32xf32>
    %141 = tpu.matmul %139, %140, %cst_122 {dimension_numbers = #tpu.dot_dimension_numbers<[1], [0], [0], [1], [0, 0, 1, 1], [], []>} : vector<2x4xf32>, vector<4x32xf32>, vector<2x32xf32> -> vector<2x32xf32>
    %142 = vector.extract_strided_slice %141 {offsets = [0, 0], sizes = [2, 4], strides = [1, 1]} : vector<2x32xf32> to vector<2x4xf32>
    %143 = vector.shape_cast %142 : vector<2x4xf32> to vector<2x1x4xf32>
    %144 = vector.extract_strided_slice %141 {offsets = [0, 4], sizes = [2, 4], strides = [1, 1]} : vector<2x32xf32> to vector<2x4xf32>
    %145 = vector.shape_cast %144 : vector<2x4xf32> to vector<2x1x4xf32>
    %146 = vector.extract_strided_slice %141 {offsets = [0, 8], sizes = [2, 4], strides = [1, 1]} : vector<2x32xf32> to vector<2x4xf32>
    %147 = vector.shape_cast %146 : vector<2x4xf32> to vector<2x1x4xf32>
    %148 = vector.extract_strided_slice %141 {offsets = [0, 12], sizes = [2, 4], strides = [1, 1]} : vector<2x32xf32> to vector<2x4xf32>
    %149 = vector.shape_cast %148 : vector<2x4xf32> to vector<2x1x4xf32>
    %150 = tpu.concatenate %143, %145, %147, %149 in 1 : vector<2x1x4xf32>, vector<2x1x4xf32>, vector<2x1x4xf32>, vector<2x1x4xf32> -> vector<2x4x4xf32>
    %151 = vector.extract_strided_slice %141 {offsets = [0, 16], sizes = [2, 16], strides = [1, 1]} : vector<2x32xf32> to vector<2x16xf32>
    %152 = vector.shape_cast %151 : vector<2x16xf32> to vector<2x1x16xf32>
    %cst_123 = arith.constant 3.000000e+00 : f32
    %153 = vector.broadcast %cst_123 : f32 to vector<2x1x16xf32>
    %154 = arith.addf %152, %153 : vector<2x1x16xf32>
    %cst_124 = arith.constant 0.000000e+00 : f32
    %cst_125 = arith.constant 6.000000e+00 : f32
    %155 = vector.broadcast %cst_124 : f32 to vector<2x1x16xf32>
    %156 = arith.maximumf %155, %154 : vector<2x1x16xf32>
    %157 = vector.broadcast %cst_125 : f32 to vector<2x1x16xf32>
    %158 = arith.minimumf %157, %156 : vector<2x1x16xf32>
    %cst_126 = arith.constant 0.166666672 : f32
    %159 = vector.broadcast %cst_126 : f32 to vector<2x1x16xf32>
    %160 = arith.mulf %158, %159 : vector<2x1x16xf32>
    %cst_127 = arith.constant 0.000000e+00 : f32
    %161 = vector.broadcast %cst_127 : f32 to vector<2x1x10x16xf32>
    %c0_128 = arith.constant 0 : index
    %c0_129 = arith.constant 0 : index
    %c0_130 = arith.constant 0 : index
    %c0_131 = arith.constant 0 : index
    %162 = vector.load %arg17[%c0_128, %c0_129, %c0_130, %c0_131] : memref<2x10x10x16xf32, #tpu.memory_space<vmem>>, vector<2x1x10x16xf32>
    tpu.vector_store %arg17[%c0_128, %c0_129, %c0_130, %c0_131], %161 {strides = array<i32>} : memref<2x10x10x16xf32, #tpu.memory_space<vmem>>, vector<2x1x10x16xf32>,
    %cst_132 = arith.constant 0.000000e+00 : f32
    %163 = vector.broadcast %cst_132 : f32 to vector<2x1x10x16xf32>
    %c0_133 = arith.constant 0 : index
    %c9_134 = arith.constant 9 : index
    %c0_135 = arith.constant 0 : index
    %c0_136 = arith.constant 0 : index
    %164 = vector.load %arg17[%c0_133, %c9_134, %c0_135, %c0_136] : memref<2x10x10x16xf32, #tpu.memory_space<vmem>>, vector<2x1x10x16xf32>
    tpu.vector_store %arg17[%c0_133, %c9_134, %c0_135, %c0_136], %163 {strides = array<i32>} : memref<2x10x10x16xf32, #tpu.memory_space<vmem>>, vector<2x1x10x16xf32>,
    %cst_137 = arith.constant 0.000000e+00 : f32
    %165 = vector.broadcast %cst_137 : f32 to vector<2x10x1x16xf32>
    %c0_138 = arith.constant 0 : index
    %c0_139 = arith.constant 0 : index
    %c0_140 = arith.constant 0 : index
    %c0_141 = arith.constant 0 : index
    %166 = vector.load %arg17[%c0_138, %c0_139, %c0_140, %c0_141] : memref<2x10x10x16xf32, #tpu.memory_space<vmem>>, vector<2x10x1x16xf32>
    tpu.vector_store %arg17[%c0_138, %c0_139, %c0_140, %c0_141], %165 {strides = array<i32>} : memref<2x10x10x16xf32, #tpu.memory_space<vmem>>, vector<2x10x1x16xf32>,
    %cst_142 = arith.constant 0.000000e+00 : f32
    %167 = vector.broadcast %cst_142 : f32 to vector<2x10x1x16xf32>
    %c0_143 = arith.constant 0 : index
    %c0_144 = arith.constant 0 : index
    %c9_145 = arith.constant 9 : index
    %c0_146 = arith.constant 0 : index
    %168 = vector.load %arg17[%c0_143, %c0_144, %c9_145, %c0_146] : memref<2x10x10x16xf32, #tpu.memory_space<vmem>>, vector<2x10x1x16xf32>
    tpu.vector_store %arg17[%c0_143, %c0_144, %c9_145, %c0_146], %167 {strides = array<i32>} : memref<2x10x10x16xf32, #tpu.memory_space<vmem>>, vector<2x10x1x16xf32>,
    %c0_147 = arith.constant 0 : index
    %c1_148 = arith.constant 1 : index
    %c1_149 = arith.constant 1 : index
    %c0_150 = arith.constant 0 : index
    %169 = vector.load %arg17[%c0_147, %c1_148, %c1_149, %c0_150] : memref<2x10x10x16xf32, #tpu.memory_space<vmem>>, vector<2x8x8x16xf32>
    tpu.vector_store %arg17[%c0_147, %c1_148, %c1_149, %c0_150], %123 {strides = array<i32>} : memref<2x10x10x16xf32, #tpu.memory_space<vmem>>, vector<2x8x8x16xf32>,
    %c0_151 = arith.constant 0 : index
    %c0_152 = arith.constant 0 : index
    %c0_153 = arith.constant 0 : index
    %c0_154 = arith.constant 0 : index
    %170 = vector.load %arg17[%c0_151, %c0_152, %c0_153, %c0_154] : memref<2x10x10x16xf32, #tpu.memory_space<vmem>>, vector<2x8x8x16xf32>
    %171 = vector.shape_cast %170 : vector<2x8x8x16xf32> to vector<128x16xf32>
    %172 = arith.truncf %171 : vector<128x16xf32> to vector<128x16xbf16>
    %c0_155 = arith.constant 0 : index
    %c0_156 = arith.constant 0 : index
    %173 = vector.load %arg18[%c0_155, %c0_156] : memref<128x144xbf16, #tpu.memory_space<vmem>>, vector<128x16xbf16>
    tpu.vector_store %arg18[%c0_155, %c0_156], %172 {strides = array<i32>} : memref<128x144xbf16, #tpu.memory_space<vmem>>, vector<128x16xbf16>,
    %c0_157 = arith.constant 0 : index
    %c0_158 = arith.constant 0 : index
    %c1_159 = arith.constant 1 : index
    %c0_160 = arith.constant 0 : index
    %174 = vector.load %arg17[%c0_157, %c0_158, %c1_159, %c0_160] : memref<2x10x10x16xf32, #tpu.memory_space<vmem>>, vector<2x8x8x16xf32>
    %175 = vector.shape_cast %174 : vector<2x8x8x16xf32> to vector<128x16xf32>
    %176 = arith.truncf %175 : vector<128x16xf32> to vector<128x16xbf16>
    %c0_161 = arith.constant 0 : index
    %c16_162 = arith.constant 16 : index
    %177 = vector.load %arg18[%c0_161, %c16_162] : memref<128x144xbf16, #tpu.memory_space<vmem>>, vector<128x16xbf16>
    tpu.vector_store %arg18[%c0_161, %c16_162], %176 {strides = array<i32>} : memref<128x144xbf16, #tpu.memory_space<vmem>>, vector<128x16xbf16>,
    %c0_163 = arith.constant 0 : index
    %c0_164 = arith.constant 0 : index
    %c2_165 = arith.constant 2 : index
    %c0_166 = arith.constant 0 : index
    %178 = vector.load %arg17[%c0_163, %c0_164, %c2_165, %c0_166] : memref<2x10x10x16xf32, #tpu.memory_space<vmem>>, vector<2x8x8x16xf32>
    %179 = vector.shape_cast %178 : vector<2x8x8x16xf32> to vector<128x16xf32>
    %180 = arith.truncf %179 : vector<128x16xf32> to vector<128x16xbf16>
    %c0_167 = arith.constant 0 : index
    %c32_168 = arith.constant 32 : index
    %181 = vector.load %arg18[%c0_167, %c32_168] : memref<128x144xbf16, #tpu.memory_space<vmem>>, vector<128x16xbf16>
    tpu.vector_store %arg18[%c0_167, %c32_168], %180 {strides = array<i32>} : memref<128x144xbf16, #tpu.memory_space<vmem>>, vector<128x16xbf16>,
    %c0_169 = arith.constant 0 : index
    %c1_170 = arith.constant 1 : index
    %c0_171 = arith.constant 0 : index
    %c0_172 = arith.constant 0 : index
    %182 = vector.load %arg17[%c0_169, %c1_170, %c0_171, %c0_172] : memref<2x10x10x16xf32, #tpu.memory_space<vmem>>, vector<2x8x8x16xf32>
    %183 = vector.shape_cast %182 : vector<2x8x8x16xf32> to vector<128x16xf32>
    %184 = arith.truncf %183 : vector<128x16xf32> to vector<128x16xbf16>
    %c0_173 = arith.constant 0 : index
    %c48_174 = arith.constant 48 : index
    %185 = vector.load %arg18[%c0_173, %c48_174] : memref<128x144xbf16, #tpu.memory_space<vmem>>, vector<128x16xbf16>
    tpu.vector_store %arg18[%c0_173, %c48_174], %184 {strides = array<i32>} : memref<128x144xbf16, #tpu.memory_space<vmem>>, vector<128x16xbf16>,
    %c0_175 = arith.constant 0 : index
    %c1_176 = arith.constant 1 : index
    %c1_177 = arith.constant 1 : index
    %c0_178 = arith.constant 0 : index
    %186 = vector.load %arg17[%c0_175, %c1_176, %c1_177, %c0_178] : memref<2x10x10x16xf32, #tpu.memory_space<vmem>>, vector<2x8x8x16xf32>
    %187 = vector.shape_cast %186 : vector<2x8x8x16xf32> to vector<128x16xf32>
    %188 = arith.truncf %187 : vector<128x16xf32> to vector<128x16xbf16>
    %c0_179 = arith.constant 0 : index
    %c64_180 = arith.constant 64 : index
    %189 = vector.load %arg18[%c0_179, %c64_180] : memref<128x144xbf16, #tpu.memory_space<vmem>>, vector<128x16xbf16>
    tpu.vector_store %arg18[%c0_179, %c64_180], %188 {strides = array<i32>} : memref<128x144xbf16, #tpu.memory_space<vmem>>, vector<128x16xbf16>,
    %c0_181 = arith.constant 0 : index
    %c1_182 = arith.constant 1 : index
    %c2_183 = arith.constant 2 : index
    %c0_184 = arith.constant 0 : index
    %190 = vector.load %arg17[%c0_181, %c1_182, %c2_183, %c0_184] : memref<2x10x10x16xf32, #tpu.memory_space<vmem>>, vector<2x8x8x16xf32>
    %191 = vector.shape_cast %190 : vector<2x8x8x16xf32> to vector<128x16xf32>
    %192 = arith.truncf %191 : vector<128x16xf32> to vector<128x16xbf16>
    %c0_185 = arith.constant 0 : index
    %c80_186 = arith.constant 80 : index
    %193 = vector.load %arg18[%c0_185, %c80_186] : memref<128x144xbf16, #tpu.memory_space<vmem>>, vector<128x16xbf16>
    tpu.vector_store %arg18[%c0_185, %c80_186], %192 {strides = array<i32>} : memref<128x144xbf16, #tpu.memory_space<vmem>>, vector<128x16xbf16>,
    %c0_187 = arith.constant 0 : index
    %c2_188 = arith.constant 2 : index
    %c0_189 = arith.constant 0 : index
    %c0_190 = arith.constant 0 : index
    %194 = vector.load %arg17[%c0_187, %c2_188, %c0_189, %c0_190] : memref<2x10x10x16xf32, #tpu.memory_space<vmem>>, vector<2x8x8x16xf32>
    %195 = vector.shape_cast %194 : vector<2x8x8x16xf32> to vector<128x16xf32>
    %196 = arith.truncf %195 : vector<128x16xf32> to vector<128x16xbf16>
    %c0_191 = arith.constant 0 : index
    %c96_192 = arith.constant 96 : index
    %197 = vector.load %arg18[%c0_191, %c96_192] : memref<128x144xbf16, #tpu.memory_space<vmem>>, vector<128x16xbf16>
    tpu.vector_store %arg18[%c0_191, %c96_192], %196 {strides = array<i32>} : memref<128x144xbf16, #tpu.memory_space<vmem>>, vector<128x16xbf16>,
    %c0_193 = arith.constant 0 : index
    %c2_194 = arith.constant 2 : index
    %c1_195 = arith.constant 1 : index
    %c0_196 = arith.constant 0 : index
    %198 = vector.load %arg17[%c0_193, %c2_194, %c1_195, %c0_196] : memref<2x10x10x16xf32, #tpu.memory_space<vmem>>, vector<2x8x8x16xf32>
    %199 = vector.shape_cast %198 : vector<2x8x8x16xf32> to vector<128x16xf32>
    %200 = arith.truncf %199 : vector<128x16xf32> to vector<128x16xbf16>
    %c0_197 = arith.constant 0 : index
    %c112_198 = arith.constant 112 : index
    %201 = vector.load %arg18[%c0_197, %c112_198] : memref<128x144xbf16, #tpu.memory_space<vmem>>, vector<128x16xbf16>
    tpu.vector_store %arg18[%c0_197, %c112_198], %200 {strides = array<i32>} : memref<128x144xbf16, #tpu.memory_space<vmem>>, vector<128x16xbf16>,
    %c0_199 = arith.constant 0 : index
    %c2_200 = arith.constant 2 : index
    %c2_201 = arith.constant 2 : index
    %c0_202 = arith.constant 0 : index
    %202 = vector.load %arg17[%c0_199, %c2_200, %c2_201, %c0_202] : memref<2x10x10x16xf32, #tpu.memory_space<vmem>>, vector<2x8x8x16xf32>
    %203 = vector.shape_cast %202 : vector<2x8x8x16xf32> to vector<128x16xf32>
    %204 = arith.truncf %203 : vector<128x16xf32> to vector<128x16xbf16>
    %c0_203 = arith.constant 0 : index
    %c128_204 = arith.constant 128 : index
    %205 = vector.load %arg18[%c0_203, %c128_204] : memref<128x144xbf16, #tpu.memory_space<vmem>>, vector<128x16xbf16>
    tpu.vector_store %arg18[%c0_203, %c128_204], %204 {strides = array<i32>} : memref<128x144xbf16, #tpu.memory_space<vmem>>, vector<128x16xbf16>,
    %c0_205 = arith.constant 0 : index
    %c0_206 = arith.constant 0 : index
    %206 = vector.load %arg18[%c0_205, %c0_206] : memref<128x144xbf16, #tpu.memory_space<vmem>>, vector<128x144xbf16>
    %c0_207 = arith.constant 0 : index
    %c0_208 = arith.constant 0 : index
    %207 = vector.load %arg8[%c0_207, %c0_208] : memref<144x20xbf16, #tpu.memory_space<vmem>>, vector<144x20xbf16>
    %cst_209 = arith.constant dense<0.000000e+00> : vector<128x20xf32>
    %208 = tpu.matmul %206, %207, %cst_209 {dimension_numbers = #tpu.dot_dimension_numbers<[1], [0], [0], [1], [0, 0, 1, 1], [], []>} : vector<128x144xbf16>, vector<144x20xbf16>, vector<128x20xf32> -> vector<128x20xf32>
    %209 = vector.shape_cast %208 : vector<128x20xf32> to vector<2x64x20xf32>
    %210 = vector.extract_strided_slice %209 {offsets = [0, 0, 0], sizes = [2, 64, 16], strides = [1, 1, 1]} : vector<2x64x20xf32> to vector<2x64x16xf32>
    %211 = vector.broadcast %160 : vector<2x1x16xf32> to vector<2x64x16xf32>
    %212 = arith.mulf %210, %211 : vector<2x64x16xf32>
    %213 = vector.extract_strided_slice %209 {offsets = [0, 0, 16], sizes = [2, 64, 4], strides = [1, 1, 1]} : vector<2x64x20xf32> to vector<2x64x4xf32>
    %c0_210 = arith.constant 0 : index
    %c0_211 = arith.constant 0 : index
    %214 = vector.load %arg13[%c0_210, %c0_211] : memref<2x24xf32, #tpu.memory_space<vmem>>, vector<1x4xf32>
    %215 = vector.shape_cast %214 : vector<1x4xf32> to vector<1x1x4xf32>
    %216 = vector.broadcast %215 : vector<1x1x4xf32> to vector<2x64x4xf32>
    %217 = arith.mulf %213, %216 : vector<2x64x4xf32>
    %c1_212 = arith.constant 1 : index
    %c0_213 = arith.constant 0 : index
    %218 = vector.load %arg13[%c1_212, %c0_213] : memref<2x24xf32, #tpu.memory_space<vmem>>, vector<1x4xf32>
    %219 = vector.shape_cast %218 : vector<1x4xf32> to vector<1x1x4xf32>
    %220 = vector.broadcast %219 : vector<1x1x4xf32> to vector<2x64x4xf32>
    %221 = arith.addf %217, %220 : vector<2x64x4xf32>
    "tpu.trace_start"() <{level = 10 : i32, message = "bmd,bed->bme"}> : () -> ()
    %cst_214 = arith.constant dense<0.000000e+00> : vector<2x64x4xf32>
    %222 = tpu.matmul %221, %150, %cst_214 {dimension_numbers = #tpu.dot_dimension_numbers<[2], [2], [1], [1], [0, 0, 0, 1, 1, 1], [0], [0]>} : vector<2x64x4xf32>, vector<2x4x4xf32>, vector<2x64x4xf32> -> vector<2x64x4xf32>
    "tpu.trace_stop"() : () -> ()
    %c0_215 = arith.constant 0 : index
    %c4_216 = arith.constant 4 : index
    %223 = vector.load %arg13[%c0_215, %c4_216] : memref<2x24xf32, #tpu.memory_space<vmem>>, vector<1x4xf32>
    %224 = vector.shape_cast %223 : vector<1x4xf32> to vector<1x1x4xf32>
    %225 = vector.broadcast %224 : vector<1x1x4xf32> to vector<2x64x4xf32>
    %226 = arith.mulf %222, %225 : vector<2x64x4xf32>
    %c1_217 = arith.constant 1 : index
    %c4_218 = arith.constant 4 : index
    %227 = vector.load %arg13[%c1_217, %c4_218] : memref<2x24xf32, #tpu.memory_space<vmem>>, vector<1x4xf32>
    %228 = vector.shape_cast %227 : vector<1x4xf32> to vector<1x1x4xf32>
    %229 = vector.broadcast %228 : vector<1x1x4xf32> to vector<2x64x4xf32>
    %230 = arith.addf %226, %229 : vector<2x64x4xf32>
    %231 = arith.addf %230, %221 : vector<2x64x4xf32>
    %232 = vector.shape_cast %231 : vector<2x64x4xf32> to vector<128x4xf32>
    %233 = arith.truncf %232 : vector<128x4xf32> to vector<128x4xbf16>
    %c0_219 = arith.constant 0 : index
    %c0_220 = arith.constant 0 : index
    %234 = vector.load %arg12[%c0_219, %c0_220] : memref<4x16xbf16, #tpu.memory_space<vmem>>, vector<4x16xbf16>
    %cst_221 = arith.constant dense<0.000000e+00> : vector<128x16xf32>
    %235 = tpu.matmul %233, %234, %cst_221 {dimension_numbers = #tpu.dot_dimension_numbers<[1], [0], [0], [1], [0, 0, 1, 1], [], []>} : vector<128x4xbf16>, vector<4x16xbf16>, vector<128x16xf32> -> vector<128x16xf32>
    %236 = vector.shape_cast %212 : vector<2x64x16xf32> to vector<128x16xf32>
    %237 = arith.addf %235, %236 : vector<128x16xf32>
    %c0_222 = arith.constant 0 : index
    %c8_223 = arith.constant 8 : index
    %238 = vector.load %arg13[%c0_222, %c8_223] : memref<2x24xf32, #tpu.memory_space<vmem>>, vector<1x16xf32>
    %239 = vector.broadcast %238 : vector<1x16xf32> to vector<128x16xf32>
    %240 = arith.mulf %237, %239 : vector<128x16xf32>
    %c1_224 = arith.constant 1 : index
    %c8_225 = arith.constant 8 : index
    %241 = vector.load %arg13[%c1_224, %c8_225] : memref<2x24xf32, #tpu.memory_space<vmem>>, vector<1x16xf32>
    %242 = vector.broadcast %241 : vector<1x16xf32> to vector<128x16xf32>
    %243 = arith.addf %240, %242 : vector<128x16xf32>
    %cst_226 = arith.constant 0.000000e+00 : f32
    %244 = vector.broadcast %cst_226 : f32 to vector<128x16xf32>
    %245 = arith.maximumf %243, %244 : vector<128x16xf32>
    %c0_227 = arith.constant 0 : index
    %c0_228 = arith.constant 0 : index
    %246 = vector.load %arg14[%c0_227, %c0_228] : memref<128x16xf32, #tpu.memory_space<vmem>>, vector<128x16xf32>
    tpu.vector_store %arg14[%c0_227, %c0_228], %245 {strides = array<i32>} : memref<128x16xf32, #tpu.memory_space<vmem>>, vector<128x16xf32>,
    return
  }
  func.func @transform_0(%arg0: i32) -> (i32, i32, i32, i32) {
    %c0_i32 = arith.constant 0 : i32
    %c0_i32_0 = arith.constant 0 : i32
    %c0_i32_1 = arith.constant 0 : i32
    %c0_i32_2 = arith.constant 0 : i32
    return %arg0, %c0_i32, %c0_i32_0, %c0_i32_1 : i32, i32, i32, i32
  }
  func.func @transform_1(%arg0: i32) -> (i32, i32) {
    %c0_i32 = arith.constant 0 : i32
    %c0_i32_0 = arith.constant 0 : i32
    %c0_i32_1 = arith.constant 0 : i32
    return %c0_i32, %c0_i32_0 : i32, i32
  }
  func.func @transform_2(%arg0: i32) -> (i32, i32) {
    %c0_i32 = arith.constant 0 : i32
    %c0_i32_0 = arith.constant 0 : i32
    %c0_i32_1 = arith.constant 0 : i32
    return %c0_i32, %c0_i32_0 : i32, i32
  }
  func.func @transform_3(%arg0: i32) -> (i32, i32) {
    %c0_i32 = arith.constant 0 : i32
    %c0_i32_0 = arith.constant 0 : i32
    %c0_i32_1 = arith.constant 0 : i32
    return %c0_i32, %c0_i32_0 : i32, i32
  }
  func.func @transform_4(%arg0: i32) -> (i32, i32) {
    %c0_i32 = arith.constant 0 : i32
    %c0_i32_0 = arith.constant 0 : i32
    %c0_i32_1 = arith.constant 0 : i32
    return %c0_i32, %c0_i32_0 : i32, i32
  }
  func.func @transform_5(%arg0: i32) -> (i32, i32) {
    %c0_i32 = arith.constant 0 : i32
    %c0_i32_0 = arith.constant 0 : i32
    %c0_i32_1 = arith.constant 0 : i32
    return %c0_i32, %c0_i32_0 : i32, i32
  }
  func.func @transform_6(%arg0: i32) -> (i32, i32) {
    %c0_i32 = arith.constant 0 : i32
    %c0_i32_0 = arith.constant 0 : i32
    %c0_i32_1 = arith.constant 0 : i32
    return %c0_i32, %c0_i32_0 : i32, i32
  }
  func.func @transform_7(%arg0: i32) -> (i32, i32) {
    %c0_i32 = arith.constant 0 : i32
    %c0_i32_0 = arith.constant 0 : i32
    %c0_i32_1 = arith.constant 0 : i32
    return %c0_i32, %c0_i32_0 : i32, i32
  }
  func.func @transform_8(%arg0: i32) -> (i32, i32) {
    %c0_i32 = arith.constant 0 : i32
    %c0_i32_0 = arith.constant 0 : i32
    %c0_i32_1 = arith.constant 0 : i32
    return %c0_i32, %c0_i32_0 : i32, i32
  }
  func.func @transform_9(%arg0: i32) -> (i32, i32) {
    %c0_i32 = arith.constant 0 : i32
    %c0_i32_0 = arith.constant 0 : i32
    %c0_i32_1 = arith.constant 0 : i32
    return %c0_i32, %c0_i32_0 : i32, i32
  }
  func.func @transform_10(%arg0: i32) -> (i32, i32) {
    %c0_i32 = arith.constant 0 : i32
    %c0_i32_0 = arith.constant 0 : i32
    %c0_i32_1 = arith.constant 0 : i32
    return %c0_i32, %c0_i32_0 : i32, i32
  }
  func.func @transform_11(%arg0: i32) -> (i32, i32) {
    %c0_i32 = arith.constant 0 : i32
    %c0_i32_0 = arith.constant 0 : i32
    %c0_i32_1 = arith.constant 0 : i32
    return %c0_i32, %c0_i32_0 : i32, i32
  }
  func.func @transform_12(%arg0: i32) -> (i32, i32) {
    %c0_i32 = arith.constant 0 : i32
    %c0_i32_0 = arith.constant 0 : i32
    %c0_i32_1 = arith.constant 0 : i32
    return %c0_i32, %c0_i32_0 : i32, i32
  }
  func.func @transform_13(%arg0: i32) -> (i32, i32) {
    %c0_i32 = arith.constant 0 : i32
    %c0_i32_0 = arith.constant 0 : i32
    return %arg0, %c0_i32 : i32, i32
  }
}

</mosaic_0001>

<bundles_post_ra>
// kernel: dcw_forward.1
= control target key start
LH: loop header
LB: loop body
LE: loop exit
PB: predicated region body
PF: predicated region fallthrough
CT: control target
= control target key end

     0   :  { %s6815_s0 = inlined_call_operand.vmem [shape: f32[4,8,8,16], index: 0, kind: input, shape index: {}]   ;;  %s6816_s1 = inlined_call_operand.vmem [shape: bf16[144,20], index: 1, kind: input, shape index: {}]   ;;  %s6817_s2 = inlined_call_operand.vmem [shape: f32[16,4], index: 2, kind: input, shape index: {}]   ;;  %s6818_s3 = inlined_call_operand.vmem [shape: f32[4,4], index: 3, kind: input, shape index: {}]   ;;  %s6819_s4 = inlined_call_operand.vmem [shape: f32[4,32], index: 4, kind: input, shape index: {}]   ;;  %s6820_s5 = inlined_call_operand.vmem [shape: bf16[4,16], index: 5, kind: input, shape index: {}]   ;;  %s6821_s6 = inlined_call_operand.vmem [shape: f32[2,24], index: 6, kind: input, shape index: {}]   ;;  %s6822_s7 = inlined_call_operand.vmem [shape: bf16[144,20], index: 7, kind: input, shape index: {}]   ;;  %s6823_s8 = inlined_call_operand.vmem [shape: f32[16,4], index: 8, kind: input, shape index: {}]   ;;  %s6824_s9 = inlined_call_operand.vmem [shape: f32[4,4], index: 9, kind: input, shape index: {}]   ;;  %s6825_s10 = inlined_call_operand.vmem [shape: f32[4,32], index: 10, kind: input, shape index: {}]   ;;  %s6826_s11 = inlined_call_operand.vmem [shape: bf16[4,16], index: 11, kind: input, shape index: {}]   ;;  %s6827_s12 = inlined_call_operand.vmem [shape: f32[2,24], index: 12, kind: input, shape index: {}]   ;;  %s6828_s13 = inlined_call_operand.hbm [shape: f32[256,16], index: 13, kind: output, shape index: {}]  }
   0x1   :  { %6849 = sst [smem:[#allocation9_spill]] %s6815_s0 }
   0x2   :  { %6850 = sst [smem:[#allocation10_spill]] %s6816_s1 }
   0x3   :  { %6851 = sst [smem:[#allocation11_spill]] %s6817_s2 }
   0x4   :  { %18 = vsyncpa [#allocation7], 0 }
   0x5   :  { %20 = vsyncpa [#allocation7 + $0x1], 0  ;;  %s4821_s25 = smov 0   ;;  %s4823_s26 = smov 0  }
   0x6   :  { %s4825_s27 = smov 0   ;;  %s4827_s28 = smov 0  }
   0x7 LB: > { %s4842_s29 = sadd.s32 4294967295, %s4736_s28   ;;  %s4269_s30 = sadd.s32 4294967294, %s4736_s28   ;;  %s4736_s28 = sphi %s4827_s28, %s6870_s28   ;;  %s4732_s27 = sphi %s4825_s27, %s6869_s27   ;;  %s4728_s26 = sphi %s4823_s26, %s6868_s26   ;;  %s4724_s25 = sphi %s4821_s25, %s6867_s25  }
   0x8   : > { %s4846_s14 = sadd.s32 1, %s4736_s28   ;;  %s311_s15 = sadd.s32 1, %s4732_s27 }
   0x9   : > { %s308_s16 = ssub.s32 %s4736_s28, %s4846_s14  ;;  %p321_p0 = scmp.ne.s32.totalorder %s4732_s27, %s4728_s26 }
   0xa   : > { %p309_p1 = scmp.eq.s32.totalorder %s308_s16, 0  ;;  %p322_p2 = scmp.eq.s32.totalorder %s4842_s29, 1 }
   0xb   : > { %p327_p3 = scmp.ne.s32.totalorder %s4728_s26, %s4724_s25  ;;  %p328_p4 = scmp.eq.s32.totalorder %s4269_s30, 1 }
   0xc   : > { %s4857_s17 = scalar_select %p309_p1, %s4732_s27, %s311_s15  }
   0xd   : > { %p4859_p5 = por %p322_p2, %p321_p0  ;;  %p4863_p6 = por %p328_p4, %p327_p3 }
   0xe   : > { %p4272_p7 = scmp.ge.s32.totalorder %s4736_s28, 1  ;;  %p392_p8 = scmp.lt.s32.totalorder %s4736_s28, 3 }
  0x10   : > { %p393_p9 = pnand %p4272_p7, %p392_p8 }
  0x11   : > { %s6833_s20 = smov (!%p393_p9), 16   ;;  %s6829_s21 = smov (!%p393_p9), 32  }
  0x12   : > { %396 = sbr.rel (%p393_p9) target bundleno = 2037 (0x7f5), region = 72  ;;  %s4274_s22 = sshll.u32 (!%p393_p9), %s4842_s29, 1 }
  0x13   : > { %p438_p10 = scmp.lt.s32.totalorder (!%p393_p9), %s4274_s22, 3  ;;  %s6854_s0 = sld [smem:[#allocation9_spill]] (!%p393_p9) }
  0x14   : > { %s6855_s2 = sld [smem:[#allocation11_spill]] (!%p393_p9)  ;;  %s6831_s30 = smov (!%p393_p9), 48  }
  0x15   : > { %s6835_s16 = smov (!%p393_p9), 80   ;;  %s6856_s1 = sld [smem:[#allocation10_spill]] (!%p393_p9) }
  0x16   : > { %s6860_s24 = smov (!%p393_p9), 64  }
  0x17   : > { %vm462_vm0 = vcmask 130048   ;;  %vm636_vm1 = vcmask 123904   ;;  %v4738_v0 = vmov 0.0   ;;  %vm645_vm2 = vcmask 122880   ;;  %s6872_s22 = smov (!%p438_p10, %s4274_s22), 3 }
  0x18   : > { %635 = vst.msk [vmem:[#allocation2] sm:$0xff] %vm462_vm0, %v4738_v0  ;;  %s4560_s23 = sshll.u32 %s6872_s22, 6  ;;  %vm511_vm3 = vcmask 1041409   ;;  %s6839_s22 = smov 96   ;;  %vm735_vm4 = vcmask 125952   ;;  %vm848_vm5 = vcmask 257152  }
  0x19   : > { %637 = vst.msk [vmem:[#allocation2 + $0x8] sm:$0x3] %vm636_vm1, %v4738_v0  ;;  %s4991_s15 = scalar_lea.vmem %s6854_s0, %s4560_s23  ;;  %s6841_s23 = smov 112   ;;  %vm961_vm6 = vcmask 388352   ;;  %vm1074_vm7 = vcmask 519552   ;;  %vm540_vm8 = vcmask 1043456  }
  0x1a   : > { %2501 = vst.msk [vmem:[#allocation4 + $0x138] sm:$0x3] %vm636_vm1, %v4738_v0  ;;  %v5000_v5 = vld [vmem:[%s4991_s15] sm:$0xff]  ;;  %v5007_v6 = vld [vmem:[%s4991_s15 + $0x8] sm:$0xff]  ;;  %v5028_v13 = vld [vmem:[%s4991_s15 + $0x10] sm:$0xff]  ;;  %vm536_vm9 = vcmask 31744  }
  0x1b   : > { %2541 = vst.msk [vmem:[#allocation4 + $0x139] sm:$0x1] %vm645_vm2, %v4738_v0  ;;  %v5010_v7 = vld [vmem:[%s4991_s15 + $0x40] sm:$0xff]  ;;  %v5013_v8 = vld [vmem:[%s4991_s15 + $0x48] sm:$0xff]  ;;  %v463_v9 = vsel %vm462_vm0, %v5000_v5, 0.0  ;;  %v464_v10 = vsel %vm462_vm0, %v5007_v6, 0.0 }
  0x1c   : > { %646 = vst.msk [vmem:[#allocation2] sm:$0x1] %vm645_vm2, %v4738_v0  ;;  %v484_v11 = vsel %vm462_vm0, %v5010_v7, 0.0  ;;  %v485_v12 = vsel %vm462_vm0, %v5013_v8, 0.0  ;;  %v5031_v14 = vld [vmem:[%s4991_s15 + $0x50] sm:$0xff]  ;;  %v465_v15 = vadd.f32 %v464_v10, %v463_v9  ;;  %v466_v17 = vsel %vm462_vm0, %v5028_v13, 0.0 }
  0x1d   : > { %638 = vst.msk [vmem:[#allocation2 + $0xa0] sm:$0xff] %vm462_vm0, %v4738_v0  ;;  %v486_v16 = vadd.f32 %v485_v12, %v484_v11  ;;  %v487_v18 = vsel %vm462_vm0, %v5031_v14, 0.0  ;;  %v5042_v19 = vld [vmem:[%s4991_s15 + $0x18] sm:$0xff]  ;;  %v5056_v25 = vld [vmem:[%s4991_s15 + $0x20] sm:$0xff]  ;;  %v5070_v31 = vld [vmem:[%s4991_s15 + $0x28] sm:$0xff]  ;;  %vm1187_vm10 = vcmask 650752  }
  0x1e   : > { %639 = vst.msk [vmem:[#allocation2 + $0xa8] sm:$0x3] %vm636_vm1, %v4738_v0  ;;  %v5045_v20 = vld [vmem:[%s4991_s15 + $0x58] sm:$0xff]  ;;  %v467_v21 = vadd.f32 %v466_v17, %v465_v15  ;;  %v468_v23 = vsel %vm462_vm0, %v5042_v19, 0.0  ;;  %v5059_v26 = vld [vmem:[%s4991_s15 + $0x60] sm:$0xff]  ;;  %v470_v29 = vsel %vm462_vm0, %v5056_v25, 0.0 }
  0x1f   : > { %641 = vst.msk [vmem:[#allocation2 + $0x90] sm:$0xff] %vm462_vm0, %v4738_v0  ;;  %v488_v22 = vadd.f32 %v487_v18, %v486_v16  ;;  %v489_v24 = vsel %vm462_vm0, %v5045_v20, 0.0  ;;  %v491_v30 = vsel %vm462_vm0, %v5059_v26, 0.0  ;;  %v5073_v32 = vld [vmem:[%s4991_s15 + $0x68] sm:$0xff]  ;;  %v472_v35 = vsel %vm462_vm0, %v5070_v31, 0.0  ;;  %v5084_v37 = vld [vmem:[%s4991_s15 + $0x30] sm:$0xff] }
  0x20   : > { %v752_v1 = vld [vmem:[#allocation2 + $0x1] sm:$0xff]  ;;  %642 = vst.msk [vmem:[#allocation2 + $0x98] sm:$0x3] %vm636_vm1, %v4738_v0  ;;  %v469_v27 = vadd.f32 %v468_v23, %v467_v21  ;;  %v493_v36 = vsel %vm462_vm0, %v5073_v32, 0.0  ;;  %v5087_v38 = vld [vmem:[%s4991_s15 + $0x70] sm:$0xff]  ;;  %v474_v41 = vsel %vm462_vm0, %v5084_v37, 0.0 }
  0x21   : > { %v768_v2 = vpack.c.bf16 %v752_v1, %v752_v1  ;;  %643 = vst.msk [vmem:[#allocation2 + $0x130] sm:$0xff] %vm462_vm0, %v4738_v0  ;;  %v490_v28 = vadd.f32 %v489_v24, %v488_v22  ;;  %v495_v42 = vsel %vm462_vm0, %v5087_v38, 0.0  ;;  %v453_v43 = vld [vmem:[%s4991_s15 + $0x38] sm:$0xff]  ;;  %v508_v55 = vld [vmem:[%s6855_s2 + $0x8] sm:$0xff]  ;;  %v507_v1 = vld [vmem:[%s6855_s2] sm:$0xff]  ;;  %vm1300_vm11 = vcmask 781952  }
  0x22   : > { %644 = vst.msk [vmem:[#allocation2 + $0x138] sm:$0x3] %vm636_vm1, %v4738_v0  ;;  %v471_v33 = vadd.f32 %v470_v29, %v469_v27  ;;  %v5099_v44 = vld [vmem:[%s4991_s15 + $0x78] sm:$0xff]  ;;  %v476_v47 = vsel %vm462_vm0, %v453_v43, 0.0  ;;  %529 = vmatpush.msra.mxu0 %v508_v55  ;;  %s6837_s15 = smov 64   ;;  %v4581_v55 = vld [vmem:[%s6856_s1 + $0x20] sm:$0xff] }
  0x23   : > { %800 = vrot.lane.b32.xlu0 %v768_v2, %s6833_s20  ;;  %647 = vst.msk [vmem:[#allocation2 + $0x10] sm:$0x1] %vm645_vm2, %v4738_v0  ;;  %v492_v34 = vadd.f32 %v491_v30, %v490_v28  ;;  %v497_v48 = vsel %vm462_vm0, %v5099_v44, 0.0  ;;  %s6862_s0 = smov 96   ;;  %vm1414_vm12 = vcmask 913152   ;;  %vm1527_vm13 = vcmask 1044352  }
  0x24   : > { %648 = vst.msk [vmem:[#allocation2 + $0x20] sm:$0x1] %vm645_vm2, %v4738_v0  ;;  %v473_v39 = vadd.f32 %v472_v35, %v471_v33  ;;  %530 = vmatpush.msra.mxu0 %v507_v1  ;;  %s6847_s2 = smov 120   ;;  %vm618_vm14 = vcmask 1040384   ;;  %vm621_vm15 = vcmask 1041408  }
  0x25   : > { %649 = vst.msk [vmem:[#allocation2 + $0x30] sm:$0x1] %vm645_vm2, %v4738_v0  ;;  %v494_v40 = vadd.f32 %v493_v36, %v492_v34  ;;  %v703_v34 = vld [vmem:[#allocation2] sm:$0xff] }
  0x26   : > { %650 = vst.msk [vmem:[#allocation2 + $0x40] sm:$0x1] %vm645_vm2, %v4738_v0  ;;  %v475_v45 = vadd.f32 %v474_v41, %v473_v39  ;;  %v719_v36 = vpack.c.bf16 %v703_v34, %v703_v34 }
  0x27   : > { %651 = vst.msk [vmem:[#allocation2 + $0x50] sm:$0x1] %vm645_vm2, %v4738_v0  ;;  %v496_v46 = vadd.f32 %v495_v42, %v494_v40 }
  0x28   : > { %652 = vst.msk [vmem:[#allocation2 + $0x60] sm:$0x1] %vm645_vm2, %v4738_v0  ;;  %v477_v49 = vadd.f32 %v476_v47, %v475_v45 }
  0x29   : > { %653 = vst.msk [vmem:[#allocation2 + $0x70] sm:$0x1] %vm645_vm2, %v4738_v0  ;;  %v498_v50 = vadd.f32 %v497_v48, %v496_v46  ;;  %v4584_v46 = vld [vmem:[%s6856_s1 + $0x38] sm:$0xff] }
  0x2a   : > { %654 = vst.msk [vmem:[#allocation2 + $0x80] sm:$0x1] %vm645_vm2, %v4738_v0  ;;  %v478_v51 = vrot.slane %v477_v49, 4  ;;  %1776 = vmatpush.bf16.msra.mxu3 %v4584_v46 }
  0x2b   : > { %657 = vst.msk [vmem:[#allocation2 + $0xb0] sm:$0x1] %vm645_vm2, %v4738_v0  ;;  %v499_v52 = vrot.slane %v498_v50, 4 }
  0x2c   : > { %658 = vst.msk [vmem:[#allocation2 + $0xc0] sm:$0x1] %vm645_vm2, %v4738_v0  ;;  %v479_v53 = vadd.f32 %v478_v51, %v477_v49  ;;  %v4583_v49 = vld [vmem:[%s6856_s1 + $0x30] sm:$0xff]  ;;  %v4582_v51 = vld [vmem:[%s6856_s1 + $0x28] sm:$0xff] }
  0x2d   : > { %659 = vst.msk [vmem:[#allocation2 + $0xd0] sm:$0x1] %vm645_vm2, %v4738_v0  ;;  %v500_v54 = vadd.f32 %v499_v52, %v498_v50 }
  0x2e   : > { %660 = vst.msk [vmem:[#allocation2 + $0xe0] sm:$0x1] %vm645_vm2, %v4738_v0  ;;  %v480_v56 = vrot.slane %v479_v53, 2  ;;  %1777 = vmatpush.bf16.msra.mxu3 %v4583_v49 }
  0x2f   : > { %661 = vst.msk [vmem:[#allocation2 + $0xf0] sm:$0x1] %vm645_vm2, %v4738_v0  ;;  %v501_v57 = vrot.slane %v500_v54, 2 }
  0x30   : > { %662 = vst.msk [vmem:[#allocation2 + $0x100] sm:$0x1] %vm645_vm2, %v4738_v0  ;;  %v481_v58 = vadd.f32 %v480_v56, %v479_v53 }
  0x31   : > { %663 = vst.msk [vmem:[#allocation2 + $0x110] sm:$0x1] %vm645_vm2, %v4738_v0  ;;  %v502_v59 = vadd.f32 %v501_v57, %v500_v54 }
  0x32   : > { %664 = vst.msk [vmem:[#allocation2 + $0x120] sm:$0x1] %vm645_vm2, %v4738_v0  ;;  %v482_v60 = vrot.slane %v481_v58, 1  ;;  %1778 = vmatpush.bf16.msra.mxu3 %v4582_v51 }
  0x33   : > { %666 = vst.msk [vmem:[#allocation2 + $0x9] sm:$0x1] %vm645_vm2, %v4738_v0  ;;  %v503_v61 = vrot.slane %v502_v59, 1 }
  0x34   : > { %667 = vst.msk [vmem:[#allocation2 + $0x19] sm:$0x1] %vm645_vm2, %v4738_v0  ;;  %v483_v62 = vadd.f32 %v482_v60, %v481_v58  ;;  %v4580_v58 = vld [vmem:[%s6856_s1 + $0x18] sm:$0xff] }
  0x35   : > { %668 = vst.msk [vmem:[#allocation2 + $0x29] sm:$0x1] %vm645_vm2, %v4738_v0  ;;  %v504_v63 = vadd.f32 %v503_v61, %v502_v59  ;;  %v4579_v59 = vld [vmem:[%s6856_s1 + $0x10] sm:$0xff]  ;;  %v4578_v61 = vld [vmem:[%s6856_s1 + $0x8] sm:$0xff] }
  0x36   : > { %669 = vst.msk [vmem:[#allocation2 + $0x39] sm:$0x1] %vm645_vm2, %v4738_v0  ;;  %v505_v2 = vmul.f32 0.015625, %v483_v62  ;;  %1779 = vmatpush.bf16.msra.mxu3 %v4581_v55  ;;  %v535_v62 = vld [vmem:[%s6818_s3] sm:$0xf] }
  0x37   : > { %670 = vst.msk [vmem:[#allocation2 + $0x49] sm:$0x1] %vm645_vm2, %v4738_v0  ;;  %4278 = vmatpush.msk.msra.mxu2 %vm540_vm8, %v535_v62 }
  0x38   : > { %671 = vst.msk [vmem:[#allocation2 + $0x59] sm:$0x1] %vm645_vm2, %v4738_v0 }
  0x39   : > { %672 = vst.msk [vmem:[#allocation2 + $0x69] sm:$0x1] %vm645_vm2, %v4738_v0 }
  0x3a   : > { %673 = vst.msk [vmem:[#allocation2 + $0x79] sm:$0x1] %vm645_vm2, %v4738_v0  ;;  %v865_v3 = vld [vmem:[#allocation2 + $0x2] sm:$0xff]  ;;  %1780 = vmatpush.bf16.msra.mxu3 %v4580_v58 }
  0x3b   : > { %674 = vst.msk [vmem:[#allocation2 + $0x89] sm:$0x1] %vm645_vm2, %v4738_v0  ;;  %v881_v4 = vpack.c.bf16 %v865_v3, %v865_v3  ;;  %v506_v3 = vmul.f32 0.015625, %v504_v63 }
  0x3c   : > { %677 = vst.msk [vmem:[#allocation2 + $0xb9] sm:$0x1] %vm645_vm2, %v4738_v0 }
  0x3d   : > { %678 = vst.msk [vmem:[#allocation2 + $0xc9] sm:$0x1] %vm645_vm2, %v4738_v0  ;;  %913 = vrot.lane.b32.xlu1 %v881_v4, %s6829_s21  ;;  %v512_v4 = vsel %vm511_vm3, %v506_v3, %v505_v2  ;;  %v4577_v2 = vld [vmem:[%s6856_s1] sm:$0xff] }
  0x3e   : > { %679 = vst.msk [vmem:[#allocation2 + $0xd9] sm:$0x1] %vm645_vm2, %v4738_v0  ;;  %4277 = vmatmul.msk.f32.vlgmr.msra.gmra.mxu0 %vm462_vm0, %v512_v4  ;;  %1781 = vmatpush.bf16.msra.mxu3 %v4579_v59 }
  0x3f   : > { %680 = vst.msk [vmem:[#allocation2 + $0xe9] sm:$0x1] %vm645_vm2, %v4738_v0 }
  0x40   : > { %681 = vst.msk [vmem:[#allocation2 + $0xf9] sm:$0x1] %vm645_vm2, %v4738_v0 }
  0x41   : > { %682 = vst.msk [vmem:[#allocation2 + $0x109] sm:$0x1] %vm645_vm2, %v4738_v0 }
  0x42   : > { %683 = vst.msk [vmem:[#allocation2 + $0x119] sm:$0x1] %vm645_vm2, %v4738_v0  ;;  %1782 = vmatpush.bf16.msra.mxu3 %v4578_v61 }
  0x43   : > { %684 = vst.msk [vmem:[#allocation2 + $0x129] sm:$0x1] %vm645_vm2, %v4738_v0 }
  0x44   : > { %2493 = vst.msk [vmem:[#allocation4] sm:$0xff] %vm462_vm0, %v4738_v0 }
  0x45   : > { %2494 = vst.msk [vmem:[#allocation4 + $0x8] sm:$0x3] %vm636_vm1, %v4738_v0 }
  0x46   : > { %2495 = vst.msk [vmem:[#allocation4 + $0xa0] sm:$0xff] %vm462_vm0, %v4738_v0  ;;  %1783 = vmatpush.bf16.msra.mxu3 %v4577_v2 }
  0x47   : > { %2496 = vst.msk [vmem:[#allocation4 + $0xa8] sm:$0x3] %vm636_vm1, %v4738_v0 }
  0x48   : > { %2498 = vst.msk [vmem:[#allocation4 + $0x90] sm:$0xff] %vm462_vm0, %v4738_v0 }
  0x49   : > { %2499 = vst.msk [vmem:[#allocation4 + $0x98] sm:$0x3] %vm636_vm1, %v4738_v0  ;;  %vm624_vm1 = vcmask 1042432  }
  0x4a   : > { %2500 = vst.msk [vmem:[#allocation4 + $0x130] sm:$0xff] %vm462_vm0, %v4738_v0 }
  0x4b   : > { %2503 = vst.msk [vmem:[#allocation4 + $0x10] sm:$0x1] %vm645_vm2, %v4738_v0 }
  0x4c   : > { %2504 = vst.msk [vmem:[#allocation4 + $0x20] sm:$0x1] %vm645_vm2, %v4738_v0 }
  0x4d   : > { %2505 = vst.msk [vmem:[#allocation4 + $0x30] sm:$0x1] %vm645_vm2, %v4738_v0 }
  0x4e   : > { %2506 = vst.msk [vmem:[#allocation4 + $0x40] sm:$0x1] %vm645_vm2, %v4738_v0 }
  0x4f   : > { %2507 = vst.msk [vmem:[#allocation4 + $0x50] sm:$0x1] %vm645_vm2, %v4738_v0 }
  0x50   : > { %2508 = vst.msk [vmem:[#allocation4 + $0x60] sm:$0x1] %vm645_vm2, %v4738_v0 }
  0x51   : > { %2509 = vst.msk [vmem:[#allocation4 + $0x70] sm:$0x1] %vm645_vm2, %v4738_v0 }
  0x52   : > { %2510 = vst.msk [vmem:[#allocation4 + $0x80] sm:$0x1] %vm645_vm2, %v4738_v0 }
  0x53   : > { %2513 = vst.msk [vmem:[#allocation4 + $0xb0] sm:$0x1] %vm645_vm2, %v4738_v0 }
  0x54   : > { %2514 = vst.msk [vmem:[#allocation4 + $0xc0] sm:$0x1] %vm645_vm2, %v4738_v0 }
  0x55   : > { %2515 = vst.msk [vmem:[#allocation4 + $0xd0] sm:$0x1] %vm645_vm2, %v4738_v0 }
  0x56   : > { %2516 = vst.msk [vmem:[#allocation4 + $0xe0] sm:$0x1] %vm645_vm2, %v4738_v0 }
  0x57   : > { %2517 = vst.msk [vmem:[#allocation4 + $0xf0] sm:$0x1] %vm645_vm2, %v4738_v0 }
  0x58   : > { %2518 = vst.msk [vmem:[#allocation4 + $0x100] sm:$0x1] %vm645_vm2, %v4738_v0 }
  0x59   : > { %2519 = vst.msk [vmem:[#allocation4 + $0x110] sm:$0x1] %vm645_vm2, %v4738_v0 }
  0x5a   : > { %2520 = vst.msk [vmem:[#allocation4 + $0x120] sm:$0x1] %vm645_vm2, %v4738_v0 }
  0x5b   : > { %2523 = vst.msk [vmem:[#allocation4 + $0x19] sm:$0x1] %vm645_vm2, %v4738_v0 }
  0x5c   : > { %2524 = vst.msk [vmem:[#allocation4 + $0x29] sm:$0x1] %vm645_vm2, %v4738_v0 }
  0x5d   : > { %2525 = vst.msk [vmem:[#allocation4 + $0x39] sm:$0x1] %vm645_vm2, %v4738_v0 }
  0x5e   : > { %2526 = vst.msk [vmem:[#allocation4 + $0x49] sm:$0x1] %vm645_vm2, %v4738_v0 }
  0x5f   : > { %2527 = vst.msk [vmem:[#allocation4 + $0x59] sm:$0x1] %vm645_vm2, %v4738_v0 }
  0x60   : > { %2528 = vst.msk [vmem:[#allocation4 + $0x69] sm:$0x1] %vm645_vm2, %v4738_v0 }
  0x61   : > { %2529 = vst.msk [vmem:[#allocation4 + $0x79] sm:$0x1] %vm645_vm2, %v4738_v0 }
  0x62   : > { %2530 = vst.msk [vmem:[#allocation4 + $0x89] sm:$0x1] %vm645_vm2, %v4738_v0 }
  0x63   : > { %2533 = vst.msk [vmem:[#allocation4 + $0xb9] sm:$0x1] %vm645_vm2, %v4738_v0 }
  0x64   : > { %2534 = vst.msk [vmem:[#allocation4 + $0xc9] sm:$0x1] %vm645_vm2, %v4738_v0 }
  0x65   : > { %2535 = vst.msk [vmem:[#allocation4 + $0xd9] sm:$0x1] %vm645_vm2, %v4738_v0 }
  0x66   : > { %2536 = vst.msk [vmem:[#allocation4 + $0xe9] sm:$0x1] %vm645_vm2, %v4738_v0 }
  0x67   : > { %2537 = vst.msk [vmem:[#allocation4 + $0xf9] sm:$0x1] %vm645_vm2, %v4738_v0 }
  0x68   : > { %2538 = vst.msk [vmem:[#allocation4 + $0x109] sm:$0x1] %vm645_vm2, %v4738_v0 }
  0x69   : > { %2539 = vst.msk [vmem:[#allocation4 + $0x119] sm:$0x1] %vm645_vm2, %v4738_v0 }
  0x6a   : > { %2540 = vst.msk [vmem:[#allocation4 + $0x129] sm:$0x1] %vm645_vm2, %v4738_v0 }
  0x6b   : > { %655 = vst.msk [vmem:[#allocation2 + $0x90] sm:$0x1] %vm645_vm2, %v4738_v0 }
  0x6c   : > { %656 = vst.msk [vmem:[#allocation2 + $0xa0] sm:$0x1] %vm645_vm2, %v4738_v0 }
  0x6d   : > { %665 = vst.msk [vmem:[#allocation2 + $0x130] sm:$0x1] %vm645_vm2, %v4738_v0 }
  0x6e   : > { %675 = vst.msk [vmem:[#allocation2 + $0x99] sm:$0x1] %vm645_vm2, %v4738_v0 }
  0x6f   : > { %676 = vst.msk [vmem:[#allocation2 + $0xa9] sm:$0x1] %vm645_vm2, %v4738_v0 }
  0x70   : > { %685 = vst.msk [vmem:[#allocation2 + $0x139] sm:$0x1] %vm645_vm2, %v4738_v0 }
  0x71   : > { %2502 = vst.msk [vmem:[#allocation4] sm:$0x1] %vm645_vm2, %v4738_v0 }
  0x72   : > { %2511 = vst.msk [vmem:[#allocation4 + $0x90] sm:$0x1] %vm645_vm2, %v4738_v0 }
  0x73   : > { %2512 = vst.msk [vmem:[#allocation4 + $0xa0] sm:$0x1] %vm645_vm2, %v4738_v0 }
  0x74   : > { %2521 = vst.msk [vmem:[#allocation4 + $0x130] sm:$0x1] %vm645_vm2, %v4738_v0 }
  0x75   : > { %2522 = vst.msk [vmem:[#allocation4 + $0x9] sm:$0x1] %vm645_vm2, %v4738_v0 }
  0x76   : > { %2531 = vst.msk [vmem:[#allocation4 + $0x99] sm:$0x1] %vm645_vm2, %v4738_v0 }
  0x77   : > { %2532 = vst.msk [vmem:[#allocation4 + $0xa9] sm:$0x1] %vm645_vm2, %v4738_v0 }
  0x78   : > { %687 = vst.msk [vmem:[#allocation2 + $0x11] sm:$0xff] %vm462_vm0, %v5000_v5 }
  0x79   : > { %688 = vst.msk [vmem:[#allocation2 + $0x21] sm:$0xff] %vm462_vm0, %v5007_v6 }
  0x7a   : > { %689 = vst.msk [vmem:[#allocation2 + $0x31] sm:$0xff] %vm462_vm0, %v5028_v13 }
  0x7b   : > { %690 = vst.msk [vmem:[#allocation2 + $0x41] sm:$0xff] %vm462_vm0, %v5042_v19 }
  0x7c   : > { %691 = vst.msk [vmem:[#allocation2 + $0x51] sm:$0xff] %vm462_vm0, %v5056_v25 }
  0x7d   : > { %692 = vst.msk [vmem:[#allocation2 + $0x61] sm:$0xff] %vm462_vm0, %v5070_v31 }
  0x7e   : > { %693 = vst.msk [vmem:[#allocation2 + $0x71] sm:$0xff] %vm462_vm0, %v5084_v37 }
  0x7f   : > { %v753_v0 = vld [vmem:[#allocation2 + $0x11] sm:$0xff]  ;;  %694 = vst.msk [vmem:[#allocation2 + $0x81] sm:$0xff] %vm462_vm0, %v453_v43 }
  0x80   : > { %v866_v5 = vld [vmem:[#allocation2 + $0x12] sm:$0xff]  ;;  %v769_v6 = vpack.c.bf16 %v753_v0, %v753_v0  ;;  %695 = vst.msk [vmem:[#allocation2 + $0xb1] sm:$0xff] %vm462_vm0, %v5010_v7  ;;  %v1092_v12 = vld [vmem:[#allocation2 + $0x21] sm:$0xff] }
  0x81   : > { %v978_v9 = vld [vmem:[#allocation2 + $0x10] sm:$0xff]  ;;  %v882_v10 = vpack.c.bf16 %v866_v5, %v866_v5  ;;  %696 = vst.msk [vmem:[#allocation2 + $0xc1] sm:$0xff] %vm462_vm0, %v5013_v8  ;;  %v1108_v7 = vpack.c.bf16 %v1092_v12, %v1092_v12  ;;  %v1318_v8 = vld [vmem:[#allocation2 + $0x20] sm:$0xff] }
  0x82   : > { %v5169_v11 = vpack.c.bf16 %v978_v9, %v978_v9  ;;  %802 = vrot.lane.b32.xlu0 %v769_v6, %s6833_s20  ;;  %697 = vst.msk [vmem:[#allocation2 + $0xd1] sm:$0xff] %vm462_vm0, %v5031_v14  ;;  %v5191_v13 = vpack.c.bf16 %v1318_v8, %v1318_v8  ;;  %v1205_v14 = vld [vmem:[#allocation2 + $0x22] sm:$0xff]  ;;  %v1432_v16 = vld [vmem:[#allocation2 + $0x31] sm:$0xff] }
  0x83   : > { %915 = vrot.lane.b32.xlu1 %v882_v10, %s6829_s21  ;;  %698 = vst.msk [vmem:[#allocation2 + $0xe1] sm:$0xff] %vm462_vm0, %v5045_v20  ;;  %v1221_v15 = vpack.c.bf16 %v1205_v14, %v1205_v14  ;;  %v980_v17 = vld [vmem:[#allocation2 + $0x30] sm:$0xff]  ;;  %v1448_v18 = vpack.c.bf16 %v1432_v16, %v1432_v16  ;;  %v981_v20 = vld [vmem:[#allocation2 + $0x40] sm:$0xff] }
  0x84   : > { %1026 = vrot.lane.b32.xlu2 %v5169_v11, %s6831_s30  ;;  %699 = vst.msk [vmem:[#allocation2 + $0xf1] sm:$0xff] %vm462_vm0, %v5059_v26  ;;  %v996_v19 = vpack.c.bf16 %v980_v17, %v980_v17  ;;  %v997_v21 = vpack.c.bf16 %v981_v20, %v981_v20  ;;  %v1206_v22 = vld [vmem:[#allocation2 + $0x32] sm:$0xff]  ;;  %v1094_v24 = vld [vmem:[#allocation2 + $0x41] sm:$0xff] }
  0x85   : > { %700 = vst.msk [vmem:[#allocation2 + $0x101] sm:$0xff] %vm462_vm0, %v5073_v32  ;;  %v1222_v23 = vpack.c.bf16 %v1206_v22, %v1206_v22  ;;  %v1110_v25 = vpack.c.bf16 %v1094_v24, %v1094_v24  ;;  %v1321_v26 = vld [vmem:[#allocation2 + $0x50] sm:$0xff]  ;;  %v869_v27 = vld [vmem:[#allocation2 + $0x42] sm:$0xff] }
  0x86   : > { %701 = vst.msk [vmem:[#allocation2 + $0x111] sm:$0xff] %vm462_vm0, %v5087_v38  ;;  %v1337_v28 = vpack.c.bf16 %v1321_v26, %v1321_v26  ;;  %v885_v29 = vpack.c.bf16 %v869_v27, %v869_v27  ;;  %v1434_v30 = vld [vmem:[#allocation2 + $0x51] sm:$0xff]  ;;  %v983_v37 = vld [vmem:[#allocation2 + $0x60] sm:$0xff] }
  0x87   : > { %702 = vst.msk [vmem:[#allocation2 + $0x121] sm:$0xff] %vm462_vm0, %v5099_v44  ;;  %v1450_v31 = vpack.c.bf16 %v1434_v30, %v1434_v30  ;;  %v870_v32 = vld [vmem:[#allocation2 + $0x52] sm:$0xff]  ;;  %v999_v39 = vpack.c.bf16 %v983_v37, %v983_v37  ;;  %v1209_v40 = vld [vmem:[#allocation2 + $0x62] sm:$0xff] }
  0x88   : > { %v886_v33 = vpack.c.bf16 %v870_v32, %v870_v32  ;;  %737 = vst.msk [vmem:[#allocation3 + $0x8] sm:$0xf] %vm735_vm4, %v5169_v11  ;;  %v1323_v41 = vld [vmem:[#allocation2 + $0x70] sm:$0xff]  ;;  %v1225_v43 = vpack.c.bf16 %v1209_v40, %v1209_v40  ;;  %v1435_v45 = vld [vmem:[#allocation2 + $0x61] sm:$0xff] }
  0x89   : > { %736 = vst.msk [vmem:[#allocation3] sm:$0xf] %vm735_vm4, %v719_v36  ;;  %v872_v42 = vld [vmem:[#allocation2 + $0x72] sm:$0xff]  ;;  %v1339_v44 = vpack.c.bf16 %v1323_v41, %v1323_v41  ;;  %v1451_v48 = vpack.c.bf16 %v1435_v45, %v1435_v45  ;;  %v1211_v52 = vld [vmem:[#allocation2 + $0x82] sm:$0xff] }
  0x8a   : > { %1139 = vrot.lane.b32.xlu0 %v769_v6, %s6837_s15  ;;  %738 = vst.msk [vmem:[#allocation3 + $0x10] sm:$0xf] %vm735_vm4, %v5191_v13  ;;  %v5243_v47 = vpack.c.bf16 %v872_v42, %v872_v42  ;;  %v5259_v53 = vpack.c.bf16 %v1211_v52, %v1211_v52  ;;  %v759_v54 = vld [vmem:[#allocation2 + $0x71] sm:$0xff]  ;;  %v1098_v1 = vld [vmem:[#allocation2 + $0x81] sm:$0xff] }
  0x8b   : > { %1141 = vrot.lane.b32.xlu1 %v1108_v7, %s6837_s15  ;;  %739 = vst.msk [vmem:[#allocation3 + $0x18] sm:$0xf] %vm735_vm4, %v996_v19  ;;  %v775_v57 = vpack.c.bf16 %v759_v54, %v759_v54  ;;  %v1114_v5 = vpack.c.bf16 %v1098_v1, %v1098_v1  ;;  %v1324_v9 = vld [vmem:[#allocation2 + $0x80] sm:$0xff]  ;;  %v986_v6 = vld [vmem:[#allocation2 + $0xb0] sm:$0xff] }
  0x8c   : > { %1028 = vrot.lane.b32.xlu2 %v5191_v13, %s6831_s30  ;;  %1576 = vst.msk [vmem:[#allocation3 + $0x4] sm:$0xf] %vm735_vm4, %v1221_v15  ;;  %v987_v11 = vld [vmem:[#allocation2 + $0xc0] sm:$0xff]  ;;  %v1340_v12 = vpack.c.bf16 %v1324_v9, %v1324_v9  ;;  %v1325_v22 = vld [vmem:[#allocation2 + $0x90] sm:$0xff] }
  0x8d   : > { %1577 = vst.msk [vmem:[#allocation3 + $0xc] sm:$0xf] %vm735_vm4, %v1222_v23  ;;  %v5304_v8 = vpack.c.bf16 %v987_v11, %v987_v11  ;;  %v1327_v26 = vld [vmem:[#allocation2 + $0xd0] sm:$0xff]  ;;  %v760_v32 = vld [vmem:[#allocation2 + $0xa1] sm:$0xff] }
  0x8e   : > { %741 = vst.msk [vmem:[#allocation3 + $0x28] sm:$0xf] %vm735_vm4, %v1337_v28  ;;  %v5326_v27 = vpack.c.bf16 %v1327_v26, %v1327_v26  ;;  %v776_v36 = vpack.c.bf16 %v760_v32, %v760_v32  ;;  %v876_v46 = vld [vmem:[#allocation2 + $0xd2] sm:$0xff]  ;;  %v1100_v49 = vld [vmem:[#allocation2 + $0xc1] sm:$0xff] }
  0x8f   : > { %740 = vst.msk [vmem:[#allocation3 + $0x20] sm:$0xf] %vm735_vm4, %v997_v21  ;;  %v989_v54 = vld [vmem:[#allocation2 + $0xe0] sm:$0xff]  ;;  %v1440_v2 = vld [vmem:[#allocation2 + $0xd1] sm:$0xff] }
  0x90   : > { %1578 = vst.msk [vmem:[#allocation3 + $0x14] sm:$0xf] %vm735_vm4, %v885_v29  ;;  %v5354_v55 = vpack.c.bf16 %v989_v54, %v989_v54  ;;  %v1215_v62 = vld [vmem:[#allocation2 + $0xe2] sm:$0xff]  ;;  %v1329_v9 = vld [vmem:[#allocation2 + $0xf0] sm:$0xff] }
  0x91   : > { %1579 = vst.msk [vmem:[#allocation3 + $0x1c] sm:$0xf] %vm735_vm4, %v886_v33  ;;  %v5366_v1 = vpack.c.bf16 %v1215_v62, %v1215_v62  ;;  %v1330_v32 = vld [vmem:[#allocation2 + $0x100] sm:$0xff]  ;;  %v992_v54 = vld [vmem:[#allocation2 + $0x110] sm:$0xff] }
  0x92   : > { %1254 = vrot.lane.b32.xlu0 %v1221_v15, %s6835_s16  ;;  %742 = vst.msk [vmem:[#allocation3 + $0x30] sm:$0xf] %vm735_vm4, %v999_v39  ;;  %v1218_v62 = vld [vmem:[#allocation2 + $0x112] sm:$0xff] }
  0x93   : > { %1366 = vrot.lane.b32.xlu1 %v5191_v13, %s6839_s22  ;;  %743 = vst.msk [vmem:[#allocation3 + $0x38] sm:$0xf] %vm735_vm4, %v1339_v44  ;;  %v4561_v13 = vld [vmem:[#allocation3 + $0x4] sm:$0xf] }
  0x94   : > { %1252 = vrot.lane.b32.xlu2 %v882_v10, %s6835_s16  ;;  %1580 = vst.msk [vmem:[#allocation3 + $0x24] sm:$0xf] %vm735_vm4, %v1225_v43  ;;  %v5299_v10 = vpack.c.bf16 %v986_v6, %v986_v6  ;;  %v4286_v14 = vld [vmem:[#allocation3 + $0x8] sm:$0xf0]  ;;  %v5378_v6 = vpack.c.bf16 %v1329_v9, %v1329_v9 }
  0x95   : > { %v801_v35 = vpop.permute.xlu0 %800  ;;  %1581 = vst.msk [vmem:[#allocation3 + $0x2c] sm:$0xf] %vm735_vm4, %v5243_v47  ;;  %v4289_v17 = vor.u32 %v4561_v13, %v4286_v14 }
  0x96   : > { %849 = vst.msk [vmem:[#allocation3] sm:$0xf] %vm848_vm5, %v801_v35 }
  0x97   : > { %1582 = vst.msk [vmem:[#allocation3 + $0x34] sm:$0xf] %vm735_vm4, %v5259_v53 }
  0x98   : > { %745 = vst.msk [vmem:[#allocation3 + $0x48] sm:$0xf] %vm735_vm4, %v5299_v10 }
  0x99   : > { %746 = vst.msk [vmem:[#allocation3 + $0x50] sm:$0xf] %vm735_vm4, %v5304_v8 }
  0x9a   : > { %1479 = vrot.lane.b32.xlu0 %v1108_v7, %s6841_s23  ;;  %747 = vst.msk [vmem:[#allocation3 + $0x58] sm:$0xf] %vm735_vm4, %v5326_v27 }
  0x9b   : > { %1481 = vrot.lane.b32.xlu1 %v1448_v18, %s6841_s23  ;;  %748 = vst.msk [vmem:[#allocation3 + $0x60] sm:$0xf] %vm735_vm4, %v5354_v55 }
  0x9c   : > { %1368 = vrot.lane.b32.xlu2 %v996_v19, %s6839_s22  ;;  %1586 = vst.msk [vmem:[#allocation3 + $0x54] sm:$0xf] %vm735_vm4, %v5366_v1 }
  0x9d   : > { %749 = vst.msk [vmem:[#allocation3 + $0x68] sm:$0xf] %vm735_vm4, %v5378_v6 }
  0xa2   : > { %806 = vrot.lane.b32.xlu0 %v1448_v18, %s6833_s20 }
  0xa3   : > { %917 = vrot.lane.b32.xlu1 %v1221_v15, %s6829_s21 }
  0xa4   : > { %804 = vrot.lane.b32.xlu2 %v1108_v7, %s6833_s20  ;;  %v4585_v7 = vld [vmem:[%s6856_s1 + $0x40] sm:$0xff]  ;;  %s6843_s1 = smov 116  }
  0xa5   : > { %1832 = vmatpush.bf16.msra.mxu1 %v4585_v7 }
  0xa8   : > { %4382 = vmatmul.msk.bf16.vlgmr.msra.gmra.mxu1 %vm462_vm0, %v4289_v17  ;;  %v878_v17 = vld [vmem:[#allocation2 + $0xf2] sm:$0xff] }
  0xaa   : > { %1030 = vrot.lane.b32.xlu0 %v996_v19, %s6831_s30  ;;  %v1438_v19 = vld [vmem:[#allocation2 + $0x91] sm:$0xff] }
  0xab   : > { %1032 = vrot.lane.b32.xlu1 %v997_v21, %s6831_s30  ;;  %v1454_v24 = vpack.c.bf16 %v1438_v19, %v1438_v19 }
  0xac   : > { %919 = vrot.lane.b32.xlu2 %v1222_v23, %s6829_s21 }
  0xaf   : > { %v914_v38 = vpop.permute.xlu1 %913 }
  0xb0   : > { %962 = vst.msk [vmem:[#allocation3] sm:$0xf] %vm961_vm6, %v914_v38 }
  0xb2   : > { %1145 = vrot.lane.b32.xlu0 %v1110_v25, %s6837_s15 }
  0xb3   : > { %1256 = vrot.lane.b32.xlu1 %v1222_v23, %s6835_s16 }
  0xb4   : > { %1143 = vrot.lane.b32.xlu2 %v1448_v18, %s6837_s15 }
  0xba   : > { %1370 = vrot.lane.b32.xlu0 %v997_v21, %s6839_s22 }
  0xbb   : > { %1372 = vrot.lane.b32.xlu1 %v1337_v28, %s6839_s22  ;;  %v5288_v63 = vpop.f32.mrf.mxu0 }
  0xbc   : > { %1258 = vrot.lane.b32.xlu2 %v885_v29, %s6835_s16  ;;  %4279 = vmatmul.msk.f32.vlgmr.msra.gmra.mxu2 %vm536_vm9, %v5288_v63 }
  0xc2   : > { %1485 = vrot.lane.b32.xlu0 %v1450_v31, %s6841_s23 }
  0xc3   : > { %808 = vrot.lane.b32.xlu1 %v1110_v25, %s6833_s20 }
  0xc4   : > { %1483 = vrot.lane.b32.xlu2 %v1110_v25, %s6841_s23  ;;  %v1341_v25 = vpack.c.bf16 %v1325_v22, %v1325_v22  ;;  %v4302_v22 = vld [vmem:[#allocation3 + $0x28] sm:$0xf0] }
  0xca   : > { %921 = vrot.lane.b32.xlu0 %v885_v29, %s6829_s21  ;;  %v873_v29 = vld [vmem:[#allocation2 + $0xa2] sm:$0xff] }
  0xcb   : > { %923 = vrot.lane.b32.xlu1 %v886_v33, %s6829_s21  ;;  %v889_v35 = vpack.c.bf16 %v873_v29, %v873_v29 }
  0xcc   : > { %810 = vrot.lane.b32.xlu2 %v1450_v31, %s6833_s20  ;;  %s6861_s20 = smov 80  }
  0xd2   : > { %1036 = vrot.lane.b32.xlu0 %v999_v39, %s6831_s30 }
  0xd3   : > { %1147 = vrot.lane.b32.xlu1 %v1450_v31, %s6837_s15 }
  0xd4   : > { %1034 = vrot.lane.b32.xlu2 %v1337_v28, %s6831_s30  ;;  %s6858_s30 = smov 32   ;;  %v761_v28 = vld [vmem:[#allocation2 + $0xb1] sm:$0xff] }
  0xd5   : > { %v777_v34 = vpack.c.bf16 %v761_v28, %v761_v28 }
  0xda   : > { %1260 = vrot.lane.b32.xlu0 %v886_v33, %s6835_s16 }
  0xdb   : > { %1262 = vrot.lane.b32.xlu1 %v1225_v43, %s6835_s16  ;;  %s6857_s16 = smov 16  }
  0xdc   : > { %1149 = vrot.lane.b32.xlu2 %v1451_v48, %s6837_s15  ;;  %s6863_s15 = smov 112  }
  0xde   : > { %v1027_v50 = vpop.permute.xlu2 %1026 }
  0xdf   : > { %1075 = vst.msk [vmem:[#allocation3] sm:$0xf] %vm1074_vm7, %v1027_v50 }
  0xe2   : > { %1376 = vrot.lane.b32.xlu0 %v1339_v44, %s6839_s22 }
  0xe3   : > { %1487 = vrot.lane.b32.xlu1 %v1451_v48, %s6841_s23 }
  0xe4   : > { %1374 = vrot.lane.b32.xlu2 %v999_v39, %s6839_s22  ;;  %s6845_s22 = smov 124  }
  0xe6   : > { %v1029_v56 = vpop.permute.xlu2 %1028 }
  0xea   : > { %812 = vrot.lane.b32.xlu0 %v1451_v48, %s6857_s16  ;;  %v5341_v48 = vpack.c.bf16 %v876_v46, %v876_v46 }
  0xeb   : > { %814 = vrot.lane.b32.xlu1 %v775_v57, %s6857_s16 }
  0xec   : > { %1489 = vrot.lane.b32.xlu2 %v775_v57, %s6841_s23  ;;  %s6859_s23 = smov 48   ;;  %1585 = vst.msk [vmem:[#allocation3 + $0x4c] sm:$0xf] %vm735_vm4, %v5341_v48 }
  0xee   : > { %v1253_v60 = vpop.permute.xlu2 %1252 }
  0xf2   : > { %927 = vrot.lane.b32.xlu0 %v5243_v47, %s6858_s30 }
  0xf3   : > { %1038 = vrot.lane.b32.xlu1 %v1339_v44, %s6859_s23  ;;  %v875_v44 = vld [vmem:[#allocation2 + $0xc2] sm:$0xff] }
  0xf4   : > { %925 = vrot.lane.b32.xlu2 %v1225_v43, %s6858_s30  ;;  %v803_v3 = vpop.permute.xlu0 %802  ;;  %v1212_v43 = vld [vmem:[#allocation2 + $0xb2] sm:$0xff]  ;;  %v891_v45 = vpack.c.bf16 %v875_v44, %v875_v44 }
  0xf5   : > { %v916_v4 = vpop.permute.xlu1 %915  ;;  %850 = vst.msk [vmem:[#allocation3 + $0x8] sm:$0xf] %vm848_vm5, %v803_v3 }
  0xf6   : > { %v1369_v0 = vpop.permute.xlu2 %1368  ;;  %963 = vst.msk [vmem:[#allocation3 + $0x8] sm:$0xf] %vm961_vm6, %v916_v4 }
  0xf7   : > { %1076 = vst.msk [vmem:[#allocation3 + $0x8] sm:$0xf] %vm1074_vm7, %v1029_v56  ;;  %v4563_v56 = vld [vmem:[#allocation3 + $0x14] sm:$0xf] }
  0xf8   : > { %1584 = vst.msk [vmem:[#allocation3 + $0x44] sm:$0xf] %vm735_vm4, %v891_v45 }
  0xfa   : > { %1151 = vrot.lane.b32.xlu0 %v775_v57, %s6860_s24  ;;  %v4294_v57 = vld [vmem:[#allocation3 + $0x18] sm:$0xf0] }
  0xfb   : > { %1153 = vrot.lane.b32.xlu1 %v1114_v5, %s6860_s24  ;;  %v4297_v58 = vor.u32 %v4563_v56, %v4294_v57 }
  0xfc   : > { %1040 = vrot.lane.b32.xlu2 %v1340_v12, %s6859_s23  ;;  %v1140_v15 = vpop.permute.xlu0 %1139 }
  0xfd   : > { %v1142_v16 = vpop.permute.xlu1 %1141  ;;  %1188 = vst.msk [vmem:[#allocation3] sm:$0xf] %vm1187_vm10, %v1140_v15  ;;  %4383 = vmatmul.msk.bf16.gmra.mxu1 %vm462_vm0, %v4297_v58 }
  0xfe   : > { %v805_v18 = vpop.permute.xlu2 %804  ;;  %1301 = vst.msk [vmem:[#allocation3] sm:$0xf] %vm1300_vm11, %v1253_v60 }
  0xff   : > { %1189 = vst.msk [vmem:[#allocation3 + $0x8] sm:$0xf] %vm1187_vm10, %v1142_v16 }
 0x100   : > { %851 = vst.msk [vmem:[#allocation3 + $0x10] sm:$0xf] %vm848_vm5, %v805_v18  ;;  %v5394_v18 = vpack.c.bf16 %v878_v17, %v878_v17 }
 0x102   : > { %1266 = vrot.lane.b32.xlu0 %v5259_v53, %s6861_s20  ;;  %v1116_v53 = vpack.c.bf16 %v1100_v49, %v1100_v49  ;;  %1587 = vst.msk [vmem:[#allocation3 + $0x5c] sm:$0xf] %vm735_vm4, %v5394_v18 }
 0x103   : > { %1378 = vrot.lane.b32.xlu1 %v1340_v12, %s6862_s0 }
 0x104   : > { %1264 = vrot.lane.b32.xlu2 %v5243_v47, %s6861_s20  ;;  %v1255_v20 = vpop.permute.xlu0 %1254  ;;  %v1228_v47 = vpack.c.bf16 %v1212_v43, %v1212_v43  ;;  %v711_v43 = vld [vmem:[#allocation2 + $0xa0] sm:$0xff] }
 0x105   : > { %v1367_v21 = vpop.permute.xlu1 %1366  ;;  %1302 = vst.msk [vmem:[#allocation3 + $0x8] sm:$0xf] %vm1300_vm11, %v1255_v20 }
 0x106   : > { %v920_v23 = vpop.permute.xlu2 %919  ;;  %1416 = vst.msk [vmem:[#allocation3 + $0x8] sm:$0xf] %vm1414_vm12, %v1369_v0 }
 0x107   : > { %1415 = vst.msk [vmem:[#allocation3] sm:$0xf] %vm1414_vm12, %v1367_v21  ;;  %v4565_v21 = vld [vmem:[#allocation3 + $0x24] sm:$0xf] }
 0x10a   : > { %1491 = vrot.lane.b32.xlu0 %v1114_v5, %s6863_s15  ;;  %v1456_v5 = vpack.c.bf16 %v1440_v2, %v1440_v2  ;;  %v1444_v2 = vld [vmem:[#allocation2 + $0x111] sm:$0xff] }
 0x10b   : > { %1493 = vrot.lane.b32.xlu1 %v1454_v24, %s6863_s15  ;;  %v4305_v24 = vor.u32 %v4565_v21, %v4302_v22 }
 0x10c   : > { %1380 = vrot.lane.b32.xlu2 %v1341_v25, %s6862_s0  ;;  %v1480_v30 = vpop.permute.xlu0 %1479  ;;  %v1441_v25 = vld [vmem:[#allocation2 + $0xe1] sm:$0xff] }
 0x10d   : > { %v1482_v31 = vpop.permute.xlu1 %1481  ;;  %1528 = vst.msk [vmem:[#allocation3] sm:$0xf] %vm1527_vm13, %v1480_v30  ;;  %4384 = vmatmul.msk.bf16.gmra.mxu1 %vm462_vm0, %v4305_v24  ;;  %v1457_v26 = vpack.c.bf16 %v1441_v25, %v1441_v25  ;;  %v1217_v30 = vld [vmem:[#allocation2 + $0x102] sm:$0xff] }
 0x10e   : > { %v1144_v33 = vpop.permute.xlu2 %1143  ;;  %1529 = vst.msk [vmem:[#allocation3 + $0x8] sm:$0xf] %vm1527_vm13, %v1482_v31  ;;  %v5415_v31 = vpack.c.bf16 %v1217_v30, %v1217_v30  ;;  %v1219_v24 = vld [vmem:[#allocation2 + $0x122] sm:$0xff]  ;;  %v1333_v30 = vld [vmem:[#allocation2 + $0x130] sm:$0xff] }
 0x110   : > { %1588 = vst.msk [vmem:[#allocation3 + $0x64] sm:$0xf] %vm735_vm4, %v5415_v31 }
 0x112   : > { %818 = vrot.lane.b32.xlu0 %v777_v34, %s6857_s16 }
 0x113   : > { %929 = vrot.lane.b32.xlu1 %v889_v35, %s6858_s30 }
 0x114   : > { %816 = vrot.lane.b32.xlu2 %v776_v36, %s6857_s16  ;;  %v807_v37 = vpop.permute.xlu0 %806  ;;  %v4284_v39 = vld [vmem:[#allocation3] sm:$0xf] }
 0x115   : > { %v918_v38 = vpop.permute.xlu1 %917  ;;  %852 = vst.msk [vmem:[#allocation3 + $0x18] sm:$0xf] %vm848_vm5, %v807_v37  ;;  %v4562_v40 = vld [vmem:[#allocation3 + $0x4] sm:$0xf0] }
 0x116   : > { %v1259_v41 = vpop.permute.xlu2 %1258  ;;  %965 = vst.msk [vmem:[#allocation3 + $0x18] sm:$0xf] %vm961_vm6, %v920_v23  ;;  %v4285_v42 = vor.u32 %v4562_v40, %v4284_v39 }
 0x117   : > { %964 = vst.msk [vmem:[#allocation3 + $0x10] sm:$0xf] %vm961_vm6, %v918_v38 }
 0x118   : > { %1784 = vmatmul.bf16.vlgmr.msra.gmra.mxu3 %v4285_v42 }
 0x11a   : > { %1042 = vrot.lane.b32.xlu0 %v5299_v10, %s6859_s23 }
 0x11b   : > { %1044 = vrot.lane.b32.xlu1 %v5304_v8, %s6859_s23 }
 0x11c   : > { %931 = vrot.lane.b32.xlu2 %v1228_v47, %s6858_s30  ;;  %v1031_v50 = vpop.permute.xlu0 %1030 }
 0x11d   : > { %v1033_v51 = vpop.permute.xlu1 %1032  ;;  %1077 = vst.msk [vmem:[#allocation3 + $0x10] sm:$0xf] %vm1074_vm7, %v1031_v50 }
 0x11e   : > { %v1484_v52 = vpop.permute.xlu2 %1483  ;;  %1190 = vst.msk [vmem:[#allocation3 + $0x10] sm:$0xf] %vm1187_vm10, %v1144_v33  ;;  %v1346_v33 = vpack.c.bf16 %v1330_v32, %v1330_v32  ;;  %v4318_v32 = vld [vmem:[#allocation3 + $0x48] sm:$0xf0] }
 0x11f   : > { %1078 = vst.msk [vmem:[#allocation3 + $0x18] sm:$0xf] %vm1074_vm7, %v1033_v51 }
 0x120   : > { %750 = vst.msk [vmem:[#allocation3 + $0x70] sm:$0xf] %vm735_vm4, %v1346_v33 }
 0x122   : > { %1157 = vrot.lane.b32.xlu0 %v1116_v53, %s6860_s24 }
 0x123   : > { %1268 = vrot.lane.b32.xlu1 %v1228_v47, %s6861_s20  ;;  %v1551_v47 = vld [vmem:[#allocation2 + $0x92] sm:$0xff] }
 0x124   : > { %1155 = vrot.lane.b32.xlu2 %v777_v34, %s6860_s24  ;;  %v1146_v59 = vpop.permute.xlu0 %1145  ;;  %v765_v34 = vld [vmem:[#allocation2 + $0xf1] sm:$0xff]  ;;  %v1567_v51 = vpack.c.bf16 %v1551_v47, %v1551_v47  ;;  %v4667_v47 = vld [vmem:[%s6821_s6 + $0x1] ss:$0 sm:$0xff] }
 0x125   : > { %v1257_v60 = vpop.permute.xlu1 %1256  ;;  %1191 = vst.msk [vmem:[#allocation3 + $0x18] sm:$0xf] %vm1187_vm10, %v1146_v59  ;;  %v781_v38 = vpack.c.bf16 %v765_v34, %v765_v34  ;;  %v4567_v59 = vld [vmem:[#allocation3 + $0x34] sm:$0xf] }
 0x126   : > { %v811_v61 = vpop.permute.xlu2 %810  ;;  %1304 = vst.msk [vmem:[#allocation3 + $0x18] sm:$0xf] %vm1300_vm11, %v1259_v41 }
 0x127   : > { %1303 = vst.msk [vmem:[#allocation3 + $0x10] sm:$0xf] %vm1300_vm11, %v1257_v60 }
 0x128   : > { %854 = vst.msk [vmem:[#allocation3 + $0x28] sm:$0xf] %vm848_vm5, %v811_v61 }
 0x129   : > { %1583 = vst.msk [vmem:[#allocation3 + $0x3c] sm:$0xf] %vm735_vm4, %v1567_v51 }
 0x12a   : > { %1382 = vrot.lane.b32.xlu0 %v5304_v8, %s6862_s0 }
 0x12b   : > { %1384 = vrot.lane.b32.xlu1 %v5326_v27, %s6862_s0 }
 0x12c   : > { %1270 = vrot.lane.b32.xlu2 %v891_v45, %s6861_s20  ;;  %v1371_v3 = vpop.permute.xlu0 %1370 }
 0x12d   : > { %v1373_v4 = vpop.permute.xlu1 %1372  ;;  %1417 = vst.msk [vmem:[#allocation3 + $0x10] sm:$0xf] %vm1414_vm12, %v1371_v3 }
 0x12e   : > { %v1035_v0 = vpop.permute.xlu2 %1034  ;;  %1530 = vst.msk [vmem:[#allocation3 + $0x10] sm:$0xf] %vm1527_vm13, %v1484_v52 }
 0x12f   : > { %1418 = vst.msk [vmem:[#allocation3 + $0x18] sm:$0xf] %vm1414_vm12, %v1373_v4 }
 0x130   : > { %v4310_v60 = vld [vmem:[#allocation3 + $0x38] sm:$0xf0] }
 0x131   : > { %v4313_v61 = vor.u32 %v4567_v59, %v4310_v60 }
 0x132   : > { %1497 = vrot.lane.b32.xlu0 %v1456_v5, %s6863_s15 }
 0x133   : > { %820 = vrot.lane.b32.xlu1 %v1116_v53, %s6857_s16  ;;  %4385 = vmatmul.msk.bf16.gmra.mxu1 %vm462_vm0, %v4313_v61 }
 0x134   : > { %1495 = vrot.lane.b32.xlu2 %v1116_v53, %s6863_s15  ;;  %v1486_v10 = vpop.permute.xlu0 %1485 }
 0x135   : > { %v809_v11 = vpop.permute.xlu1 %808  ;;  %1531 = vst.msk [vmem:[#allocation3 + $0x18] sm:$0xf] %vm1527_vm13, %v1486_v10  ;;  %v4292_v7 = vld [vmem:[#allocation3 + $0x10] sm:$0xf] }
 0x136   : > { %v1150_v12 = vpop.permute.xlu2 %1149  ;;  %853 = vst.msk [vmem:[#allocation3 + $0x20] sm:$0xf] %vm848_vm5, %v809_v11 }
 0x13a   : > { %933 = vrot.lane.b32.xlu0 %v891_v45, %s6858_s30  ;;  %v727_v45 = vpack.c.bf16 %v711_v43, %v711_v43  ;;  %v4666_v43 = vld [vmem:[%s6821_s6] ss:$0 sm:$0xff] }
 0x13b   : > { %935 = vrot.lane.b32.xlu1 %v5341_v48, %s6858_s30 }
 0x13c   : > { %822 = vrot.lane.b32.xlu2 %v1456_v5, %s6857_s16  ;;  %v922_v8 = vpop.permute.xlu0 %921  ;;  %v4564_v14 = vld [vmem:[#allocation3 + $0x14] sm:$0xf0]  ;;  %744 = vst.msk [vmem:[#allocation3 + $0x40] sm:$0xf] %vm735_vm4, %v727_v45 }
 0x13d   : > { %v924_v13 = vpop.permute.xlu1 %923  ;;  %966 = vst.msk [vmem:[#allocation3 + $0x20] sm:$0xf] %vm961_vm6, %v922_v8  ;;  %v4293_v15 = vor.u32 %v4564_v14, %v4292_v7  ;;  %v568_v14 = vld [vmem:[%s6819_s4] sm:$0xf] }
 0x13e   : > { %v1375_v16 = vpop.permute.xlu2 %1374  ;;  %1079 = vst.msk [vmem:[#allocation3 + $0x20] sm:$0xf] %vm1074_vm7, %v1035_v0  ;;  %4280 = vmatpush.msk.msrb.mxu2 %vm540_vm8, %v568_v14 }
 0x13f   : > { %967 = vst.msk [vmem:[#allocation3 + $0x28] sm:$0xf] %vm961_vm6, %v924_v13  ;;  %1789 = vmatmul.bf16.gmra.mxu3 %v4293_v15  ;;  %v561_v9 = vpop.f32.mrf.mxu2 }
 0x142   : > { %1048 = vrot.lane.b32.xlu0 %v5354_v55, %s6859_s23 }
 0x143   : > { %1159 = vrot.lane.b32.xlu1 %v1456_v5, %s6860_s24  ;;  %v1460_v5 = vpack.c.bf16 %v1444_v2, %v1444_v2 }
 0x144   : > { %1046 = vrot.lane.b32.xlu2 %v5326_v27, %s6859_s23  ;;  %v1037_v19 = vpop.permute.xlu0 %1036 }
 0x145   : > { %v1148_v20 = vpop.permute.xlu1 %1147  ;;  %1080 = vst.msk [vmem:[#allocation3 + $0x28] sm:$0xf] %vm1074_vm7, %v1037_v19 }
 0x146   : > { %v1490_v23 = vpop.permute.xlu2 %1489  ;;  %1193 = vst.msk [vmem:[#allocation3 + $0x28] sm:$0xf] %vm1187_vm10, %v1150_v12 }
 0x147   : > { %1192 = vst.msk [vmem:[#allocation3 + $0x20] sm:$0xf] %vm1187_vm10, %v1148_v20 }
 0x14a   : > { %1272 = vrot.lane.b32.xlu0 %v5341_v48, %s6861_s20  ;;  %v1104_v48 = vld [vmem:[#allocation2 + $0x101] sm:$0xff] }
 0x14b   : > { %1274 = vrot.lane.b32.xlu1 %v5366_v1, %s6861_s20  ;;  %v1120_v53 = vpack.c.bf16 %v1104_v48, %v1104_v48 }
 0x14c   : > { %1161 = vrot.lane.b32.xlu2 %v1457_v26, %s6860_s24  ;;  %v1261_v27 = vpop.permute.xlu0 %1260 }
 0x14d   : > { %v1263_v28 = vpop.permute.xlu1 %1262  ;;  %1305 = vst.msk [vmem:[#allocation3 + $0x20] sm:$0xf] %vm1300_vm11, %v1261_v27 }
 0x14e   : > { %v926_v29 = vpop.permute.xlu2 %925  ;;  %1419 = vst.msk [vmem:[#allocation3 + $0x20] sm:$0xf] %vm1414_vm12, %v1375_v16  ;;  %v993_v16 = vld [vmem:[#allocation2 + $0x120] sm:$0xff] }
 0x14f   : > { %1306 = vst.msk [vmem:[#allocation3 + $0x28] sm:$0xf] %vm1300_vm11, %v1263_v28  ;;  %v1009_v22 = vpack.c.bf16 %v993_v16, %v993_v16 }
 0x152   : > { %1388 = vrot.lane.b32.xlu0 %v5378_v6, %s6862_s0 }
 0x153   : > { %1499 = vrot.lane.b32.xlu1 %v1457_v26, %s6863_s15 }
 0x154   : > { %1386 = vrot.lane.b32.xlu2 %v5354_v55, %s6862_s0  ;;  %v1377_v35 = vpop.permute.xlu0 %1376  ;;  %v1008_v55 = vpack.c.bf16 %v992_v54, %v992_v54 }
 0x155   : > { %v1488_v36 = vpop.permute.xlu1 %1487  ;;  %1420 = vst.msk [vmem:[#allocation3 + $0x28] sm:$0xf] %vm1414_vm12, %v1377_v35 }
 0x156   : > { %v1041_v37 = vpop.permute.xlu2 %1040  ;;  %1533 = vst.msk [vmem:[#allocation3 + $0x28] sm:$0xf] %vm1527_vm13, %v1490_v23  ;;  %v1106_v23 = vld [vmem:[#allocation2 + $0x121] sm:$0xff] }
 0x157   : > { %1532 = vst.msk [vmem:[#allocation3 + $0x20] sm:$0xf] %vm1527_vm13, %v1488_v36  ;;  %v1122_v28 = vpack.c.bf16 %v1106_v23, %v1106_v23 }
 0x158   : > { %751 = vst.msk [vmem:[#allocation3 + $0x78] sm:$0xf] %vm735_vm4, %v1008_v55 }
 0x15a   : > { %824 = vrot.lane.b32.xlu0 %v1457_v26, %s6857_s16 }
 0x15b   : > { %826 = vrot.lane.b32.xlu1 %v781_v38, %s6857_s16 }
 0x15c   : > { %1501 = vrot.lane.b32.xlu2 %v781_v38, %s6863_s15  ;;  %v813_v39 = vpop.permute.xlu0 %812 }
 0x15d   : > { %v815_v40 = vpop.permute.xlu1 %814  ;;  %855 = vst.msk [vmem:[#allocation3 + $0x30] sm:$0xf] %vm848_vm5, %v813_v39  ;;  %v4566_v41 = vld [vmem:[#allocation3 + $0x24] sm:$0xf0] }
 0x15e   : > { %v1265_v42 = vpop.permute.xlu2 %1264  ;;  %968 = vst.msk [vmem:[#allocation3 + $0x30] sm:$0xf] %vm961_vm6, %v926_v29  ;;  %v4300_v44 = vld [vmem:[#allocation3 + $0x20] sm:$0xf]  ;;  %v1235_v29 = vpack.c.bf16 %v1219_v24, %v1219_v24 }
 0x15f   : > { %856 = vst.msk [vmem:[#allocation3 + $0x38] sm:$0xf] %vm848_vm5, %v815_v40  ;;  %v4301_v46 = vor.u32 %v4566_v41, %v4300_v44 }
 0x160   : > { %1590 = vst.msk [vmem:[#allocation3 + $0x74] sm:$0xf] %vm735_vm4, %v1235_v29 }
 0x161   : > { %1794 = vmatmul.bf16.gmra.mxu3 %v4301_v46 }
 0x162   : > { %939 = vrot.lane.b32.xlu0 %v5394_v18, %s6858_s30 }
 0x163   : > { %1050 = vrot.lane.b32.xlu1 %v5378_v6, %s6859_s23  ;;  %v562_v6 = vadd.f32 3.0, %v561_v9 }
 0x164   : > { %937 = vrot.lane.b32.xlu2 %v5366_v1, %s6858_s30  ;;  %v928_v49 = vpop.permute.xlu0 %927  ;;  %v1234_v1 = vpack.c.bf16 %v1218_v62, %v1218_v62 }
 0x165   : > { %v1039_v50 = vpop.permute.xlu1 %1038  ;;  %969 = vst.msk [vmem:[#allocation3 + $0x38] sm:$0xf] %vm961_vm6, %v928_v49  ;;  %v564_v10 = vmax.f32 %v562_v6, 0.0 }
 0x166   : > { %v1381_v52 = vpop.permute.xlu2 %1380  ;;  %1082 = vst.msk [vmem:[#allocation3 + $0x38] sm:$0xf] %vm1074_vm7, %v1041_v37  ;;  %v1349_v37 = vpack.c.bf16 %v1333_v30, %v1333_v30 }
 0x167   : > { %1081 = vst.msk [vmem:[#allocation3 + $0x30] sm:$0xf] %vm1074_vm7, %v1039_v50  ;;  %v565_v7 = vmin.f32 %v564_v10, 6.0 }
 0x168   : > { %1589 = vst.msk [vmem:[#allocation3 + $0x6c] sm:$0xf] %vm735_vm4, %v1234_v1 }
 0x169   : > { %v566_v13 = vmul.f32 0.16666667, %v565_v7 }
 0x16a   : > { %1163 = vrot.lane.b32.xlu0 %v781_v38, %s6860_s24  ;;  %v1446_v38 = vld [vmem:[#allocation2 + $0x131] sm:$0xff] }
 0x16b   : > { %1165 = vrot.lane.b32.xlu1 %v1120_v53, %s6860_s24  ;;  %v567_v15 = vmul.f32 %v566_v13, %v5288_v63 }
 0x16c   : > { %1052 = vrot.lane.b32.xlu2 %v1346_v33, %s6859_s23  ;;  %v1152_v56 = vpop.permute.xlu0 %1151 }
 0x16d   : > { %v1154_v57 = vpop.permute.xlu1 %1153  ;;  %1194 = vst.msk [vmem:[#allocation3 + $0x30] sm:$0xf] %vm1187_vm10, %v1152_v56  ;;  %4281 = vmatmul.msk.f32.vlgmr.msrb.gmra.mxu2 %vm536_vm9, %v567_v15  ;;  %v4571_v56 = vld [vmem:[#allocation3 + $0x54] sm:$0xf]  ;;  %v4573_v15 = vld [vmem:[#allocation3 + $0x64] sm:$0xf] }
 0x16e   : > { %v817_v58 = vpop.permute.xlu2 %816  ;;  %1307 = vst.msk [vmem:[#allocation3 + $0x30] sm:$0xf] %vm1300_vm11, %v1265_v42  ;;  %v1462_v42 = vpack.c.bf16 %v1446_v38, %v1446_v38  ;;  %v4575_v38 = vld [vmem:[#allocation3 + $0x74] sm:$0xf] }
 0x16f   : > { %1195 = vst.msk [vmem:[#allocation3 + $0x38] sm:$0xf] %vm1187_vm10, %v1154_v57  ;;  %v4326_v57 = vld [vmem:[#allocation3 + $0x58] sm:$0xf0]  ;;  %v4334_v16 = vld [vmem:[#allocation3 + $0x68] sm:$0xf0] }
 0x170   : > { %857 = vst.msk [vmem:[#allocation3 + $0x40] sm:$0xf] %vm848_vm5, %v817_v58  ;;  %v4329_v59 = vor.u32 %v4571_v56, %v4326_v57 }
 0x172   : > { %1278 = vrot.lane.b32.xlu0 %v5415_v31, %s6861_s20 }
 0x173   : > { %1390 = vrot.lane.b32.xlu1 %v1346_v33, %s6862_s0 }
 0x174   : > { %1276 = vrot.lane.b32.xlu2 %v5394_v18, %s6861_s20  ;;  %v1267_v3 = vpop.permute.xlu0 %1266 }
 0x175   : > { %v1379_v4 = vpop.permute.xlu1 %1378  ;;  %1308 = vst.msk [vmem:[#allocation3 + $0x38] sm:$0xf] %vm1300_vm11, %v1267_v3 }
 0x176   : > { %v932_v0 = vpop.permute.xlu2 %931  ;;  %1422 = vst.msk [vmem:[#allocation3 + $0x38] sm:$0xf] %vm1414_vm12, %v1381_v52 }
 0x177   : > { %1421 = vst.msk [vmem:[#allocation3 + $0x30] sm:$0xf] %vm1414_vm12, %v1379_v4 }
 0x17a   : > { %1503 = vrot.lane.b32.xlu0 %v1120_v53, %s6863_s15 }
 0x17b   : > { %1505 = vrot.lane.b32.xlu1 %v1460_v5, %s6863_s15 }
 0x17c   : > { %1392 = vrot.lane.b32.xlu2 %v1008_v55, %s6862_s0  ;;  %v1492_v11 = vpop.permute.xlu0 %1491 }
 0x17d   : > { %v1494_v12 = vpop.permute.xlu1 %1493  ;;  %1534 = vst.msk [vmem:[#allocation3 + $0x30] sm:$0xf] %vm1527_vm13, %v1492_v11 }
 0x17e   : > { %v1156_v8 = vpop.permute.xlu2 %1155  ;;  %1535 = vst.msk [vmem:[#allocation3 + $0x38] sm:$0xf] %vm1527_vm13, %v1494_v12 }
 0x182   : > { %830 = vrot.lane.b32.xlu0 %v1460_v5, %s6857_s16 }
 0x183   : > { %941 = vrot.lane.b32.xlu1 %v5415_v31, %s6858_s30  ;;  %v4569_v31 = vld [vmem:[#allocation3 + $0x44] sm:$0xf] }
 0x184   : > { %828 = vrot.lane.b32.xlu2 %v1120_v53, %s6857_s16  ;;  %v819_v17 = vpop.permute.xlu0 %818  ;;  %v4308_v19 = vld [vmem:[#allocation3 + $0x30] sm:$0xf]  ;;  %v4321_v35 = vor.u32 %v4569_v31, %v4318_v32 }
 0x185   : > { %v930_v18 = vpop.permute.xlu1 %929  ;;  %858 = vst.msk [vmem:[#allocation3 + $0x48] sm:$0xf] %vm848_vm5, %v819_v17  ;;  %v4568_v20 = vld [vmem:[#allocation3 + $0x34] sm:$0xf0] }
 0x186   : > { %v1271_v21 = vpop.permute.xlu2 %1270  ;;  %971 = vst.msk [vmem:[#allocation3 + $0x48] sm:$0xf] %vm961_vm6, %v932_v0  ;;  %v4309_v63 = vor.u32 %v4568_v20, %v4308_v19  ;;  %4386 = vmatmul.msk.bf16.gmra.mxu1 %vm462_vm0, %v4321_v35 }
 0x187   : > { %970 = vst.msk [vmem:[#allocation3 + $0x40] sm:$0xf] %vm961_vm6, %v930_v18  ;;  %v4337_v18 = vor.u32 %v4573_v15, %v4334_v16 }
 0x188   : > { %1799 = vmatmul.bf16.gmra.mxu3 %v4309_v63 }
 0x18a   : > { %1054 = vrot.lane.b32.xlu0 %v1008_v55, %s6859_s23 }
 0x18b   : > { %1056 = vrot.lane.b32.xlu1 %v1009_v22, %s6859_s23 }
 0x18c   : > { %943 = vrot.lane.b32.xlu2 %v1234_v1, %s6858_s30  ;;  %v1043_v25 = vpop.permute.xlu0 %1042 }
 0x18d   : > { %v1045_v26 = vpop.permute.xlu1 %1044  ;;  %1083 = vst.msk [vmem:[#allocation3 + $0x40] sm:$0xf] %vm1074_vm7, %v1043_v25 }
 0x18e   : > { %v1496_v27 = vpop.permute.xlu2 %1495  ;;  %1196 = vst.msk [vmem:[#allocation3 + $0x40] sm:$0xf] %vm1187_vm10, %v1156_v8  ;;  %v5533_v8 = vpop.f32.mrf.mxu1 }
 0x18f   : > { %1084 = vst.msk [vmem:[#allocation3 + $0x48] sm:$0xf] %vm1074_vm7, %v1045_v26 }
 0x192   : > { %1169 = vrot.lane.b32.xlu0 %v1122_v28, %s6860_s24 }
 0x193   : > { %1280 = vrot.lane.b32.xlu1 %v1234_v1, %s6861_s20 }
 0x194   : > { %1167 = vrot.lane.b32.xlu2 %v1460_v5, %s6860_s24  ;;  %v1158_v33 = vpop.permute.xlu0 %1157 }
 0x195   : > { %v1269_v34 = vpop.permute.xlu1 %1268  ;;  %1197 = vst.msk [vmem:[#allocation3 + $0x48] sm:$0xf] %vm1187_vm10, %v1158_v33 }
 0x196   : > { %v823_v36 = vpop.permute.xlu2 %822  ;;  %1310 = vst.msk [vmem:[#allocation3 + $0x48] sm:$0xf] %vm1300_vm11, %v1271_v21  ;;  %4387 = vmatmul.msk.bf16.gmra.mxu1 %vm462_vm0, %v4329_v59  ;;  %v1836_v63 = vpop.f32.mrf.mxu1 }
 0x197   : > { %1309 = vst.msk [vmem:[#allocation3 + $0x40] sm:$0xf] %vm1300_vm11, %v1269_v34 }
 0x198   : > { %860 = vst.msk [vmem:[#allocation3 + $0x58] sm:$0xf] %vm848_vm5, %v823_v36 }
 0x19a   : > { %1394 = vrot.lane.b32.xlu0 %v1009_v22, %s6862_s0 }
 0x19b   : > { %1396 = vrot.lane.b32.xlu1 %v1349_v37, %s6862_s0  ;;  %v5535_v17 = vpop.f32.mrf.mxu3 }
 0x19c   : > { %1282 = vrot.lane.b32.xlu2 %v1235_v29, %s6861_s20  ;;  %v1383_v39 = vpop.permute.xlu0 %1382  ;;  %v5569_v57 = vadd.f32 %v5533_v8, %v5535_v17 }
 0x19d   : > { %v1385_v40 = vpop.permute.xlu1 %1384  ;;  %1423 = vst.msk [vmem:[#allocation3 + $0x40] sm:$0xf] %vm1414_vm12, %v1383_v39 }
 0x19e   : > { %v1047_v41 = vpop.permute.xlu2 %1046  ;;  %1536 = vst.msk [vmem:[#allocation3 + $0x40] sm:$0xf] %vm1527_vm13, %v1496_v27  ;;  %v1839_v26 = vpop.f32.mrf.mxu1 }
 0x19f   : > { %1424 = vst.msk [vmem:[#allocation3 + $0x48] sm:$0xf] %vm1414_vm12, %v1385_v40 }
 0x1a2   : > { %1509 = vrot.lane.b32.xlu0 %v1462_v42, %s6863_s15 }
 0x1a3   : > { %1903 = vrot.lane.b32.xlu1 %v4666_v43, %s6857_s16  ;;  %v1787_v22 = vpop.f32.mrf.mxu3 }
 0x1a4   : > { %1507 = vrot.lane.b32.xlu2 %v1122_v28, %s6863_s15  ;;  %v1498_v44 = vpop.permute.xlu0 %1497  ;;  %v1559_v28 = vld [vmem:[#allocation2 + $0x132] sm:$0xff] }
 0x1a5   : > { %v821_v45 = vpop.permute.xlu1 %820  ;;  %1537 = vst.msk [vmem:[#allocation3 + $0x48] sm:$0xf] %vm1527_vm13, %v1498_v44  ;;  %v4316_v48 = vld [vmem:[#allocation3 + $0x40] sm:$0xf]  ;;  %v1575_v29 = vpack.c.bf16 %v1559_v28, %v1559_v28 }
 0x1a6   : > { %v1162_v46 = vpop.permute.xlu2 %1161  ;;  %859 = vst.msk [vmem:[#allocation3 + $0x50] sm:$0xf] %vm848_vm5, %v821_v45  ;;  %4388 = vmatmul.msk.bf16.gmra.mxu1 %vm462_vm0, %v4337_v18  ;;  %v1841_v36 = vpop.f32.mrf.mxu1 }
 0x1a7   : > { %1591 = vst.msk [vmem:[#allocation3 + $0x7c] sm:$0xf] %vm735_vm4, %v1575_v29 }
 0x1ac   : > { %1925 = vrot.lane.b32.xlu2 %v4667_v47, %s6857_s16  ;;  %v934_v49 = vpop.permute.xlu0 %933  ;;  %v4570_v51 = vld [vmem:[#allocation3 + $0x44] sm:$0xf0] }
 0x1ad   : > { %v936_v50 = vpop.permute.xlu1 %935  ;;  %972 = vst.msk [vmem:[#allocation3 + $0x50] sm:$0xf] %vm961_vm6, %v934_v49  ;;  %v4317_v52 = vor.u32 %v4570_v51, %v4316_v48 }
 0x1ae   : > { %v1387_v53 = vpop.permute.xlu2 %1386  ;;  %1085 = vst.msk [vmem:[#allocation3 + $0x50] sm:$0xf] %vm1074_vm7, %v1047_v41  ;;  %v4342_v39 = vld [vmem:[#allocation3 + $0x78] sm:$0xf0]  ;;  %v1844_v43 = vpop.f32.mrf.mxu1 }
 0x1af   : > { %973 = vst.msk [vmem:[#allocation3 + $0x58] sm:$0xf] %vm961_vm6, %v936_v50  ;;  %1804 = vmatmul.bf16.gmra.mxu3 %v4317_v52  ;;  %v4345_v41 = vor.u32 %v4575_v38, %v4342_v39 }
 0x1b4   : > { %v1049_v54 = vpop.permute.xlu0 %1048 }
 0x1b5   : > { %v1160_v55 = vpop.permute.xlu1 %1159  ;;  %1086 = vst.msk [vmem:[#allocation3 + $0x58] sm:$0xf] %vm1074_vm7, %v1049_v54 }
 0x1b6   : > { %v1502_v58 = vpop.permute.xlu2 %1501  ;;  %1199 = vst.msk [vmem:[#allocation3 + $0x58] sm:$0xf] %vm1187_vm10, %v1162_v46  ;;  %4389 = vmatmul.msk.bf16.gmra.mxu1 %vm462_vm0, %v4345_v41  ;;  %v1846_v50 = vpop.f32.mrf.mxu1 }
 0x1b7   : > { %1198 = vst.msk [vmem:[#allocation3 + $0x50] sm:$0xf] %vm1187_vm10, %v1160_v55 }
 0x1bc   : > { %v1273_v60 = vpop.permute.xlu0 %1272 }
 0x1bd   : > { %v1275_v61 = vpop.permute.xlu1 %1274  ;;  %1311 = vst.msk [vmem:[#allocation3 + $0x50] sm:$0xf] %vm1300_vm11, %v1273_v60 }
 0x1be   : > { %v938_v62 = vpop.permute.xlu2 %937  ;;  %1425 = vst.msk [vmem:[#allocation3 + $0x50] sm:$0xf] %vm1414_vm12, %v1387_v53  ;;  %v1849_v56 = vpop.f32.mrf.mxu1 }
 0x1bf   : > { %1312 = vst.msk [vmem:[#allocation3 + $0x58] sm:$0xf] %vm1300_vm11, %v1275_v61 }
 0x1c2   : > { %v1790_v27 = vpop.f32.mrf.mxu3 }
 0x1c3   : > { %v5573_v59 = vadd.f32 %v1839_v26, %v1790_v27 }
 0x1c4   : > { %v1389_v1 = vpop.permute.xlu0 %1388 }
 0x1c5   : > { %v1500_v2 = vpop.permute.xlu1 %1499  ;;  %1426 = vst.msk [vmem:[#allocation3 + $0x58] sm:$0xf] %vm1414_vm12, %v1389_v1 }
 0x1c6   : > { %v1053_v3 = vpop.permute.xlu2 %1052  ;;  %1539 = vst.msk [vmem:[#allocation3 + $0x58] sm:$0xf] %vm1527_vm13, %v1502_v58  ;;  %v5571_v58 = vadd.f32 %v1836_v63, %v1787_v22 }
 0x1c7   : > { %1538 = vst.msk [vmem:[#allocation3 + $0x50] sm:$0xf] %vm1527_vm13, %v1500_v2 }
 0x1ca   : > { %v1792_v37 = vpop.f32.mrf.mxu3 }
 0x1cc   : > { %v825_v4 = vpop.permute.xlu0 %824 }
 0x1cd   : > { %v827_v0 = vpop.permute.xlu1 %826  ;;  %861 = vst.msk [vmem:[#allocation3 + $0x60] sm:$0xf] %vm848_vm5, %v825_v4  ;;  %v4572_v5 = vld [vmem:[#allocation3 + $0x54] sm:$0xf0] }
 0x1ce   : > { %v1277_v9 = vpop.permute.xlu2 %1276  ;;  %862 = vst.msk [vmem:[#allocation3 + $0x68] sm:$0xf] %vm848_vm5, %v827_v0  ;;  %v4324_v6 = vld [vmem:[#allocation3 + $0x50] sm:$0xf] }
 0x1cf   : > { %974 = vst.msk [vmem:[#allocation3 + $0x60] sm:$0xf] %vm961_vm6, %v938_v62  ;;  %v4325_v10 = vor.u32 %v4572_v5, %v4324_v6 }
 0x1d1   : > { %1809 = vmatmul.bf16.gmra.mxu3 %v4325_v10 }
 0x1d4   : > { %v940_v11 = vpop.permute.xlu0 %939 }
 0x1d5   : > { %v1051_v12 = vpop.permute.xlu1 %1050  ;;  %975 = vst.msk [vmem:[#allocation3 + $0x68] sm:$0xf] %vm961_vm6, %v940_v11  ;;  %v5595_v11 = vadd.f32 %v1841_v36, %v1792_v37 }
 0x1d6   : > { %v1393_v7 = vpop.permute.xlu2 %1392  ;;  %1087 = vst.msk [vmem:[#allocation3 + $0x60] sm:$0xf] %vm1074_vm7, %v1051_v12 }
 0x1d7   : > { %1088 = vst.msk [vmem:[#allocation3 + $0x68] sm:$0xf] %vm1074_vm7, %v1053_v3 }
 0x1dc   : > { %v1164_v13 = vpop.permute.xlu0 %1163 }
 0x1dd   : > { %v1166_v14 = vpop.permute.xlu1 %1165  ;;  %1200 = vst.msk [vmem:[#allocation3 + $0x60] sm:$0xf] %vm1187_vm10, %v1164_v13 }
 0x1de   : > { %1201 = vst.msk [vmem:[#allocation3 + $0x68] sm:$0xf] %vm1187_vm10, %v1166_v14  ;;  %v829_v19 = vpop.permute.xlu2 %828  ;;  %v1851_v14 = vpop.f32.mrf.mxu1 }
 0x1df   : > { %1313 = vst.msk [vmem:[#allocation3 + $0x60] sm:$0xf] %vm1300_vm11, %v1277_v9 }
 0x1e0   : > { %863 = vst.msk [vmem:[#allocation3 + $0x70] sm:$0xf] %vm848_vm5, %v829_v19 }
 0x1e4   : > { %v1279_v20 = vpop.permute.xlu0 %1278  ;;  %v1795_v44 = vpop.f32.mrf.mxu3 }
 0x1e5   : > { %1314 = vst.msk [vmem:[#allocation3 + $0x68] sm:$0xf] %vm1300_vm11, %v1279_v20  ;;  %v1391_v21 = vpop.permute.xlu1 %1390  ;;  %v5589_v9 = vadd.f32 %v1844_v43, %v1795_v44 }
 0x1e6   : > { %1427 = vst.msk [vmem:[#allocation3 + $0x60] sm:$0xf] %vm1414_vm12, %v1391_v21  ;;  %v944_v25 = vpop.permute.xlu2 %943 }
 0x1e7   : > { %1428 = vst.msk [vmem:[#allocation3 + $0x68] sm:$0xf] %vm1414_vm12, %v1393_v7 }
 0x1ec   : > { %v1504_v23 = vpop.permute.xlu0 %1503  ;;  %v1797_v51 = vpop.f32.mrf.mxu3 }
 0x1ed   : > { %1540 = vst.msk [vmem:[#allocation3 + $0x60] sm:$0xf] %vm1527_vm13, %v1504_v23  ;;  %v1506_v24 = vpop.permute.xlu1 %1505  ;;  %v5591_v6 = vadd.f32 %v1846_v50, %v1797_v51 }
 0x1ee   : > { %1541 = vst.msk [vmem:[#allocation3 + $0x68] sm:$0xf] %vm1527_vm13, %v1506_v24  ;;  %v1168_v35 = vpop.permute.xlu2 %1167 }
 0x1f0   : > { %v5557_v48 = vpop.f32.mrf.mxu2 }
 0x1f1   : > { %v598_v49 = vperm.slane %v5557_v48, 0  ;;  %v5617_v22 = vrot.slane %v5557_v48, 1 }
 0x1f3   : > { %612 = vrot.lane.b32.xlu2 %v598_v49, %s6843_s1  ;;  %606 = vrot.lane.b32.xlu1 %v598_v49, %s6847_s2 }
 0x1f4   : > { %v831_v30 = vpop.permute.xlu0 %830  ;;  %v4332_v31 = vld [vmem:[#allocation3 + $0x60] sm:$0xf]  ;;  %600 = vrot.lane.b32.xlu0 %v598_v49, %s6845_s22 }
 0x1f5   : > { %864 = vst.msk [vmem:[#allocation3 + $0x78] sm:$0xf] %vm848_vm5, %v831_v30  ;;  %v942_v32 = vpop.permute.xlu1 %941  ;;  %v4574_v33 = vld [vmem:[#allocation3 + $0x64] sm:$0xf0] }
 0x1f6   : > { %976 = vst.msk [vmem:[#allocation3 + $0x70] sm:$0xf] %vm961_vm6, %v942_v32  ;;  %v4333_v34 = vor.u32 %v4574_v33, %v4332_v31  ;;  %v1283_v45 = vpop.permute.xlu2 %1282 }
 0x1f7   : > { %977 = vst.msk [vmem:[#allocation3 + $0x78] sm:$0xf] %vm961_vm6, %v944_v25  ;;  %v599_v25 = vperm.slane %v5617_v22, 0 }
 0x1f8   : > { %1814 = vmatmul.bf16.gmra.mxu3 %v4333_v34 }
 0x1fc   : > { %v1055_v40 = vpop.permute.xlu0 %1054 }
 0x1fd   : > { %1089 = vst.msk [vmem:[#allocation3 + $0x70] sm:$0xf] %vm1074_vm7, %v1055_v40  ;;  %v1057_v42 = vpop.permute.xlu1 %1056 }
 0x1fe   : > { %1090 = vst.msk [vmem:[#allocation3 + $0x78] sm:$0xf] %vm1074_vm7, %v1057_v42  ;;  %v1508_v52 = vpop.permute.xlu2 %1507 }
 0x1ff   : > { %1202 = vst.msk [vmem:[#allocation3 + $0x70] sm:$0xf] %vm1187_vm10, %v1168_v35 }
 0x203   : > { %v1854_v27 = vpop.f32.mrf.mxu1 }
 0x204   : > { %v1170_v46 = vpop.permute.xlu0 %1169 }
 0x205   : > { %1203 = vst.msk [vmem:[#allocation3 + $0x78] sm:$0xf] %vm1187_vm10, %v1170_v46  ;;  %v1281_v47 = vpop.permute.xlu1 %1280 }
 0x206   : > { %1315 = vst.msk [vmem:[#allocation3 + $0x70] sm:$0xf] %vm1300_vm11, %v1281_v47  ;;  %v5578_v62 = vpop.permute.xlu2 %1925 }
 0x207   : > { %1316 = vst.msk [vmem:[#allocation3 + $0x78] sm:$0xf] %vm1300_vm11, %v1283_v45 }
 0x20b   : > { %v1800_v55 = vpop.f32.mrf.mxu3  ;;  %v1856_v32 = vpop.f32.mrf.mxu1 }
 0x20c   : > { %v1395_v53 = vpop.permute.xlu0 %1394  ;;  %v5611_v21 = vadd.f32 %v1849_v56, %v1800_v55 }
 0x20d   : > { %1429 = vst.msk [vmem:[#allocation3 + $0x70] sm:$0xf] %vm1414_vm12, %v1395_v53  ;;  %v1397_v54 = vpop.permute.xlu1 %1396 }
 0x20e   : > { %1430 = vst.msk [vmem:[#allocation3 + $0x78] sm:$0xf] %vm1414_vm12, %v1397_v54 }
 0x20f   : > { %1542 = vst.msk [vmem:[#allocation3 + $0x70] sm:$0xf] %vm1527_vm13, %v1508_v52 }
 0x213   : > { %v1802_v13 = vpop.f32.mrf.mxu3  ;;  %v1859_v37 = vpop.f32.mrf.mxu1 }
 0x214   : > { %v1510_v60 = vpop.permute.xlu0 %1509  ;;  %v5604_v17 = vadd.f32 %v1851_v14, %v1802_v13  ;;  %v4668_v14 = vld [vmem:[%s6821_s6] ss:$0 sm:$0xff] }
 0x215   : > { %1543 = vst.msk [vmem:[#allocation3 + $0x78] sm:$0xf] %vm1527_vm13, %v1510_v60  ;;  %v5576_v61 = vpop.permute.xlu1 %1903 }
 0x216   : > { %v1908_v1 = vmul.f32 %v5576_v61, %v5573_v59  ;;  %v1907_v2 = vmul.f32 %v5576_v61, %v5571_v58  ;;  %v1906_v3 = vmul.f32 %v5576_v61, %v5569_v57  ;;  %v4340_v10 = vld [vmem:[#allocation3 + $0x70] sm:$0xf]  ;;  %v1911_v7 = vmul.f32 %v5576_v61, %v5591_v6 }
 0x217   : > { %v1910_v8 = vmul.f32 %v5576_v61, %v5589_v9  ;;  %v1909_v16 = vmul.f32 %v5576_v61, %v5595_v11  ;;  %v1913_v63 = vmul.f32 %v5576_v61, %v5604_v17  ;;  %v1912_v23 = vmul.f32 %v5576_v61, %v5611_v21 }
 0x218   : > { %v1930_v4 = vadd.f32 %v5578_v62, %v1908_v1  ;;  %v1929_v0 = vadd.f32 %v5578_v62, %v1907_v2  ;;  %v1928_v5 = vadd.f32 %v5578_v62, %v1906_v3  ;;  %v1933_v18 = vadd.f32 %v5578_v62, %v1911_v7 }
 0x219   : > { %v1932_v19 = vadd.f32 %v5578_v62, %v1910_v8  ;;  %v1931_v20 = vadd.f32 %v5578_v62, %v1909_v16  ;;  %v1935_v24 = vadd.f32 %v5578_v62, %v1913_v63  ;;  %v1934_v26 = vadd.f32 %v5578_v62, %v1912_v23 }
 0x21a   : > { %1956 = vrot.lane.b32.xlu2 %v1930_v4, %s6863_s15  ;;  %1954 = vrot.lane.b32.xlu1 %v1929_v0, %s6863_s15 }
 0x21b   : > { %1952 = vrot.lane.b32.xlu0 %v1928_v5, %s6863_s15  ;;  %v1861_v42 = vpop.f32.mrf.mxu1 }
 0x21c   : > { %v4576_v12 = vld [vmem:[#allocation3 + $0x74] sm:$0xf0] }
 0x21d   : > { %v4341_v15 = vor.u32 %v4576_v12, %v4340_v10  ;;  %v628_v10 = vadd.f32 3.0, %v5617_v22 }
 0x21f   : > { %1819 = vmatmul.bf16.gmra.mxu3 %v4341_v15  ;;  %v630_v7 = vmax.f32 %v628_v10, 0.0 }
 0x221   : > { %v632_v15 = vmin.f32 %v630_v7, 6.0 }
 0x222   : > { %1962 = vrot.lane.b32.xlu2 %v1933_v18, %s6863_s15  ;;  %1960 = vrot.lane.b32.xlu1 %v1932_v19, %s6863_s15 }
 0x223   : > { %1958 = vrot.lane.b32.xlu0 %v1931_v20, %s6863_s15  ;;  %v1864_v47 = vpop.f32.mrf.mxu1  ;;  %v634_v16 = vmul.f32 0.16666667, %v632_v15 }
 0x225   : > { %v1877_v63 = vperm.slane %v634_v16, 0 }
 0x22a   : > { %1966 = vrot.lane.b32.xlu1 %v1935_v24, %s6863_s15  ;;  %602 = vrot.lane.b32.xlu2 %v599_v25, %s6845_s22 }
 0x22b   : > { %1964 = vrot.lane.b32.xlu0 %v1934_v26, %s6863_s15  ;;  %v1866_v2 = vpop.f32.mrf.mxu1 }
 0x232   : > { %v1805_v28 = vpop.f32.mrf.mxu3  ;;  %614 = vrot.lane.b32.xlu1 %v599_v25, %s6843_s1  ;;  %s6866_s1 = smov 124  }
 0x233   : > { %v5628_v29 = vadd.f32 %v1854_v27, %v1805_v28  ;;  %608 = vrot.lane.b32.xlu0 %v599_v25, %s6847_s2  ;;  %v1869_v25 = vpop.f32.mrf.mxu1 }
 0x235   : > { %v1914_v30 = vmul.f32 %v5576_v61, %v5628_v29 }
 0x237   : > { %v1936_v31 = vadd.f32 %v5578_v62, %v1914_v30 }
 0x239   : > { %2036 = vrot.lane.b32.xlu2 %v1936_v31, %s6863_s15 }
 0x23a   : > { %v1807_v33 = vpop.f32.mrf.mxu3 }
 0x23b   : > { %v5635_v34 = vadd.f32 %v1856_v32, %v1807_v33 }
 0x23d   : > { %v1915_v35 = vmul.f32 %v5576_v61, %v5635_v34 }
 0x23f   : > { %v1937_v36 = vadd.f32 %v5578_v62, %v1915_v35 }
 0x241   : > { %2038 = vrot.lane.b32.xlu0 %v1937_v36, %s6863_s15 }
 0x24d   : > { %v613_v55 = vpop.permute.xlu2 %612 }
 0x254   : > { %v1810_v38 = vpop.f32.mrf.mxu3 }
 0x255   : > { %v5641_v39 = vadd.f32 %v1859_v37, %v1810_v38  ;;  %v627_v37 = vadd.f32 3.0, %v5557_v48 }
 0x257   : > { %v1916_v40 = vmul.f32 %v5576_v61, %v5641_v39 }
 0x259   : > { %v1938_v41 = vadd.f32 %v5578_v62, %v1916_v40 }
 0x25b   : > { %2040 = vrot.lane.b32.xlu1 %v1938_v41, %s6863_s15 }
 0x25c   : > { %v1812_v43 = vpop.f32.mrf.mxu3 }
 0x25d   : > { %v5647_v44 = vadd.f32 %v1861_v42, %v1812_v43  ;;  %v629_v43 = vmax.f32 %v627_v37, 0.0 }
 0x25f   : > { %v1917_v45 = vmul.f32 %v5576_v61, %v5647_v44 }
 0x261   : > { %v1939_v46 = vadd.f32 %v5578_v62, %v1917_v45  ;;  %v4669_v45 = vld [vmem:[%s6821_s6 + $0x1] ss:$0 sm:$0xff] }
 0x263   : > { %2042 = vrot.lane.b32.xlu2 %v1939_v46, %s6863_s15 }
 0x265   : > { %v607_v50 = vpop.permute.xlu1 %606 }
 0x266   : > { %v601_v52 = vpop.permute.xlu0 %600 }
 0x267   : > { %v619_v53 = vsel %vm618_vm14, %v5557_v48, %v601_v52 }
 0x268   : > { %v622_v56 = vsel %vm621_vm15, %v619_v53, %v607_v50 }
 0x269   : > { %v625_v60 = vsel %vm624_vm1, %v622_v56, %v613_v55  ;;  %v2196_v56 = vld [vmem:[%s6820_s5] sm:$0x3] }
 0x26a   : > { %4390 = vmatpush.xpose.msk.msra.mxu2 %vm536_vm9, %v625_v60  ;;  %v2222_v60 = vsel %vm621_vm15, %v2196_v56, 0 }
 0x26e   : > { %2231 = vmatpush.bf16.msrb.mxu2 %v2222_v60 }
 0x274   : > { %v5671_v12 = vpop.permute.xlu2 %1956 }
 0x27b   : > { %v1815_v49 = vpop.f32.mrf.mxu3 }
 0x27c   : > { %v5653_v51 = vadd.f32 %v1864_v47, %v1815_v49  ;;  %v5687_v20 = vpop.permute.xlu2 %1962  ;;  %v631_v47 = vmin.f32 %v629_v43, 6.0 }
 0x27e   : > { %v1918_v54 = vmul.f32 %v5576_v61, %v5653_v51  ;;  %v633_v49 = vmul.f32 0.16666667, %v631_v47 }
 0x280   : > { %v1940_v1 = vadd.f32 %v5578_v62, %v1918_v54 }
 0x282   : > { %2044 = vrot.lane.b32.xlu0 %v1940_v1, %s6863_s15 }
 0x283   : > { %v1817_v3 = vpop.f32.mrf.mxu3 }
 0x284   : > { %v5664_v4 = vadd.f32 %v1866_v2, %v1817_v3  ;;  %v603_v26 = vpop.permute.xlu2 %602 }
 0x285   : > { %v620_v31 = vsel %vm618_vm14, %v5617_v22, %v603_v26  ;;  %v1871_v22 = vpop.f32.mrf.mxu1 }
 0x286   : > { %v1919_v0 = vmul.f32 %v5576_v61, %v5664_v4 }
 0x288   : > { %v1941_v5 = vadd.f32 %v5578_v62, %v1919_v0 }
 0x28a   : > { %2046 = vrot.lane.b32.xlu1 %v1941_v5, %s6863_s15 }
 0x28c   : > { %v5673_v8 = vpop.permute.xlu1 %1954 }
 0x28d   : > { %v5675_v13 = vpop.permute.xlu0 %1952 }
 0x28e   : > { %4391 = vmatmul.msk.f32.vlgmr.msra.gmra.mxu2 %vm536_vm9, %v5675_v13 }
 0x292   : > { %2115 = vrot.lane.b32.xlu1 %v4668_v14, %s6845_s22 }
 0x293   : > { %v5713_v40 = vpop.permute.xlu2 %2036 }
 0x294   : > { %v5683_v18 = vpop.permute.xlu1 %1960 }
 0x295   : > { %v5685_v19 = vpop.permute.xlu0 %1958 }
 0x296   : > { %4392 = vmatmul.msk.f32.gmra.mxu2 %vm536_vm9, %v5673_v8 }
 0x29a   : > { %1880 = vrot.lane.b32.xlu1 %v1877_v63, %s6863_s15 }
 0x29c   : > { %v5692_v23 = vpop.permute.xlu1 %1966 }
 0x29d   : > { %v5694_v24 = vpop.permute.xlu0 %1964 }
 0x29e   : > { %4393 = vmatmul.msk.f32.gmra.mxu2 %vm536_vm9, %v5671_v12 }
 0x2a2   : > { %v1820_v27 = vpop.f32.mrf.mxu3 }
 0x2a3   : > { %v5698_v28 = vadd.f32 %v1869_v25, %v1820_v27 }
 0x2a4   : > { %v615_v30 = vpop.permute.xlu1 %614 }
 0x2a5   : > { %v1920_v32 = vmul.f32 %v5576_v61, %v5698_v28  ;;  %v609_v33 = vpop.permute.xlu0 %608 }
 0x2a6   : > { %v623_v35 = vsel %vm621_vm15, %v620_v31, %v609_v33  ;;  %4394 = vmatmul.msk.f32.gmra.mxu2 %vm536_vm9, %v5685_v19 }
 0x2a7   : > { %v1942_v36 = vadd.f32 %v5578_v62, %v1920_v32  ;;  %v626_v38 = vsel %vm624_vm1, %v623_v35, %v615_v30 }
 0x2a8   : > { %4399 = vmatpush.xpose.msk.msrb.mxu0 %vm536_vm9, %v626_v38  ;;  %4612 = vmatpush.xpose.msk.msrb.mxu1 %vm536_vm9, %v626_v38 }
 0x2a9   : > { %2048 = vrot.lane.b32.xlu2 %v1942_v36, %s6863_s15 }
 0x2aa   : > { %v1822_v41 = vpop.f32.mrf.mxu3 }
 0x2ab   : > { %v5715_v42 = vadd.f32 %v1871_v22, %v1822_v41  ;;  %4400 = vmatmul.msk.f32.vlgmr.msrb.gmra.mxu0 %vm536_vm9, %v5713_v40 }
 0x2ad   : > { %v1921_v48 = vmul.f32 %v5576_v61, %v5715_v42  ;;  %v1876_v61 = vperm.slane %v633_v49, 0 }
 0x2ae   : > { %4395 = vmatmul.msk.f32.gmra.mxu2 %vm536_vm9, %v5683_v18 }
 0x2af   : > { %v1943_v46 = vadd.f32 %v5578_v62, %v1921_v48 }
 0x2b1   : > { %2050 = vrot.lane.b32.xlu0 %v1943_v46, %s6863_s15  ;;  %2137 = vrot.lane.b32.xlu2 %v4669_v45, %s6845_s22 }
 0x2b3   : > { %v5729_v50 = vpop.permute.xlu0 %2038 }
 0x2b4   : > { %4401 = vmatmul.msk.f32.gmra.mxu0 %vm536_vm9, %v5729_v50 }
 0x2b6   : > { %4396 = vmatmul.msk.f32.gmra.mxu2 %vm536_vm9, %v5687_v20 }
 0x2b9   : > { %1878 = vrot.lane.b32.xlu0 %v1876_v61, %s6863_s15  ;;  %2273 = vrot.lane.b32.xlu2 %v4668_v14, %s6847_s2 }
 0x2bd   : > { %v5746_v52 = vpop.permute.xlu2 %2042 }
 0x2be   : > { %4397 = vmatmul.msk.f32.gmra.mxu2 %vm536_vm9, %v5694_v24 }
 0x2c1   : > { %2292 = vrot.lane.b32.xlu0 %v4669_v45, %s6847_s2 }
 0x2c6   : > { %4398 = vmatmul.msk.f32.gmra.mxu2 %vm536_vm9, %v5692_v23 }
 0x2cd   : > { %v5742_v62 = vpop.permute.xlu1 %2040 }
 0x2ce   : > { %4402 = vmatmul.msk.f32.gmra.mxu0 %vm536_vm9, %v5742_v62 }
 0x2d6   : > { %4403 = vmatmul.msk.f32.gmra.mxu0 %vm536_vm9, %v5746_v52 }
 0x2f4   : > { %v5750_v53 = vpop.permute.xlu0 %2044 }
 0x2f5   : > { %4404 = vmatmul.msk.f32.gmra.mxu0 %vm536_vm9, %v5750_v53 }
 0x2fc   : > { %v5754_v54 = vpop.permute.xlu1 %2046 }
 0x2fd   : > { %4405 = vmatmul.msk.f32.vlgmr.msrb.gmra.mxu1 %vm536_vm9, %v5754_v54 }
 0x303   : > { %v5758_v55 = vpop.permute.xlu2 %2048 }
 0x304   : > { %v5766_v2 = vpop.permute.xlu1 %2115 }
 0x305   : > { %4406 = vmatmul.msk.f32.gmra.mxu1 %vm536_vm9, %v5758_v55 }
 0x30b   : > { %v5769_v0 = vpop.permute.xlu2 %2137 }
 0x311   : > { %v2004_v1 = vpop.f32.mrf.mxu2 }
 0x312   : > { %v2118_v3 = vmul.f32 %v5766_v2, %v2004_v1 }
 0x314   : > { %v2140_v7 = vadd.f32 %v5769_v0, %v2118_v3 }
 0x316   : > { %v2172_v15 = vadd.f32 %v2140_v7, %v5675_v13 }
 0x319   : > { %v2007_v5 = vpop.f32.mrf.mxu2 }
 0x31a   : > { %v2119_v10 = vmul.f32 %v5766_v2, %v2007_v5 }
 0x31c   : > { %v2141_v14 = vadd.f32 %v5769_v0, %v2119_v10 }
 0x31e   : > { %v2173_v16 = vadd.f32 %v2141_v14, %v5673_v8 }
 0x320   : > { %v2188_v63 = vpack.c.bf16 %v2173_v16, %v2172_v15 }
 0x321   : > { %v2010_v25 = vpop.f32.mrf.mxu2 }
 0x322   : > { %4408 = vmatmul.msk.bf16.vlgmr.msrb.gmra.mxu2 %vm536_vm9, %v2188_v63  ;;  %v2120_v27 = vmul.f32 %v5766_v2, %v2010_v25 }
 0x323   : > { %v5777_v26 = vpop.permute.xlu0 %2050 }
 0x324   : > { %4407 = vmatmul.msk.f32.gmra.mxu1 %vm536_vm9, %v5777_v26  ;;  %v2142_v31 = vadd.f32 %v5769_v0, %v2120_v27 }
 0x326   : > { %v2174_v8 = vadd.f32 %v2142_v31, %v5671_v12 }
 0x329   : > { %v2013_v30 = vpop.f32.mrf.mxu2 }
 0x32a   : > { %v2121_v32 = vmul.f32 %v5766_v2, %v2013_v30 }
 0x32c   : > { %v2143_v13 = vadd.f32 %v5769_v0, %v2121_v32 }
 0x32e   : > { %v2175_v33 = vadd.f32 %v2143_v13, %v5685_v19  ;;  %v2088_v19 = vpop.f32.mrf.mxu0 }
 0x32f   : > { %v2126_v10 = vmul.f32 %v5766_v2, %v2088_v19 }
 0x330   : > { %v2189_v35 = vpack.c.bf16 %v2175_v33, %v2174_v8 }
 0x331   : > { %v2016_v36 = vpop.f32.mrf.mxu2  ;;  %v2148_v15 = vadd.f32 %v5769_v0, %v2126_v10 }
 0x332   : > { %4409 = vmatmul.msk.bf16.gmra.mxu2 %vm536_vm9, %v2189_v35  ;;  %v2122_v37 = vmul.f32 %v5766_v2, %v2016_v36 }
 0x333   : > { %v2180_v63 = vadd.f32 %v2148_v15, %v5713_v40 }
 0x334   : > { %v2144_v22 = vadd.f32 %v5769_v0, %v2122_v37 }
 0x336   : > { %v2176_v48 = vadd.f32 %v2144_v22, %v5683_v18  ;;  %v2091_v1 = vpop.f32.mrf.mxu0 }
 0x337   : > { %v2127_v5 = vmul.f32 %v5766_v2, %v2091_v1 }
 0x339   : > { %v2019_v38 = vpop.f32.mrf.mxu2  ;;  %v2149_v14 = vadd.f32 %v5769_v0, %v2127_v5 }
 0x33a   : > { %v2123_v41 = vmul.f32 %v5766_v2, %v2019_v38 }
 0x33b   : > { %v2181_v16 = vadd.f32 %v2149_v14, %v5729_v50 }
 0x33c   : > { %v2145_v43 = vadd.f32 %v5769_v0, %v2123_v41  ;;  %v2607_v41 = vld [vmem:[#allocation4 + $0x1] sm:$0xff] }
 0x33d   : > { %v2192_v25 = vpack.c.bf16 %v2181_v16, %v2180_v63 }
 0x33e   : > { %v2177_v45 = vadd.f32 %v2145_v43, %v5687_v20 }
 0x340   : > { %v2190_v12 = vpack.c.bf16 %v2177_v45, %v2176_v48  ;;  %v2623_v48 = vpack.c.bf16 %v2607_v41, %v2607_v41  ;;  %v3287_v45 = vld [vmem:[#allocation4 + $0x91] sm:$0xff] }
 0x341   : > { %v2022_v46 = vpop.f32.mrf.mxu2 }
 0x342   : > { %4410 = vmatmul.msk.bf16.gmra.mxu2 %vm536_vm9, %v2190_v12  ;;  %v2124_v47 = vmul.f32 %v5766_v2, %v2022_v46  ;;  %v3303_v12 = vpack.c.bf16 %v3287_v45, %v3287_v45  ;;  %2655 = vrot.lane.b32.xlu1 %v2623_v48, %s6857_s16  ;;  %v3175_v46 = vld [vmem:[#allocation4 + $0x90] sm:$0xff] }
 0x343   : > { %v3191_v19 = vpack.c.bf16 %v3175_v46, %v3175_v46 }
 0x344   : > { %v2146_v61 = vadd.f32 %v5769_v0, %v2124_v47  ;;  %3342 = vrot.lane.b32.xlu2 %v3303_v12, %s6863_s15  ;;  %v5828_v47 = vpop.permute.xlu0 %1878 }
 0x345   : > { %v1884_v5 = vmul.f32 %v5828_v47, %v5569_v57  ;;  %v1885_v57 = vmul.f32 %v5828_v47, %v5571_v58 }
 0x346   : > { %v2178_v3 = vadd.f32 %v2146_v61, %v5694_v24  ;;  %v2727_v61 = vld [vmem:[#allocation4 + $0xa2] sm:$0xff] }
 0x347   : > { %v2743_v1 = vpack.c.bf16 %v2727_v61, %v2727_v61 }
 0x349   : > { %v2025_v49 = vpop.f32.mrf.mxu2 }
 0x34a   : > { %v2125_v56 = vmul.f32 %v5766_v2, %v2025_v49  ;;  %v2615_v49 = vld [vmem:[#allocation4 + $0xa1] sm:$0xff] }
 0x34b   : > { %v2094_v7 = vpop.f32.mrf.mxu0 }
 0x34c   : > { %v2147_v60 = vadd.f32 %v5769_v0, %v2125_v56  ;;  %v2128_v27 = vmul.f32 %v5766_v2, %v2094_v7  ;;  %2783 = vrot.lane.b32.xlu2 %v2743_v1, %s6858_s30  ;;  %v5837_v7 = vpop.permute.xlu2 %2273  ;;  %v5841_v63 = vpop.permute.xlu0 %2292 }
 0x34e   : > { %v2179_v18 = vadd.f32 %v2147_v60, %v5692_v23  ;;  %v2150_v31 = vadd.f32 %v5769_v0, %v2128_v27  ;;  %v2631_v60 = vpack.c.bf16 %v2615_v49, %v2615_v49 }
 0x350   : > { %v2191_v20 = vpack.c.bf16 %v2179_v18, %v2178_v3  ;;  %v2182_v13 = vadd.f32 %v2150_v31, %v5742_v62  ;;  %v2719_v62 = vld [vmem:[#allocation4 + $0x2] sm:$0xff]  ;;  %v1886_v31 = vmul.f32 %v5828_v47, %v5573_v59 }
 0x351   : > { %v2735_v43 = vpack.c.bf16 %v2719_v62, %v2719_v62  ;;  %v1887_v62 = vmul.f32 %v5828_v47, %v5595_v11  ;;  %v4610_v11 = vld [vmem:[%s6822_s7 + $0x40] sm:$0xff] }
 0x352   : > { %4411 = vmatmul.msk.bf16.gmra.mxu2 %vm536_vm9, %v2191_v20  ;;  %3680 = vmatpush.bf16.msra.mxu1 %v4610_v11 }
 0x353   : > { %v2097_v24 = vpop.f32.mrf.mxu0  ;;  %2767 = vrot.lane.b32.xlu0 %v2735_v43, %s6858_s30 }
 0x354   : > { %v2129_v23 = vmul.f32 %v5766_v2, %v2097_v24 }
 0x356   : > { %v2151_v30 = vadd.f32 %v5769_v0, %v2129_v23 }
 0x358   : > { %v2183_v32 = vadd.f32 %v2151_v30, %v5746_v52 }
 0x35a   : > { %v2193_v8 = vpack.c.bf16 %v2183_v32, %v2182_v13 }
 0x35b   : > { %3230 = vrot.lane.b32.xlu0 %v3191_v19, %s6862_s0 }
 0x362   : > { %4412 = vmatmul.msk.bf16.gmra.mxu2 %vm536_vm9, %v2192_v25 }
 0x363   : > { %2671 = vrot.lane.b32.xlu0 %v2631_v60, %s6857_s16  ;;  %v1888_v60 = vmul.f32 %v5828_v47, %v5589_v9 }
 0x372   : > { %4413 = vmatmul.msk.bf16.gmra.mxu2 %vm536_vm9, %v2193_v8  ;;  %v2100_v40 = vpop.f32.mrf.mxu0 }
 0x373   : > { %v2130_v50 = vmul.f32 %v5766_v2, %v2100_v40 }
 0x375   : > { %v2152_v35 = vadd.f32 %v5769_v0, %v2130_v50 }
 0x377   : > { %v2184_v38 = vadd.f32 %v2152_v35, %v5750_v53 }
 0x37a   : > { %v2103_v33 = vpop.f32.mrf.mxu1 }
 0x37b   : > { %v2131_v36 = vmul.f32 %v5766_v2, %v2103_v33 }
 0x37d   : > { %v2153_v37 = vadd.f32 %v5769_v0, %v2131_v36 }
 0x37f   : > { %v2185_v22 = vadd.f32 %v2153_v37, %v5754_v54 }
 0x381   : > { %v2194_v52 = vpack.c.bf16 %v2185_v22, %v2184_v38 }
 0x382   : > { %v2106_v53 = vpop.f32.mrf.mxu1 }
 0x383   : > { %4414 = vmatmul.msk.bf16.gmra.mxu2 %vm536_vm9, %v2194_v52  ;;  %v2132_v54 = vmul.f32 %v5766_v2, %v2106_v53 }
 0x385   : > { %v2154_v3 = vadd.f32 %v5769_v0, %v2132_v54 }
 0x387   : > { %v2186_v14 = vadd.f32 %v2154_v3, %v5758_v55 }
 0x3a1   : > { %v2109_v56 = vpop.f32.mrf.mxu1 }
 0x3a2   : > { %v2133_v18 = vmul.f32 %v5766_v2, %v2109_v56 }
 0x3a4   : > { %v2155_v20 = vadd.f32 %v5769_v0, %v2133_v18 }
 0x3a5   : > { %v2233_v10 = vpop.f32.mrf.mxu2 }
 0x3a6   : > { %v2187_v15 = vadd.f32 %v2155_v20, %v5777_v26  ;;  %v2234_v16 = vadd.f32 %v2233_v10, %v1884_v5 }
 0x3a8   : > { %v2195_v2 = vpack.c.bf16 %v2187_v15, %v2186_v14  ;;  %v2276_v25 = vmul.f32 %v5837_v7, %v2234_v16 }
 0x3aa   : > { %4415 = vmatmul.msk.bf16.gmra.mxu2 %vm536_vm9, %v2195_v2  ;;  %v2295_v0 = vadd.f32 %v5841_v63, %v2276_v25 }
 0x3ac   : > { %v2311_v24 = vmax.f32 %v2295_v0, 0.0  ;;  %v1889_v0 = vmul.f32 %v5828_v47, %v5591_v6 }
 0x3ad   : > { %v2235_v23 = vpop.f32.mrf.mxu2 }
 0x3ae   : > { %v2236_v27 = vadd.f32 %v2235_v23, %v1885_v57  ;;  %2543 = vst.msk [vmem:[#allocation4 + $0x11] sm:$0xff] %vm462_vm0, %v2311_v24  ;;  %v2327_v32 = vsel %vm462_vm0, %v2311_v24, 0.0 }
 0x3b0   : > { %v2277_v55 = vmul.f32 %v5837_v7, %v2236_v27 }
 0x3b2   : > { %v2296_v26 = vadd.f32 %v5841_v63, %v2277_v55 }
 0x3b4   : > { %v2312_v30 = vmax.f32 %v2296_v26, 0.0 }
 0x3b5   : > { %v2238_v13 = vpop.f32.mrf.mxu2  ;;  %v3055_v8 = vld [vmem:[#allocation4 + $0x12] sm:$0xff] }
 0x3b6   : > { %v2608_v40 = vld [vmem:[#allocation4 + $0x11] sm:$0xff]  ;;  %v2328_v58 = vsel %vm462_vm0, %v2312_v30, 0.0  ;;  %2544 = vst.msk [vmem:[#allocation4 + $0x21] sm:$0xff] %vm462_vm0, %v2312_v30  ;;  %v2239_v33 = vadd.f32 %v2238_v13, %v1886_v31  ;;  %v3071_v35 = vpack.c.bf16 %v3055_v8, %v3055_v8 }
 0x3b7   : > { %v2831_v50 = vld [vmem:[#allocation4 + $0x10] sm:$0xff]  ;;  %v2624_v36 = vpack.c.bf16 %v2608_v40, %v2608_v40  ;;  %v2329_v37 = vadd.f32 %v2328_v58, %v2327_v32 }
 0x3b8   : > { %v2847_v38 = vpack.c.bf16 %v2831_v50, %v2831_v50  ;;  %v2278_v22 = vmul.f32 %v5837_v7, %v2239_v33  ;;  %3103 = vrot.lane.b32.xlu0 %v3071_v35, %s6861_s20  ;;  %2769 = vrot.lane.b32.xlu1 %v3071_v35, %s6858_s30  ;;  %v1890_v33 = vmul.f32 %v5828_v47, %v5611_v21 }
 0x3b9   : > { %2657 = vrot.lane.b32.xlu2 %v2624_v36, %s6857_s16 }
 0x3ba   : > { %2592 = vst.msk [vmem:[#allocation5 + $0x8] sm:$0xf] %vm735_vm4, %v2847_v38  ;;  %v2297_v59 = vadd.f32 %v5841_v63, %v2278_v22 }
 0x3bc   : > { %v2313_v52 = vmax.f32 %v2297_v59, 0.0 }
 0x3bd   : > { %v3392_v41 = vld [vmem:[#allocation4 + $0x22] sm:$0xff]  ;;  %v2240_v43 = vpop.f32.mrf.mxu2 }
 0x3be   : > { %v2832_v48 = vld [vmem:[#allocation4 + $0x20] sm:$0xff]  ;;  %v5864_v45 = vpack.c.bf16 %v3392_v41, %v3392_v41  ;;  %v2330_v12 = vsel %vm462_vm0, %v2313_v52, 0.0  ;;  %2545 = vst.msk [vmem:[#allocation4 + $0x31] sm:$0xff] %vm462_vm0, %v2313_v52  ;;  %v2241_v46 = vadd.f32 %v2240_v43, %v1887_v62 }
 0x3bf   : > { %v2848_v19 = vpack.c.bf16 %v2832_v48, %v2832_v48  ;;  %v2331_v53 = vadd.f32 %v2330_v12, %v2329_v37  ;;  %v2609_v61 = vld [vmem:[#allocation4 + $0x21] sm:$0xff]  ;;  %v1891_v12 = vmul.f32 %v5828_v47, %v5604_v17 }
 0x3c0   : > { %3424 = vst.msk [vmem:[#allocation5 + $0x4] sm:$0xf] %vm735_vm4, %v5864_v45  ;;  %v2279_v54 = vmul.f32 %v5837_v7, %v2241_v46  ;;  %2991 = vrot.lane.b32.xlu1 %v2624_v36, %s6860_s24  ;;  %v2625_v18 = vpack.c.bf16 %v2609_v61, %v2609_v61 }
 0x3c1   : > { %2881 = vrot.lane.b32.xlu0 %v2848_v19, %s6859_s23  ;;  %2879 = vrot.lane.b32.xlu2 %v2847_v38, %s6859_s23  ;;  %2593 = vst.msk [vmem:[#allocation5 + $0x10] sm:$0xf] %vm735_vm4, %v2848_v19 }
 0x3c2   : > { %v2298_v49 = vadd.f32 %v5841_v63, %v2279_v54 }
 0x3c4   : > { %v2314_v56 = vmax.f32 %v2298_v49, 0.0 }
 0x3c5   : > { %v3393_v1 = vld [vmem:[#allocation4 + $0x32] sm:$0xff]  ;;  %v2243_v3 = vpop.f32.mrf.mxu2 }
 0x3c6   : > { %v3169_v20 = vld [vmem:[#allocation4 + $0x30] sm:$0xff]  ;;  %v5881_v5 = vpack.c.bf16 %v3393_v1, %v3393_v1  ;;  %v2332_v10 = vsel %vm462_vm0, %v2314_v56, 0.0  ;;  %2546 = vst.msk [vmem:[#allocation4 + $0x41] sm:$0xff] %vm462_vm0, %v2314_v56  ;;  %v2244_v14 = vadd.f32 %v2243_v3, %v1888_v60  ;;  %v5949_v1 = vpop.permute.xlu1 %1880 }
 0x3c7   : > { %v5885_v15 = vpack.c.bf16 %v3169_v20, %v3169_v20  ;;  %v2333_v16 = vadd.f32 %v2332_v10, %v2331_v53  ;;  %v4586_v31 = vld [vmem:[#allocation5 + $0x4] sm:$0xf]  ;;  %v2610_v50 = vld [vmem:[#allocation4 + $0x31] sm:$0xff] }
 0x3c8   : > { %3425 = vst.msk [vmem:[#allocation5 + $0xc] sm:$0xf] %vm735_vm4, %v5881_v5  ;;  %v2280_v2 = vmul.f32 %v5837_v7, %v2244_v14  ;;  %3105 = vrot.lane.b32.xlu1 %v5864_v45, %s6861_s20  ;;  %v2626_v59 = vpack.c.bf16 %v2610_v50, %v2610_v50  ;;  %v3399_v20 = vld [vmem:[#allocation4 + $0x92] sm:$0xff]  ;;  %v1892_v14 = vmul.f32 %v5949_v1, %v5628_v29 }
 0x3c9   : > { %2659 = vrot.lane.b32.xlu0 %v2625_v18, %s6857_s16  ;;  %2993 = vrot.lane.b32.xlu2 %v2625_v18, %s6860_s24  ;;  %2594 = vst.msk [vmem:[#allocation5 + $0x18] sm:$0xf] %vm735_vm4, %v5885_v15 }
 0x3ca   : > { %v2299_v9 = vadd.f32 %v5841_v63, %v2280_v2 }
 0x3cc   : > { %v2315_v25 = vmax.f32 %v2299_v9, 0.0 }
 0x3cd   : > { %v3394_v57 = vld [vmem:[#allocation4 + $0x42] sm:$0xff]  ;;  %v2245_v24 = vpop.f32.mrf.mxu2 }
 0x3ce   : > { %v3170_v23 = vld [vmem:[#allocation4 + $0x40] sm:$0xff]  ;;  %v2334_v27 = vsel %vm462_vm0, %v2315_v25, 0.0  ;;  %2547 = vst.msk [vmem:[#allocation4 + $0x51] sm:$0xff] %vm462_vm0, %v2315_v25  ;;  %v2246_v55 = vadd.f32 %v2245_v24, %v1889_v0  ;;  %v5901_v26 = vpack.c.bf16 %v3394_v57, %v3394_v57 }
 0x3cf   : > { %v2335_v30 = vadd.f32 %v2334_v27, %v2333_v16  ;;  %v4425_v32 = vld [vmem:[#allocation5 + $0x8] sm:$0xf0]  ;;  %v5903_v13 = vpack.c.bf16 %v3170_v23, %v3170_v23  ;;  %v3415_v16 = vpack.c.bf16 %v3399_v20, %v3399_v20 }
 0x3d0   : > { %v2281_v8 = vmul.f32 %v5837_v7, %v2246_v55  ;;  %3328 = vrot.lane.b32.xlu1 %v2625_v18, %s6863_s15  ;;  %v4428_v6 = vor.u32 %v4586_v31, %v4425_v32  ;;  %3426 = vst.msk [vmem:[#allocation5 + $0x14] sm:$0xf] %vm735_vm4, %v5901_v26  ;;  %v2946_v18 = vld [vmem:[#allocation4 + $0x41] sm:$0xff]  ;;  %v1893_v31 = vmul.f32 %v5949_v1, %v5635_v34 }
 0x3d1   : > { %3218 = vrot.lane.b32.xlu0 %v5885_v15, %s6862_s0  ;;  %3216 = vrot.lane.b32.xlu2 %v2848_v19, %s6862_s0  ;;  %2595 = vst.msk [vmem:[#allocation5 + $0x20] sm:$0xf] %vm735_vm4, %v5903_v13  ;;  %v2962_v24 = vpack.c.bf16 %v2946_v18, %v2946_v18  ;;  %v2656_v18 = vpop.permute.xlu1 %2655 }
 0x3d2   : > { %v2300_v40 = vadd.f32 %v5841_v63, %v2281_v8  ;;  %4521 = vmatmul.msk.bf16.vlgmr.msra.gmra.mxu1 %vm462_vm0, %v4428_v6  ;;  %3431 = vst.msk [vmem:[#allocation5 + $0x3c] sm:$0xf] %vm735_vm4, %v3415_v16 }
 0x3d4   : > { %v2316_v58 = vmax.f32 %v2300_v40, 0.0 }
 0x3d5   : > { %v3395_v35 = vld [vmem:[#allocation4 + $0x52] sm:$0xff]  ;;  %v2248_v36 = vpop.f32.mrf.mxu2 }
 0x3d6   : > { %v2835_v37 = vld [vmem:[#allocation4 + $0x50] sm:$0xff]  ;;  %v2336_v38 = vsel %vm462_vm0, %v2316_v58, 0.0  ;;  %2548 = vst.msk [vmem:[#allocation4 + $0x61] sm:$0xff] %vm462_vm0, %v2316_v58  ;;  %v2249_v22 = vadd.f32 %v2248_v36, %v1890_v33  ;;  %v5920_v52 = vpack.c.bf16 %v3395_v35, %v3395_v35 }
 0x3d7   : > { %v2337_v62 = vadd.f32 %v2336_v38, %v2335_v30  ;;  %v5922_v41 = vpack.c.bf16 %v2835_v37, %v2835_v37  ;;  %v4588_v61 = vld [vmem:[#allocation5 + $0x14] sm:$0xf]  ;;  %v1894_v37 = vmul.f32 %v5949_v1, %v5641_v39 }
 0x3d8   : > { %v2282_v43 = vmul.f32 %v5837_v7, %v2249_v22  ;;  %2661 = vrot.lane.b32.xlu1 %v2626_v59, %s6857_s16  ;;  %3427 = vst.msk [vmem:[#allocation5 + $0x1c] sm:$0xf] %vm735_vm4, %v5920_v52  ;;  %v2612_v35 = vld [vmem:[#allocation4 + $0x51] sm:$0xff] }
 0x3d9   : > { %2773 = vrot.lane.b32.xlu0 %v5881_v5, %s6858_s30  ;;  %2771 = vrot.lane.b32.xlu2 %v5864_v45, %s6858_s30  ;;  %2596 = vst.msk [vmem:[#allocation5 + $0x28] sm:$0xf] %vm735_vm4, %v5922_v41 }
 0x3da   : > { %v2301_v21 = vadd.f32 %v5841_v63, %v2282_v43 }
 0x3dc   : > { %v2317_v48 = vmax.f32 %v2301_v21, 0.0 }
 0x3dd   : > { %v3396_v46 = vld [vmem:[#allocation4 + $0x62] sm:$0xff]  ;;  %v2250_v19 = vpop.f32.mrf.mxu2 }
 0x3de   : > { %v3172_v53 = vld [vmem:[#allocation4 + $0x60] sm:$0xff]  ;;  %v5937_v54 = vpack.c.bf16 %v3396_v46, %v3396_v46  ;;  %v2338_v11 = vsel %vm462_vm0, %v2317_v48, 0.0  ;;  %2549 = vst.msk [vmem:[#allocation4 + $0x71] sm:$0xff] %vm462_vm0, %v2317_v48  ;;  %v2251_v49 = vadd.f32 %v2250_v19, %v1891_v12  ;;  %v1895_v48 = vmul.f32 %v5949_v1, %v5647_v44  ;;  %v4449_v12 = vld [vmem:[#allocation5 + $0x38] sm:$0xf0] }
 0x3df   : > { %v2339_v45 = vadd.f32 %v2338_v11, %v2337_v62  ;;  %v4433_v56 = vld [vmem:[#allocation5 + $0x18] sm:$0xf0]  ;;  %v5941_v60 = vpack.c.bf16 %v3172_v53, %v3172_v53  ;;  %v6006_v62 = vpack.c.bf16 %v2612_v35, %v2612_v35  ;;  %v2948_v20 = vld [vmem:[#allocation4 + $0x61] sm:$0xff] }
 0x3e0   : > { %3428 = vst.msk [vmem:[#allocation5 + $0x24] sm:$0xf] %vm735_vm4, %v5937_v54  ;;  %v2283_v17 = vmul.f32 %v5837_v7, %v2251_v49  ;;  %2883 = vrot.lane.b32.xlu1 %v5885_v15, %s6859_s23  ;;  %v4436_v47 = vor.u32 %v4588_v61, %v4433_v56 }
 0x3e1   : > { %2995 = vrot.lane.b32.xlu0 %v2626_v59, %s6860_s24  ;;  %3330 = vrot.lane.b32.xlu2 %v2626_v59, %s6863_s15  ;;  %2597 = vst.msk [vmem:[#allocation5 + $0x30] sm:$0xf] %vm735_vm4, %v5941_v60 }
 0x3e2   : > { %v2302_v3 = vadd.f32 %v5841_v63, %v2283_v17  ;;  %4522 = vmatmul.msk.bf16.gmra.mxu1 %vm462_vm0, %v4436_v47  ;;  %v2559_v17 = vld [vmem:[#allocation4] sm:$0xff] }
 0x3e4   : > { %v2318_v10 = vmax.f32 %v2302_v3, 0.0  ;;  %v2575_v3 = vpack.c.bf16 %v2559_v17, %v2559_v17 }
 0x3e5   : > { %v3397_v15 = vld [vmem:[#allocation4 + $0x72] sm:$0xff]  ;;  %v2253_v2 = vpop.f32.mrf.mxu2 }
 0x3e6   : > { %v3173_v9 = vld [vmem:[#allocation4 + $0x70] sm:$0xff]  ;;  %v5958_v25 = vpack.c.bf16 %v3397_v15, %v3397_v15  ;;  %v2340_v0 = vsel %vm462_vm0, %v2318_v10, 0.0  ;;  %2550 = vst.msk [vmem:[#allocation4 + $0x81] sm:$0xff] %vm462_vm0, %v2318_v10  ;;  %v2254_v57 = vadd.f32 %v2253_v2, %v1892_v14 }
 0x3e7   : > { %v5962_v23 = vadd.f32 %v2340_v0, %v2339_v45  ;;  %v5965_v27 = vpack.c.bf16 %v3173_v9, %v3173_v9  ;;  %v4590_v40 = vld [vmem:[#allocation5 + $0x24] sm:$0xf]  ;;  %v6029_v45 = vpop.permute.xlu2 %3342  ;;  %2591 = vst.msk [vmem:[#allocation5] sm:$0xf] %vm735_vm4, %v2575_v3  ;;  %v2964_v9 = vpack.c.bf16 %v2948_v20, %v2948_v20  ;;  %v2768_v0 = vpop.permute.xlu0 %2767 }
 0x3e8   : > { %3429 = vst.msk [vmem:[#allocation5 + $0x2c] sm:$0xf] %vm735_vm4, %v5958_v25  ;;  %v2284_v29 = vmul.f32 %v5837_v7, %v2254_v57  ;;  %2997 = vrot.lane.b32.xlu1 %v2962_v24, %s6860_s24 }
 0x3e9   : > { %3109 = vrot.lane.b32.xlu0 %v5901_v26, %s6861_s20  ;;  %3107 = vrot.lane.b32.xlu2 %v5881_v5, %s6861_s20  ;;  %2598 = vst.msk [vmem:[#allocation5 + $0x38] sm:$0xf] %vm735_vm4, %v5965_v27 }
 0x3ea   : > { %v5978_v55 = vadd.f32 %v5841_v63, %v2284_v29  ;;  %2703 = vst.msk [vmem:[#allocation5] sm:$0xf] %vm848_vm5, %v2656_v18 }
 0x3eb   : > { %2815 = vst.msk [vmem:[#allocation5] sm:$0xf] %vm961_vm6, %v2768_v0 }
 0x3ec   : > { %v2319_v30 = vmax.f32 %v5978_v55, 0.0 }
 0x3ed   : > { %v3398_v32 = vld [vmem:[#allocation4 + $0x82] sm:$0xff]  ;;  %v2255_v8 = vpop.f32.mrf.mxu2 }
 0x3ee   : > { %v5983_v6 = vpack.c.bf16 %v3398_v32, %v3398_v32  ;;  %2551 = vst.msk [vmem:[#allocation4 + $0xb1] sm:$0xff] %vm462_vm0, %v2319_v30  ;;  %v2256_v5 = vadd.f32 %v2255_v8, %v1893_v31 }
 0x3ef   : > { %v4441_v50 = vld [vmem:[#allocation5 + $0x28] sm:$0xf0]  ;;  %v6069_v29 = vpop.permute.xlu2 %2783 }
 0x3f0   : > { %3430 = vst.msk [vmem:[#allocation5 + $0x34] sm:$0xf] %vm735_vm4, %v5983_v6  ;;  %v2285_v58 = vmul.f32 %v5837_v7, %v2256_v5  ;;  %3220 = vrot.lane.b32.xlu1 %v5903_v13, %s6862_s0  ;;  %v4444_v34 = vor.u32 %v4590_v40, %v4441_v50  ;;  %v1897_v5 = vmul.f32 %v5949_v1, %v5664_v4 }
 0x3f1   : > { %3332 = vrot.lane.b32.xlu0 %v2962_v24, %s6863_s15  ;;  %2885 = vrot.lane.b32.xlu2 %v5903_v13, %s6859_s23 }
 0x3f2   : > { %v5997_v33 = vadd.f32 %v5841_v63, %v2285_v58  ;;  %4523 = vmatmul.msk.bf16.gmra.mxu1 %vm462_vm0, %v4444_v34 }
 0x3f4   : > { %v2320_v36 = vmax.f32 %v5997_v33, 0.0 }
 0x3f5   : > { %v2258_v38 = vpop.f32.mrf.mxu2  ;;  %v2839_v22 = vld [vmem:[#allocation4 + $0xb0] sm:$0xff] }
 0x3f6   : > { %2552 = vst.msk [vmem:[#allocation4 + $0xc1] sm:$0xff] %vm462_vm0, %v2320_v36  ;;  %v2259_v59 = vadd.f32 %v2258_v38, %v1894_v37  ;;  %v6008_v13 = vpack.c.bf16 %v2839_v22, %v2839_v22 }
 0x3f7   : > { %v4592_v53 = vld [vmem:[#allocation5 + $0x34] sm:$0xf] }
 0x3f8   : > { %v2286_v43 = vmul.f32 %v5837_v7, %v2259_v59  ;;  %2775 = vrot.lane.b32.xlu1 %v5901_v26, %s6858_s30  ;;  %2600 = vst.msk [vmem:[#allocation5 + $0x48] sm:$0xf] %vm735_vm4, %v6008_v13  ;;  %v4452_v56 = vor.u32 %v4592_v53, %v4449_v12  ;;  %v3285_v53 = vld [vmem:[#allocation4 + $0x71] sm:$0xff] }
 0x3f9   : > { %2665 = vrot.lane.b32.xlu0 %v6006_v62, %s6857_s16  ;;  %2663 = vrot.lane.b32.xlu2 %v2962_v24, %s6857_s16 }
 0x3fa   : > { %v6019_v39 = vadd.f32 %v5841_v63, %v2286_v43 }
 0x3fc   : > { %v2321_v21 = vmax.f32 %v6019_v39, 0.0  ;;  %v2950_v39 = vld [vmem:[#allocation4 + $0x81] sm:$0xff] }
 0x3fd   : > { %v3400_v46 = vld [vmem:[#allocation4 + $0xc2] sm:$0xff]  ;;  %v2260_v19 = vpop.f32.mrf.mxu2 }
 0x3fe   : > { %v2840_v11 = vld [vmem:[#allocation4 + $0xc0] sm:$0xff]  ;;  %v6024_v49 = vpack.c.bf16 %v3400_v46, %v3400_v46  ;;  %2553 = vst.msk [vmem:[#allocation4 + $0xd1] sm:$0xff] %vm462_vm0, %v2321_v21  ;;  %v2261_v26 = vadd.f32 %v2260_v19, %v1895_v48  ;;  %v6103_v48 = vpop.permute.xlu0 %3230  ;;  %v2351_v33 = vsel %vm462_vm0, %v2321_v21, 0.0  ;;  %v2342_v21 = vrot.slane %v5962_v23, 4 }
 0x3ff   : > { %v6031_v61 = vpack.c.bf16 %v2840_v11, %v2840_v11 }
 0x400   : > { %3432 = vst.msk [vmem:[#allocation5 + $0x44] sm:$0xf] %vm735_vm4, %v6024_v49  ;;  %v2287_v44 = vmul.f32 %v5837_v7, %v2261_v26  ;;  %3334 = vrot.lane.b32.xlu1 %v6006_v62, %s6863_s15  ;;  %v3301_v26 = vpack.c.bf16 %v3285_v53, %v3285_v53 }
 0x401   : > { %2887 = vrot.lane.b32.xlu0 %v5922_v41, %s6859_s23  ;;  %3222 = vrot.lane.b32.xlu2 %v5922_v41, %s6862_s0  ;;  %2601 = vst.msk [vmem:[#allocation5 + $0x50] sm:$0xf] %vm735_vm4, %v6031_v61  ;;  %v1896_v41 = vmul.f32 %v5949_v1, %v5653_v51 }
 0x402   : > { %v6045_v47 = vadd.f32 %v5841_v63, %v2287_v44  ;;  %4524 = vmatmul.msk.bf16.gmra.mxu1 %vm462_vm0, %v4452_v56 }
 0x404   : > { %v2322_v10 = vmax.f32 %v6045_v47, 0.0 }
 0x405   : > { %v3401_v14 = vld [vmem:[#allocation4 + $0xd2] sm:$0xff] }
 0x406   : > { %v2841_v16 = vld [vmem:[#allocation4 + $0xd0] sm:$0xff]  ;;  %v6053_v15 = vpack.c.bf16 %v3401_v14, %v3401_v14  ;;  %2554 = vst.msk [vmem:[#allocation4 + $0xe1] sm:$0xff] %vm462_vm0, %v2322_v10  ;;  %v2263_v2 = vpop.f32.mrf.mxu2 }
 0x407   : > { %v6058_v57 = vpack.c.bf16 %v2841_v16, %v2841_v16  ;;  %v2264_v24 = vadd.f32 %v2263_v2, %v1896_v41  ;;  %v4594_v35 = vld [vmem:[#allocation5 + $0x44] sm:$0xf]  ;;  %v3407_v41 = vld [vmem:[#allocation4 + $0x132] sm:$0xff] }
 0x408   : > { %3433 = vst.msk [vmem:[#allocation5 + $0x4c] sm:$0xf] %vm735_vm4, %v6053_v15  ;;  %3111 = vrot.lane.b32.xlu1 %v5920_v52, %s6861_s20  ;;  %v2567_v16 = vld [vmem:[#allocation4 + $0xa0] sm:$0xff]  ;;  %v3423_v2 = vpack.c.bf16 %v3407_v41, %v3407_v41 }
 0x409   : > { %3001 = vrot.lane.b32.xlu0 %v2964_v9, %s6860_s24  ;;  %v2288_v51 = vmul.f32 %v5837_v7, %v2264_v24  ;;  %2777 = vrot.lane.b32.xlu2 %v5920_v52, %s6858_s30  ;;  %2602 = vst.msk [vmem:[#allocation5 + $0x58] sm:$0xf] %vm735_vm4, %v6058_v57  ;;  %v2583_v0 = vpack.c.bf16 %v2567_v16, %v2567_v16 }
 0x40a   : > { %3439 = vst.msk [vmem:[#allocation5 + $0x7c] sm:$0xf] %vm735_vm4, %v3423_v2 }
 0x40b   : > { %v6074_v31 = vadd.f32 %v5841_v63, %v2288_v51  ;;  %v2372_v51 = vld [vmem:[%s6823_s8 + $0x8] sm:$0xff]  ;;  %2599 = vst.msk [vmem:[#allocation5 + $0x40] sm:$0xf] %vm735_vm4, %v2583_v0 }
 0x40c   : > { %2392 = vmatpush.msra.mxu0 %v2372_v51 }
 0x40d   : > { %v3402_v32 = vld [vmem:[#allocation4 + $0xe2] sm:$0xff]  ;;  %v2323_v8 = vmax.f32 %v6074_v31, 0.0  ;;  %v2343_v31 = vadd.f32 %v2342_v21, %v5962_v23 }
 0x40e   : > { %v3178_v40 = vld [vmem:[#allocation4 + $0xe0] sm:$0xff]  ;;  %v6079_v50 = vpack.c.bf16 %v3402_v32, %v3402_v32  ;;  %v2265_v58 = vpop.f32.mrf.mxu2 }
 0x40f   : > { %v6081_v34 = vpack.c.bf16 %v3178_v40, %v3178_v40  ;;  %2555 = vst.msk [vmem:[#allocation4 + $0xf1] sm:$0xff] %vm462_vm0, %v2323_v8  ;;  %v2266_v52 = vadd.f32 %v2265_v58, %v1897_v5  ;;  %v4457_v37 = vld [vmem:[#allocation5 + $0x48] sm:$0xf0]  ;;  %v2371_v32 = vld [vmem:[%s6823_s8] sm:$0xff]  ;;  %v1898_v40 = vmul.f32 %v5949_v1, %v5698_v28  ;;  %v2348_v28 = vsel %vm462_vm0, %v2319_v30, 0.0 }
 0x410   : > { %3434 = vst.msk [vmem:[#allocation5 + $0x54] sm:$0xf] %vm735_vm4, %v6079_v50  ;;  %2889 = vrot.lane.b32.xlu1 %v5941_v60, %s6859_s23  ;;  %v4460_v4 = vor.u32 %v4594_v35, %v4457_v37  ;;  %2393 = vmatpush.msra.mxu0 %v2371_v32  ;;  %v2349_v37 = vsel %vm462_vm0, %v2320_v36, 0.0  ;;  %v1899_v30 = vmul.f32 %v5949_v1, %v5715_v42 }
 0x411   : > { %3224 = vrot.lane.b32.xlu0 %v5941_v60, %s6862_s0  ;;  %v2289_v38 = vmul.f32 %v5837_v7, %v2266_v52  ;;  %2999 = vrot.lane.b32.xlu2 %v6006_v62, %s6860_s24  ;;  %2603 = vst.msk [vmem:[#allocation5 + $0x60] sm:$0xf] %vm735_vm4, %v6081_v34  ;;  %v2966_v42 = vpack.c.bf16 %v2950_v39, %v2950_v39 }
 0x412   : > { %4525 = vmatmul.msk.bf16.gmra.mxu1 %vm462_vm0, %v4460_v4 }
 0x413   : > { %v6099_v22 = vadd.f32 %v5841_v63, %v2289_v38  ;;  %v2658_v59 = vpop.permute.xlu2 %2657 }
 0x414   : > { %2704 = vst.msk [vmem:[#allocation5 + $0x8] sm:$0xf] %vm848_vm5, %v2658_v59  ;;  %v2350_v59 = vadd.f32 %v2349_v37, %v2348_v28 }
 0x415   : > { %v2324_v43 = vmax.f32 %v6099_v22, 0.0 }
 0x416   : > { %v3403_v60 = vld [vmem:[#allocation4 + $0xf2] sm:$0xff] }
 0x417   : > { %v3179_v12 = vld [vmem:[#allocation4 + $0xf0] sm:$0xff]  ;;  %v6105_v46 = vpack.c.bf16 %v3403_v60, %v3403_v60  ;;  %2556 = vst.msk [vmem:[#allocation4 + $0x101] sm:$0xff] %vm462_vm0, %v2324_v43  ;;  %v2357_v1 = vsel %vm462_vm0, %v2324_v43, 0.0 }
 0x418   : > { %v6110_v62 = vpack.c.bf16 %v3179_v12, %v3179_v12  ;;  %2667 = vrot.lane.b32.xlu1 %v2964_v9, %s6857_s16  ;;  %v4596_v3 = vld [vmem:[#allocation5 + $0x54] sm:$0xf] }
 0x419   : > { %2779 = vrot.lane.b32.xlu0 %v5937_v54, %s6858_s30  ;;  %3435 = vst.msk [vmem:[#allocation5 + $0x5c] sm:$0xf] %vm735_vm4, %v6105_v46  ;;  %3113 = vrot.lane.b32.xlu2 %v5937_v54, %s6861_s20  ;;  %v2672_v54 = vpop.permute.xlu0 %2671  ;;  %v2728_v12 = vld [vmem:[#allocation4 + $0xb2] sm:$0xff] }
 0x41a   : > { %2604 = vst.msk [vmem:[#allocation5 + $0x68] sm:$0xf] %vm735_vm4, %v6110_v62 }
 0x41b   : > { %v2880_v19 = vpop.permute.xlu2 %2879  ;;  %2711 = vst.msk [vmem:[#allocation5 + $0x40] sm:$0xf] %vm848_vm5, %v2672_v54 }
 0x41c   : > { %2927 = vst.msk [vmem:[#allocation5] sm:$0xf] %vm1074_vm7, %v2880_v19  ;;  %v2352_v19 = vadd.f32 %v2351_v33, %v2350_v59 }
 0x41d   : > { %2823 = vst.msk [vmem:[#allocation5 + $0x40] sm:$0xf] %vm961_vm6, %v6069_v29 }
 0x41e   : > { %v3404_v11 = vld [vmem:[#allocation4 + $0x102] sm:$0xff] }
 0x41f   : > { %v2844_v44 = vld [vmem:[#allocation4 + $0x100] sm:$0xff]  ;;  %v6122_v56 = vpack.c.bf16 %v3404_v11, %v3404_v11  ;;  %v2355_v11 = vsel %vm462_vm0, %v2323_v8, 0.0 }
 0x420   : > { %v6124_v17 = vpack.c.bf16 %v2844_v44, %v2844_v44  ;;  %3226 = vrot.lane.b32.xlu1 %v5965_v27, %s6862_s0  ;;  %v4465_v18 = vld [vmem:[#allocation5 + $0x58] sm:$0xf0] }
 0x421   : > { %3338 = vrot.lane.b32.xlu0 %v3301_v26, %s6863_s15  ;;  %3436 = vst.msk [vmem:[#allocation5 + $0x64] sm:$0xf] %vm735_vm4, %v6122_v56  ;;  %3336 = vrot.lane.b32.xlu2 %v2964_v9, %s6863_s15  ;;  %v4468_v20 = vor.u32 %v4596_v3, %v4465_v18 }
 0x422   : > { %2605 = vst.msk [vmem:[#allocation5 + $0x70] sm:$0xf] %vm735_vm4, %v6124_v17 }
 0x423   : > { %4526 = vmatmul.msk.bf16.gmra.mxu1 %vm462_vm0, %v4468_v20  ;;  %v2994_v14 = vpop.permute.xlu2 %2993  ;;  %v2951_v20 = vld [vmem:[#allocation4 + $0xb1] sm:$0xff] }
 0x424   : > { %v2967_v0 = vpack.c.bf16 %v2951_v20, %v2951_v20 }
 0x428   : > { %2781 = vrot.lane.b32.xlu1 %v5958_v25, %s6858_s30 }
 0x429   : > { %3115 = vrot.lane.b32.xlu0 %v5958_v25, %s6861_s20  ;;  %2669 = vrot.lane.b32.xlu2 %v3301_v26, %s6857_s16  ;;  %v2838_v25 = vld [vmem:[#allocation4 + $0x80] sm:$0xff] }
 0x42a   : > { %v3104_v9 = vpop.permute.xlu0 %3103  ;;  %v2770_v24 = vpop.permute.xlu1 %2769  ;;  %v6154_v35 = vpack.c.bf16 %v2838_v25, %v2838_v25 }
 0x42b   : > { %v3217_v5 = vpop.permute.xlu2 %3216  ;;  %2816 = vst.msk [vmem:[#allocation5 + $0x8] sm:$0xf] %vm961_vm6, %v2770_v24 }
 0x42d   : > { %v2268_v58 = vpop.f32.mrf.mxu2 }
 0x42e   : > { %v2269_v52 = vadd.f32 %v2268_v58, %v1898_v40 }
 0x430   : > { %v2290_v4 = vmul.f32 %v5837_v7, %v2269_v52  ;;  %3003 = vrot.lane.b32.xlu1 %v3301_v26, %s6860_s24 }
 0x431   : > { %2893 = vrot.lane.b32.xlu0 %v6154_v35, %s6859_s23  ;;  %2891 = vrot.lane.b32.xlu2 %v5965_v27, %s6859_s23  ;;  %v2353_v27 = vsel %vm462_vm0, %v2322_v10, 0.0  ;;  %v2744_v10 = vpack.c.bf16 %v2728_v12, %v2728_v12 }
 0x432   : > { %v2309_v36 = vadd.f32 %v5841_v63, %v2290_v4  ;;  %v2992_v38 = vpop.permute.xlu1 %2991  ;;  %v2354_v26 = vadd.f32 %v2353_v27, %v2352_v19 }
 0x433   : > { %v2882_v29 = vpop.permute.xlu0 %2881  ;;  %v2772_v60 = vpop.permute.xlu2 %2771  ;;  %3039 = vst.msk [vmem:[#allocation5] sm:$0xf] %vm1187_vm10, %v2992_v38 }
 0x434   : > { %2928 = vst.msk [vmem:[#allocation5 + $0x8] sm:$0xf] %vm1074_vm7, %v2882_v29  ;;  %v2325_v55 = vmax.f32 %v2309_v36, 0.0  ;;  %v2356_v8 = vadd.f32 %v2355_v11, %v2354_v26  ;;  %v2618_v26 = vld [vmem:[#allocation4 + $0xd1] sm:$0xff] }
 0x435   : > { %3040 = vst.msk [vmem:[#allocation5 + $0x8] sm:$0xf] %vm1187_vm10, %v2994_v14  ;;  %v2270_v53 = vpop.f32.mrf.mxu2 }
 0x436   : > { %2557 = vst.msk [vmem:[#allocation4 + $0x111] sm:$0xff] %vm462_vm0, %v2325_v55  ;;  %v2271_v47 = vadd.f32 %v2270_v53, %v1899_v30  ;;  %v2359_v54 = vsel %vm462_vm0, %v2325_v55, 0.0  ;;  %v2358_v18 = vadd.f32 %v2357_v1, %v2356_v8  ;;  %v3288_v30 = vld [vmem:[#allocation4 + $0xc1] sm:$0xff]  ;;  %v4481_v1 = vld [vmem:[#allocation5 + $0x78] sm:$0xf0] }
 0x437   : > { %3151 = vst.msk [vmem:[#allocation5] sm:$0xf] %vm1300_vm11, %v3104_v9  ;;  %v3304_v19 = vpack.c.bf16 %v3288_v30, %v3288_v30 }
 0x438   : > { %v2291_v44 = vmul.f32 %v5837_v7, %v2271_v47  ;;  %3264 = vst.msk [vmem:[#allocation5] sm:$0xf] %vm1414_vm12, %v3217_v5  ;;  %3117 = vrot.lane.b32.xlu1 %v5983_v6, %s6861_s20  ;;  %v2344_v6 = vrot.slane %v2343_v31, 2  ;;  %v2360_v41 = vadd.f32 %v2359_v54, %v2358_v18  ;;  %v2954_v18 = vld [vmem:[#allocation4 + $0xe1] sm:$0xff] }
 0x439   : > { %2785 = vrot.lane.b32.xlu0 %v2744_v10, %s6858_s30  ;;  %3005 = vrot.lane.b32.xlu2 %v2966_v42, %s6860_s24 }
 0x43a   : > { %v2310_v22 = vadd.f32 %v5841_v63, %v2291_v44  ;;  %v3106_v43 = vpop.permute.xlu1 %3105  ;;  %v2345_v51 = vadd.f32 %v2344_v6, %v2343_v31  ;;  %v2634_v44 = vpack.c.bf16 %v2618_v26, %v2618_v26  ;;  %v3183_v26 = vld [vmem:[#allocation4 + $0x130] sm:$0xff] }
 0x43b   : > { %v2660_v3 = vpop.permute.xlu0 %2659  ;;  %v3331_v7 = vpop.permute.xlu2 %3330  ;;  %3152 = vst.msk [vmem:[#allocation5 + $0x8] sm:$0xf] %vm1300_vm11, %v3106_v43 }
 0x43c   : > { %2705 = vst.msk [vmem:[#allocation5 + $0x10] sm:$0xf] %vm848_vm5, %v2660_v3  ;;  %v2326_v14 = vmax.f32 %v2310_v22, 0.0  ;;  %v2346_v4 = vrot.slane %v2345_v51, 1 }
 0x43d   : > { %2817 = vst.msk [vmem:[#allocation5 + $0x10] sm:$0xf] %vm961_vm6, %v2772_v60  ;;  %v3405_v23 = vld [vmem:[#allocation4 + $0x112] sm:$0xff] }
 0x43e   : > { %v3181_v16 = vld [vmem:[#allocation4 + $0x110] sm:$0xff]  ;;  %v6201_v2 = vpack.c.bf16 %v3405_v23, %v3405_v23  ;;  %v2361_v63 = vsel %vm462_vm0, %v2326_v14, 0.0  ;;  %2558 = vst.msk [vmem:[#allocation4 + $0x121] sm:$0xff] %vm462_vm0, %v2326_v14  ;;  %v2347_v38 = vadd.f32 %v2346_v4, %v2345_v51 }
 0x43f   : > { %v6205_v9 = vpack.c.bf16 %v3181_v16, %v3181_v16  ;;  %v2362_v24 = vadd.f32 %v2361_v63, %v2360_v41  ;;  %v3291_v63 = vld [vmem:[#allocation4 + $0xf1] sm:$0xff] }
 0x440   : > { %3437 = vst.msk [vmem:[#allocation5 + $0x6c] sm:$0xf] %vm735_vm4, %v6201_v2  ;;  %3340 = vrot.lane.b32.xlu1 %v2966_v42, %s6863_s15  ;;  %v2369_v39 = vmul.f32 0.015625, %v2347_v38  ;;  %v2957_v38 = vld [vmem:[#allocation4 + $0x111] sm:$0xff] }
 0x441   : > { %3007 = vrot.lane.b32.xlu0 %v2967_v0, %s6860_s24  ;;  %v2363_v32 = vrot.slane %v2362_v24, 4  ;;  %3228 = vrot.lane.b32.xlu2 %v6154_v35, %s6862_s0  ;;  %2606 = vst.msk [vmem:[#allocation5 + $0x78] sm:$0xf] %vm735_vm4, %v6205_v9  ;;  %v4598_v35 = vld [vmem:[#allocation5 + $0x64] sm:$0xf] }
 0x442   : > { %v3329_v25 = vpop.permute.xlu1 %3328 }
 0x443   : > { %v3219_v5 = vpop.permute.xlu0 %3218  ;;  %v2364_v40 = vadd.f32 %v2363_v32, %v2362_v24  ;;  %v3108_v58 = vpop.permute.xlu2 %3107  ;;  %3376 = vst.msk [vmem:[#allocation5] sm:$0xf] %vm1527_vm13, %v3329_v25 }
 0x444   : > { %3265 = vst.msk [vmem:[#allocation5 + $0x8] sm:$0xf] %vm1414_vm12, %v3219_v5 }
 0x445   : > { %3377 = vst.msk [vmem:[#allocation5 + $0x8] sm:$0xf] %vm1527_vm13, %v3331_v7  ;;  %v2365_v52 = vrot.slane %v2364_v40, 2  ;;  %v3406_v37 = vld [vmem:[#allocation4 + $0x122] sm:$0xff]  ;;  %v2970_v7 = vpack.c.bf16 %v2954_v18, %v2954_v18 }
 0x446   : > { %v6218_v28 = vpack.c.bf16 %v3406_v37, %v3406_v37  ;;  %v3294_v30 = vld [vmem:[#allocation4 + $0x121] sm:$0xff] }
 0x447   : > { %v2366_v33 = vadd.f32 %v2365_v52, %v2364_v40  ;;  %v4473_v36 = vld [vmem:[#allocation5 + $0x68] sm:$0xf0] }
 0x448   : > { %3438 = vst.msk [vmem:[#allocation5 + $0x74] sm:$0xf] %vm735_vm4, %v6218_v28  ;;  %v4476_v29 = vor.u32 %v4598_v35, %v4473_v36  ;;  %2673 = vrot.lane.b32.xlu1 %v2967_v0, %s6857_s16  ;;  %v3307_v0 = vpack.c.bf16 %v3291_v63, %v3291_v63 }
 0x449   : > { %3121 = vrot.lane.b32.xlu0 %v6024_v49, %s6861_s20  ;;  %v2367_v59 = vrot.slane %v2366_v33, 1  ;;  %3119 = vrot.lane.b32.xlu2 %v2744_v10, %s6861_s20 }
 0x44a   : > { %4527 = vmatmul.msk.bf16.gmra.mxu1 %vm462_vm0, %v4476_v29  ;;  %v2662_v12 = vpop.permute.xlu1 %2661 }
 0x44b   : > { %v2774_v60 = vpop.permute.xlu0 %2773  ;;  %v2368_v27 = vadd.f32 %v2367_v59, %v2366_v33  ;;  %2706 = vst.msk [vmem:[#allocation5 + $0x18] sm:$0xf] %vm848_vm5, %v2662_v12  ;;  %v2886_v55 = vpop.permute.xlu2 %2885  ;;  %v2398_v59 = vld [vmem:[%s6824_s9] sm:$0xf] }
 0x44c   : > { %2818 = vst.msk [vmem:[#allocation5 + $0x18] sm:$0xf] %vm961_vm6, %v2774_v60  ;;  %v2973_v60 = vpack.c.bf16 %v2957_v38, %v2957_v38  ;;  %4417 = vmatpush.msk.msrb.mxu0 %vm540_vm8, %v2398_v59  ;;  %v4604_v38 = vld [vmem:[%s6822_s7 + $0x10] sm:$0xff]  ;;  %v4603_v59 = vld [vmem:[%s6822_s7 + $0x8] sm:$0xff] }
 0x44d   : > { %v2370_v21 = vmul.f32 0.015625, %v2368_v27  ;;  %2930 = vst.msk [vmem:[#allocation5 + $0x18] sm:$0xf] %vm1074_vm7, %v2886_v55 }
 0x44f   : > { %v2375_v53 = vsel %vm511_vm3, %v2370_v21, %v2369_v39  ;;  %v4600_v42 = vld [vmem:[#allocation5 + $0x74] sm:$0xf]  ;;  %v2846_v39 = vld [vmem:[#allocation4 + $0x120] sm:$0xff]  ;;  %v3310_v21 = vpack.c.bf16 %v3294_v30, %v3294_v30 }
 0x450   : > { %4416 = vmatmul.msk.f32.vlgmr.msra.gmra.mxu0 %vm462_vm0, %v2375_v53  ;;  %2895 = vrot.lane.b32.xlu1 %v6008_v13, %s6859_s23  ;;  %v4484_v31 = vor.u32 %v4600_v42, %v4481_v1  ;;  %v3199_v42 = vpack.c.bf16 %v3183_v26, %v3183_v26  ;;  %v4671_v26 = vld [vmem:[%s6827_s12] ss:$0 sm:$0xff] }
 0x451   : > { %3344 = vrot.lane.b32.xlu0 %v3304_v19, %s6863_s15  ;;  %2897 = vrot.lane.b32.xlu2 %v6031_v61, %s6859_s23 }
 0x452   : > { %v2884_v47 = vpop.permute.xlu1 %2883 }
 0x453   : > { %v2996_v11 = vpop.permute.xlu0 %2995  ;;  %2929 = vst.msk [vmem:[#allocation5 + $0x10] sm:$0xf] %vm1074_vm7, %v2884_v47  ;;  %v2664_v10 = vpop.permute.xlu2 %2663 }
 0x454   : > { %3041 = vst.msk [vmem:[#allocation5 + $0x10] sm:$0xf] %vm1187_vm10, %v2996_v11 }
 0x455   : > { %3153 = vst.msk [vmem:[#allocation5 + $0x10] sm:$0xf] %vm1300_vm11, %v3108_v58  ;;  %v2621_v58 = vld [vmem:[#allocation4 + $0x101] sm:$0xff] }
 0x456   : > { %2707 = vst.msk [vmem:[#allocation5 + $0x20] sm:$0xf] %vm848_vm5, %v2664_v10  ;;  %v2637_v52 = vpack.c.bf16 %v2621_v58, %v2621_v58 }
 0x458   : > { %3009 = vrot.lane.b32.xlu1 %v3304_v19, %s6860_s24 }
 0x459   : > { %2677 = vrot.lane.b32.xlu0 %v2634_v44, %s6857_s16  ;;  %2675 = vrot.lane.b32.xlu2 %v3304_v19, %s6857_s16  ;;  %v2862_v19 = vpack.c.bf16 %v2846_v39, %v2846_v39 }
 0x45a   : > { %4528 = vmatmul.msk.bf16.gmra.mxu1 %vm462_vm0, %v4484_v31  ;;  %v2998_v8 = vpop.permute.xlu1 %2997 }
 0x45b   : > { %v3110_v13 = vpop.permute.xlu0 %3109  ;;  %3042 = vst.msk [vmem:[#allocation5 + $0x18] sm:$0xf] %vm1187_vm10, %v2998_v8  ;;  %v3223_v54 = vpop.permute.xlu2 %3222 }
 0x45c   : > { %3154 = vst.msk [vmem:[#allocation5 + $0x18] sm:$0xf] %vm1300_vm11, %v3110_v13 }
 0x45d   : > { %3267 = vst.msk [vmem:[#allocation5 + $0x18] sm:$0xf] %vm1414_vm12, %v3223_v54 }
 0x460   : > { %3232 = vrot.lane.b32.xlu1 %v6031_v61, %s6862_s0 }
 0x461   : > { %2899 = vrot.lane.b32.xlu0 %v6058_v57, %s6859_s23  ;;  %3234 = vrot.lane.b32.xlu2 %v6058_v57, %s6862_s0 }
 0x462   : > { %v3221_v3 = vpop.permute.xlu1 %3220 }
 0x463   : > { %v3333_v22 = vpop.permute.xlu0 %3332  ;;  %3266 = vst.msk [vmem:[#allocation5 + $0x10] sm:$0xf] %vm1414_vm12, %v3221_v3  ;;  %v2778_v43 = vpop.permute.xlu2 %2777 }
 0x464   : > { %3378 = vst.msk [vmem:[#allocation5 + $0x10] sm:$0xf] %vm1527_vm13, %v3333_v22 }
 0x468   : > { %2787 = vrot.lane.b32.xlu1 %v6024_v49, %s6858_s30 }
 0x469   : > { %3013 = vrot.lane.b32.xlu0 %v2970_v7, %s6860_s24  ;;  %2789 = vrot.lane.b32.xlu2 %v6053_v15, %s6858_s30 }
 0x46a   : > { %v2776_v20 = vpop.permute.xlu1 %2775 }
 0x46b   : > { %v2666_v61 = vpop.permute.xlu0 %2665  ;;  %v3000_v57 = vpop.permute.xlu2 %2999  ;;  %2819 = vst.msk [vmem:[#allocation5 + $0x20] sm:$0xf] %vm961_vm6, %v2776_v20 }
 0x46c   : > { %2708 = vst.msk [vmem:[#allocation5 + $0x28] sm:$0xf] %vm848_vm5, %v2666_v61 }
 0x46d   : > { %2820 = vst.msk [vmem:[#allocation5 + $0x28] sm:$0xf] %vm961_vm6, %v2778_v43 }
 0x470   : > { %3346 = vrot.lane.b32.xlu1 %v2634_v44, %s6863_s15 }
 0x471   : > { %3236 = vrot.lane.b32.xlu0 %v6081_v34, %s6862_s0  ;;  %3011 = vrot.lane.b32.xlu2 %v2634_v44, %s6860_s24  ;;  %v3295_v44 = vld [vmem:[#allocation4 + $0x131] sm:$0xff] }
 0x472   : > { %v3335_v14 = vpop.permute.xlu1 %3334  ;;  %v3311_v8 = vpack.c.bf16 %v3295_v44, %v3295_v44 }
 0x473   : > { %v2888_v49 = vpop.permute.xlu0 %2887  ;;  %v3114_v6 = vpop.permute.xlu2 %3113  ;;  %3379 = vst.msk [vmem:[#allocation5 + $0x18] sm:$0xf] %vm1527_vm13, %v3335_v14 }
 0x474   : > { %2931 = vst.msk [vmem:[#allocation5 + $0x20] sm:$0xf] %vm1074_vm7, %v2888_v49 }
 0x475   : > { %3043 = vst.msk [vmem:[#allocation5 + $0x20] sm:$0xf] %vm1187_vm10, %v3000_v57 }
 0x478   : > { %3123 = vrot.lane.b32.xlu1 %v6053_v15, %s6861_s20 }
 0x479   : > { %2791 = vrot.lane.b32.xlu0 %v6079_v50, %s6858_s30  ;;  %3125 = vrot.lane.b32.xlu2 %v6079_v50, %s6861_s20 }
 0x47a   : > { %v3112_v23 = vpop.permute.xlu1 %3111 }
 0x47b   : > { %v3002_v41 = vpop.permute.xlu0 %3001  ;;  %3155 = vst.msk [vmem:[#allocation5 + $0x20] sm:$0xf] %vm1300_vm11, %v3112_v23  ;;  %v3337_v16 = vpop.permute.xlu2 %3336 }
 0x480   : > { %2901 = vrot.lane.b32.xlu1 %v6081_v34, %s6859_s23 }
 0x481   : > { %3350 = vrot.lane.b32.xlu0 %v3307_v0, %s6863_s15  ;;  %3348 = vrot.lane.b32.xlu2 %v2970_v7, %s6863_s15 }
 0x482   : > { %v2890_v51 = vpop.permute.xlu1 %2889 }
 0x483   : > { %v3225_v24 = vpop.permute.xlu0 %3224  ;;  %v2670_v15 = vpop.permute.xlu2 %2669  ;;  %2932 = vst.msk [vmem:[#allocation5 + $0x28] sm:$0xf] %vm1074_vm7, %v2890_v51 }
 0x484   : > { %3268 = vst.msk [vmem:[#allocation5 + $0x20] sm:$0xf] %vm1414_vm12, %v3225_v24 }
 0x485   : > { %3380 = vst.msk [vmem:[#allocation5 + $0x20] sm:$0xf] %vm1527_vm13, %v3337_v16 }
 0x486   : > { %3044 = vst.msk [vmem:[#allocation5 + $0x28] sm:$0xf] %vm1187_vm10, %v3002_v41 }
 0x487   : > { %3156 = vst.msk [vmem:[#allocation5 + $0x28] sm:$0xf] %vm1300_vm11, %v3114_v6 }
 0x488   : > { %2710 = vst.msk [vmem:[#allocation5 + $0x38] sm:$0xf] %vm848_vm5, %v2670_v15  ;;  %2679 = vrot.lane.b32.xlu1 %v2970_v7, %s6857_s16 }
 0x489   : > { %3127 = vrot.lane.b32.xlu0 %v6105_v46, %s6861_s20  ;;  %2681 = vrot.lane.b32.xlu2 %v3307_v0, %s6857_s16 }
 0x48a   : > { %v2668_v34 = vpop.permute.xlu1 %2667 }
 0x48b   : > { %v2780_v50 = vpop.permute.xlu0 %2779  ;;  %2709 = vst.msk [vmem:[#allocation5 + $0x30] sm:$0xf] %vm848_vm5, %v2668_v34  ;;  %v2892_v32 = vpop.permute.xlu2 %2891  ;;  %v4609_v34 = vld [vmem:[%s6822_s7 + $0x38] sm:$0xff] }
 0x48c   : > { %2821 = vst.msk [vmem:[#allocation5 + $0x30] sm:$0xf] %vm961_vm6, %v2780_v50  ;;  %v2429_v50 = vld [vmem:[%s6825_s10] sm:$0xf] }
 0x48d   : > { %2933 = vst.msk [vmem:[#allocation5 + $0x30] sm:$0xf] %vm1074_vm7, %v2892_v32  ;;  %4419 = vmatpush.msk.msra.mxu0 %vm540_vm8, %v2429_v50  ;;  %v4608_v32 = vld [vmem:[%s6822_s7 + $0x30] sm:$0xff] }
 0x490   : > { %3238 = vrot.lane.b32.xlu1 %v6110_v62, %s6862_s0 }
 0x491   : > { %2905 = vrot.lane.b32.xlu0 %v6124_v17, %s6859_s23  ;;  %2903 = vrot.lane.b32.xlu2 %v6110_v62, %s6859_s23 }
 0x492   : > { %v3227_v25 = vpop.permute.xlu1 %3226 }
 0x493   : > { %v3339_v5 = vpop.permute.xlu0 %3338  ;;  %3269 = vst.msk [vmem:[#allocation5 + $0x28] sm:$0xf] %vm1414_vm12, %v3227_v25  ;;  %v3006_v40 = vpop.permute.xlu2 %3005  ;;  %v4607_v25 = vld [vmem:[%s6822_s7 + $0x28] sm:$0xff] }
 0x494   : > { %3381 = vst.msk [vmem:[#allocation5 + $0x28] sm:$0xf] %vm1527_vm13, %v3339_v5 }
 0x498   : > { %2793 = vrot.lane.b32.xlu1 %v6105_v46, %s6858_s30 }
 0x499   : > { %2683 = vrot.lane.b32.xlu0 %v2637_v52, %s6857_s16  ;;  %3017 = vrot.lane.b32.xlu2 %v2637_v52, %s6860_s24 }
 0x49a   : > { %v2782_v4 = vpop.permute.xlu1 %2781 }
 0x49b   : > { %v3116_v37 = vpop.permute.xlu0 %3115  ;;  %2822 = vst.msk [vmem:[#allocation5 + $0x38] sm:$0xf] %vm961_vm6, %v2782_v4  ;;  %v3229_v62 = vpop.permute.xlu2 %3228 }
 0x4a0   : > { %3015 = vrot.lane.b32.xlu1 %v3307_v0, %s6860_s24 }
 0x4a1   : > { %3242 = vrot.lane.b32.xlu0 %v6205_v9, %s6862_s0  ;;  %3240 = vrot.lane.b32.xlu2 %v6124_v17, %s6862_s0 }
 0x4a2   : > { %v3004_v35 = vpop.permute.xlu1 %3003 }
 0x4a3   : > { %v2894_v33 = vpop.permute.xlu0 %2893  ;;  %v3120_v46 = vpop.permute.xlu2 %3119  ;;  %3045 = vst.msk [vmem:[#allocation5 + $0x30] sm:$0xf] %vm1187_vm10, %v3004_v35  ;;  %v4606_v35 = vld [vmem:[%s6822_s7 + $0x20] sm:$0xff] }
 0x4a4   : > { %2934 = vst.msk [vmem:[#allocation5 + $0x38] sm:$0xf] %vm1074_vm7, %v2894_v33 }
 0x4a5   : > { %3046 = vst.msk [vmem:[#allocation5 + $0x38] sm:$0xf] %vm1187_vm10, %v3006_v40 }
 0x4a6   : > { %3157 = vst.msk [vmem:[#allocation5 + $0x30] sm:$0xf] %vm1300_vm11, %v3116_v37 }
 0x4a7   : > { %3270 = vst.msk [vmem:[#allocation5 + $0x30] sm:$0xf] %vm1414_vm12, %v3229_v62 }
 0x4a8   : > { %3129 = vrot.lane.b32.xlu1 %v6122_v56, %s6861_s20 }
 0x4a9   : > { %2797 = vrot.lane.b32.xlu0 %v6201_v2, %s6858_s30  ;;  %2795 = vrot.lane.b32.xlu2 %v6122_v56, %s6858_s30 }
 0x4aa   : > { %v3118_v36 = vpop.permute.xlu1 %3117 }
 0x4ab   : > { %v2786_v17 = vpop.permute.xlu0 %2785  ;;  %3158 = vst.msk [vmem:[#allocation5 + $0x38] sm:$0xf] %vm1300_vm11, %v3118_v36  ;;  %v2898_v29 = vpop.permute.xlu2 %2897 }
 0x4ac   : > { %3271 = vst.msk [vmem:[#allocation5 + $0x38] sm:$0xf] %vm1414_vm12, %v6103_v48 }
 0x4ad   : > { %3383 = vst.msk [vmem:[#allocation5 + $0x38] sm:$0xf] %vm1527_vm13, %v6029_v45 }
 0x4b0   : > { %3352 = vrot.lane.b32.xlu1 %v2637_v52, %s6863_s15 }
 0x4b1   : > { %3019 = vrot.lane.b32.xlu0 %v2973_v60, %s6860_s24  ;;  %3354 = vrot.lane.b32.xlu2 %v2973_v60, %s6863_s15 }
 0x4b2   : > { %v3341_v12 = vpop.permute.xlu1 %3340 }
 0x4b3   : > { %v3008_v56 = vpop.permute.xlu0 %3007  ;;  %3382 = vst.msk [vmem:[#allocation5 + $0x30] sm:$0xf] %vm1527_vm13, %v3341_v12  ;;  %v2676_v48 = vpop.permute.xlu2 %2675 }
 0x4b4   : > { %2713 = vst.msk [vmem:[#allocation5 + $0x50] sm:$0xf] %vm848_vm5, %v2676_v48 }
 0x4b8   : > { %2685 = vrot.lane.b32.xlu1 %v2973_v60, %s6857_s16  ;;  %v4602_v60 = vld [vmem:[%s6822_s7] sm:$0xff] }
 0x4b9   : > { %3133 = vrot.lane.b32.xlu0 %v6218_v28, %s6861_s20  ;;  %3131 = vrot.lane.b32.xlu2 %v6201_v2, %s6861_s20 }
 0x4ba   : > { %v2674_v27 = vpop.permute.xlu1 %2673 }
 0x4bb   : > { %v3122_v45 = vpop.permute.xlu0 %3121  ;;  %2712 = vst.msk [vmem:[#allocation5 + $0x48] sm:$0xf] %vm848_vm5, %v2674_v27  ;;  %v3235_v55 = vpop.permute.xlu2 %3234 }
 0x4bc   : > { %2824 = vst.msk [vmem:[#allocation5 + $0x48] sm:$0xf] %vm961_vm6, %v2786_v17  ;;  %v4605_v17 = vld [vmem:[%s6822_s7 + $0x18] sm:$0xff] }
 0x4bd   : > { %2936 = vst.msk [vmem:[#allocation5 + $0x48] sm:$0xf] %vm1074_vm7, %v2898_v29 }
 0x4c0   : > { %2907 = vrot.lane.b32.xlu1 %v6205_v9, %s6859_s23 }
 0x4c1   : > { %3356 = vrot.lane.b32.xlu0 %v3310_v21, %s6863_s15  ;;  %2909 = vrot.lane.b32.xlu2 %v2862_v19, %s6859_s23 }
 0x4c2   : > { %v2896_v28 = vpop.permute.xlu1 %2895 }
 0x4c3   : > { %v3345_v2 = vpop.permute.xlu0 %3344  ;;  %v2790_v53 = vpop.permute.xlu2 %2789  ;;  %2935 = vst.msk [vmem:[#allocation5 + $0x40] sm:$0xf] %vm1074_vm7, %v2896_v28 }
 0x4c4   : > { %3047 = vst.msk [vmem:[#allocation5 + $0x40] sm:$0xf] %vm1187_vm10, %v3008_v56 }
 0x4c5   : > { %3159 = vst.msk [vmem:[#allocation5 + $0x40] sm:$0xf] %vm1300_vm11, %v3120_v46 }
 0x4c8   : > { %3021 = vrot.lane.b32.xlu1 %v3310_v21, %s6860_s24  ;;  %s434_s24 = sand.u32 1, %s4728_s26  }
 0x4c9   : > { %3246 = vrot.lane.b32.xlu2 %v3199_v42, %s6862_s0  ;;  %v4589_v42 = vld [vmem:[#allocation5 + $0x14] sm:$0xf0]  ;;  %s4273_s20 = sshll.u32 %s434_s24, 7 }
 0x4ca   : > { %v3010_v47 = vpop.permute.xlu1 %3009 }
 0x4cb   : > { %v2678_v11 = vpop.permute.xlu0 %2677  ;;  %v3012_v10 = vpop.permute.xlu2 %3011  ;;  %3048 = vst.msk [vmem:[#allocation5 + $0x48] sm:$0xf] %vm1187_vm10, %v3010_v47  ;;  %v4587_v47 = vld [vmem:[#allocation5 + $0x4] sm:$0xf0] }
 0x4cc   : > { %2714 = vst.msk [vmem:[#allocation5 + $0x58] sm:$0xf] %vm848_vm5, %v2678_v11  ;;  %v4423_v11 = vld [vmem:[#allocation5] sm:$0xf] }
 0x4cd   : > { %2826 = vst.msk [vmem:[#allocation5 + $0x58] sm:$0xf] %vm961_vm6, %v2790_v53  ;;  %v6356_v9 = vpop.f32.mrf.mxu0 }
 0x4ce   : > { %4418 = vmatmul.msk.f32.vlgmr.msrb.gmra.mxu0 %vm536_vm9, %v6356_v9  ;;  %3160 = vst.msk [vmem:[#allocation5 + $0x48] sm:$0xf] %vm1300_vm11, %v3122_v45  ;;  %v4670_v45 = vld [vmem:[%s6827_s12 + $0x1] ss:$0 sm:$0xff] }
 0x4cf   : > { %3273 = vst.msk [vmem:[#allocation5 + $0x48] sm:$0xf] %vm1414_vm12, %v3235_v55  ;;  %3624 = vmatpush.bf16.msrb.mxu0 %v4609_v34  ;;  %3773 = vrot.lane.b32.xlu0 %v4670_v45, %s6857_s16 }
 0x4d0   : > { %3244 = vrot.lane.b32.xlu1 %v2862_v19, %s6862_s0  ;;  %s6865_s0 = smov 120  }
 0x4d1   : > { %3751 = vrot.lane.b32.xlu2 %v4671_v26, %s6857_s16  ;;  %s6864_s16 = smov 116  }
 0x4d2   : > { %v3233_v31 = vpop.permute.xlu1 %3232 }
 0x4d3   : > { %v2900_v1 = vpop.permute.xlu0 %2899  ;;  %v3126_v13 = vpop.permute.xlu2 %3125  ;;  %3272 = vst.msk [vmem:[#allocation5 + $0x40] sm:$0xf] %vm1414_vm12, %v3233_v31  ;;  %3625 = vmatpush.bf16.msrb.mxu0 %v4608_v32  ;;  %v4591_v31 = vld [vmem:[#allocation5 + $0x24] sm:$0xf0] }
 0x4d4   : > { %3384 = vst.msk [vmem:[#allocation5 + $0x40] sm:$0xf] %vm1527_vm13, %v3345_v2 }
 0x4d7   : > { %3626 = vmatpush.bf16.msrb.mxu0 %v4607_v25 }
 0x4d8   : > { %3358 = vrot.lane.b32.xlu1 %v3311_v8, %s6863_s15 }
 0x4da   : > { %v2788_v22 = vpop.permute.xlu1 %2787 }
 0x4db   : > { %v3014_v54 = vpop.permute.xlu0 %3013  ;;  %v3349_v3 = vpop.permute.xlu2 %3348  ;;  %2825 = vst.msk [vmem:[#allocation5 + $0x50] sm:$0xf] %vm961_vm6, %v2788_v22  ;;  %3627 = vmatpush.bf16.msrb.mxu0 %v4606_v35 }
 0x4dc   : > { %2937 = vst.msk [vmem:[#allocation5 + $0x50] sm:$0xf] %vm1074_vm7, %v2900_v1  ;;  %v4431_v1 = vld [vmem:[#allocation5 + $0x10] sm:$0xf] }
 0x4dd   : > { %3049 = vst.msk [vmem:[#allocation5 + $0x50] sm:$0xf] %vm1187_vm10, %v3012_v10  ;;  %v4424_v10 = vor.u32 %v4587_v47, %v4423_v11  ;;  %v4432_v44 = vor.u32 %v4589_v42, %v4431_v1 }
 0x4df   : > { %3628 = vmatpush.bf16.msrb.mxu0 %v4605_v17 }
 0x4e2   : > { %v3347_v18 = vpop.permute.xlu1 %3346 }
 0x4e3   : > { %v3237_v43 = vpop.permute.xlu0 %3236  ;;  %v2682_v7 = vpop.permute.xlu2 %2681  ;;  %3385 = vst.msk [vmem:[#allocation5 + $0x48] sm:$0xf] %vm1527_vm13, %v3347_v18  ;;  %3629 = vmatpush.bf16.msrb.mxu0 %v4604_v38 }
 0x4e4   : > { %2716 = vst.msk [vmem:[#allocation5 + $0x68] sm:$0xf] %vm848_vm5, %v2682_v7 }
 0x4e7   : > { %3630 = vmatpush.bf16.msrb.mxu0 %v4603_v59 }
 0x4ea   : > { %v3124_v20 = vpop.permute.xlu1 %3123 }
 0x4eb   : > { %v2792_v61 = vpop.permute.xlu0 %2791  ;;  %3161 = vst.msk [vmem:[#allocation5 + $0x50] sm:$0xf] %vm1300_vm11, %v3124_v20  ;;  %v2904_v57 = vpop.permute.xlu2 %2903  ;;  %3631 = vmatpush.bf16.msrb.mxu0 %v4602_v60 }
 0x4ec   : > { %3274 = vst.msk [vmem:[#allocation5 + $0x50] sm:$0xf] %vm1414_vm12, %v3237_v43  ;;  %v4455_v43 = vld [vmem:[#allocation5 + $0x40] sm:$0xf] }
 0x4ed   : > { %3386 = vst.msk [vmem:[#allocation5 + $0x50] sm:$0xf] %vm1527_vm13, %v3349_v3  ;;  %v4595_v3 = vld [vmem:[#allocation5 + $0x44] sm:$0xf0] }
 0x4ee   : > { %v4456_v18 = vor.u32 %v4595_v3, %v4455_v43 }
 0x4f2   : > { %v2902_v14 = vpop.permute.xlu1 %2901 }
 0x4f3   : > { %v3351_v49 = vpop.permute.xlu0 %3350  ;;  %2938 = vst.msk [vmem:[#allocation5 + $0x58] sm:$0xf] %vm1074_vm7, %v2902_v14  ;;  %v3018_v6 = vpop.permute.xlu2 %3017 }
 0x4f4   : > { %3050 = vst.msk [vmem:[#allocation5 + $0x58] sm:$0xf] %vm1187_vm10, %v3014_v54  ;;  %v4593_v54 = vld [vmem:[#allocation5 + $0x34] sm:$0xf0] }
 0x4f5   : > { %3162 = vst.msk [vmem:[#allocation5 + $0x58] sm:$0xf] %vm1300_vm11, %v3126_v13  ;;  %v4439_v13 = vld [vmem:[#allocation5 + $0x20] sm:$0xf] }
 0x4f6   : > { %v4440_v8 = vor.u32 %v4591_v31, %v4439_v13 }
 0x4fa   : > { %v2680_v23 = vpop.permute.xlu1 %2679 }
 0x4fb   : > { %v3128_v41 = vpop.permute.xlu0 %3127  ;;  %2715 = vst.msk [vmem:[#allocation5 + $0x60] sm:$0xf] %vm848_vm5, %v2680_v23  ;;  %v3241_v16 = vpop.permute.xlu2 %3240 }
 0x4fc   : > { %2827 = vst.msk [vmem:[#allocation5 + $0x60] sm:$0xf] %vm961_vm6, %v2792_v61  ;;  %v4463_v61 = vld [vmem:[#allocation5 + $0x50] sm:$0xf] }
 0x4fd   : > { %2939 = vst.msk [vmem:[#allocation5 + $0x60] sm:$0xf] %vm1074_vm7, %v2904_v57 }
 0x502   : > { %v3239_v0 = vpop.permute.xlu1 %3238 }
 0x503   : > { %v2906_v63 = vpop.permute.xlu0 %2905  ;;  %3275 = vst.msk [vmem:[#allocation5 + $0x58] sm:$0xf] %vm1414_vm12, %v3239_v0  ;;  %v2796_v51 = vpop.permute.xlu2 %2795 }
 0x504   : > { %3387 = vst.msk [vmem:[#allocation5 + $0x58] sm:$0xf] %vm1527_vm13, %v3351_v49 }
 0x50a   : > { %v2794_v15 = vpop.permute.xlu1 %2793 }
 0x50b   : > { %v2684_v24 = vpop.permute.xlu0 %2683  ;;  %2828 = vst.msk [vmem:[#allocation5 + $0x68] sm:$0xf] %vm961_vm6, %v2794_v15  ;;  %v3355_v40 = vpop.permute.xlu2 %3354  ;;  %v4597_v7 = vld [vmem:[#allocation5 + $0x54] sm:$0xf0] }
 0x50c   : > { %2717 = vst.msk [vmem:[#allocation5 + $0x70] sm:$0xf] %vm848_vm5, %v2684_v24  ;;  %v4464_v20 = vor.u32 %v4597_v7, %v4463_v61 }
 0x50d   : > { %2829 = vst.msk [vmem:[#allocation5 + $0x70] sm:$0xf] %vm961_vm6, %v2796_v51 }
 0x50e   : > { %2940 = vst.msk [vmem:[#allocation5 + $0x68] sm:$0xf] %vm1074_vm7, %v2906_v63 }
 0x50f   : > { %3052 = vst.msk [vmem:[#allocation5 + $0x68] sm:$0xf] %vm1187_vm10, %v3018_v6  ;;  %v3682_v6 = vpop.f32.mrf.mxu1 }
 0x512   : > { %v3016_v5 = vpop.permute.xlu1 %3015 }
 0x513   : > { %3051 = vst.msk [vmem:[#allocation5 + $0x60] sm:$0xf] %vm1187_vm10, %v3016_v5  ;;  %v3243_v52 = vpop.permute.xlu0 %3242  ;;  %v3132_v37 = vpop.permute.xlu2 %3131 }
 0x514   : > { %3163 = vst.msk [vmem:[#allocation5 + $0x60] sm:$0xf] %vm1300_vm11, %v3128_v41 }
 0x515   : > { %3276 = vst.msk [vmem:[#allocation5 + $0x60] sm:$0xf] %vm1414_vm12, %v3241_v16 }
 0x517   : > { %v3684_v41 = vpop.f32.mrf.mxu1 }
 0x51a   : > { %v3130_v58 = vpop.permute.xlu1 %3129 }
 0x51b   : > { %3164 = vst.msk [vmem:[#allocation5 + $0x68] sm:$0xf] %vm1300_vm11, %v3130_v58  ;;  %v2798_v62 = vpop.permute.xlu0 %2797  ;;  %v2910_v46 = vpop.permute.xlu2 %2909 }
 0x51c   : > { %3277 = vst.msk [vmem:[#allocation5 + $0x68] sm:$0xf] %vm1414_vm12, %v3243_v52 }
 0x51d   : > { %3389 = vst.msk [vmem:[#allocation5 + $0x68] sm:$0xf] %vm1527_vm13, %v3355_v40 }
 0x51f   : > { %v3687_v0 = vpop.f32.mrf.mxu1 }
 0x522   : > { %v3353_v4 = vpop.permute.xlu1 %3352 }
 0x523   : > { %3388 = vst.msk [vmem:[#allocation5 + $0x60] sm:$0xf] %vm1527_vm13, %v3353_v4  ;;  %v3020_v36 = vpop.permute.xlu0 %3019  ;;  %v3247_v48 = vpop.permute.xlu2 %3246 }
 0x524   : > { %v4599_v49 = vld [vmem:[#allocation5 + $0x64] sm:$0xf0] }
 0x527   : > { %v3689_v32 = vpop.f32.mrf.mxu1 }
 0x52a   : > { %v2686_v33 = vpop.permute.xlu1 %2685  ;;  %v4471_v57 = vld [vmem:[#allocation5 + $0x60] sm:$0xf] }
 0x52b   : > { %2718 = vst.msk [vmem:[#allocation5 + $0x78] sm:$0xf] %vm848_vm5, %v2686_v33  ;;  %v3134_v56 = vpop.permute.xlu0 %3133  ;;  %v4472_v14 = vor.u32 %v4599_v49, %v4471_v57  ;;  %v6452_v50 = vpop.permute.xlu2 %3751 }
 0x52c   : > { %2830 = vst.msk [vmem:[#allocation5 + $0x78] sm:$0xf] %vm961_vm6, %v2798_v62 }
 0x52d   : > { %2942 = vst.msk [vmem:[#allocation5 + $0x78] sm:$0xf] %vm1074_vm7, %v2910_v46 }
 0x52f   : > { %v3692_v4 = vpop.f32.mrf.mxu1 }
 0x532   : > { %v2908_v29 = vpop.permute.xlu1 %2907 }
 0x533   : > { %2941 = vst.msk [vmem:[#allocation5 + $0x70] sm:$0xf] %vm1074_vm7, %v2908_v29  ;;  %v3357_v55 = vpop.permute.xlu0 %3356 }
 0x534   : > { %3053 = vst.msk [vmem:[#allocation5 + $0x70] sm:$0xf] %vm1187_vm10, %v3020_v36 }
 0x535   : > { %3165 = vst.msk [vmem:[#allocation5 + $0x70] sm:$0xf] %vm1300_vm11, %v3132_v37 }
 0x537   : > { %v3694_v36 = vpop.f32.mrf.mxu1 }
 0x53a   : > { %v3022_v12 = vpop.permute.xlu1 %3021 }
 0x53b   : > { %3054 = vst.msk [vmem:[#allocation5 + $0x78] sm:$0xf] %vm1187_vm10, %v3022_v12 }
 0x53c   : > { %3166 = vst.msk [vmem:[#allocation5 + $0x78] sm:$0xf] %vm1300_vm11, %v3134_v56 }
 0x53d   : > { %3279 = vst.msk [vmem:[#allocation5 + $0x78] sm:$0xf] %vm1414_vm12, %v3247_v48 }
 0x53f   : > { %v3697_v56 = vpop.f32.mrf.mxu1 }
 0x541   : > { %v6456_v5 = vpop.permute.xlu0 %3773 }
 0x542   : > { %v3245_v27 = vpop.permute.xlu1 %3244 }
 0x543   : > { %3278 = vst.msk [vmem:[#allocation5 + $0x70] sm:$0xf] %vm1414_vm12, %v3245_v27 }
 0x544   : > { %3390 = vst.msk [vmem:[#allocation5 + $0x70] sm:$0xf] %vm1527_vm13, %v3357_v55 }
 0x54a   : > { %v3359_v39 = vpop.permute.xlu1 %3358 }
 0x54b   : > { %v2422_v30 = vpop.f32.mrf.mxu0  ;;  %3391 = vst.msk [vmem:[#allocation5 + $0x78] sm:$0xf] %vm1527_vm13, %v3359_v39  ;;  %v4479_v16 = vld [vmem:[#allocation5 + $0x70] sm:$0xf] }
 0x54c   : > { %v2423_v21 = vadd.f32 3.0, %v2422_v30 }
 0x54e   : > { %v2425_v19 = vmax.f32 %v2423_v21, 0.0  ;;  %v3699_v21 = vpop.f32.mrf.mxu1 }
 0x550   : > { %v2426_v2 = vmin.f32 %v2425_v19, 6.0 }
 0x552   : > { %v2427_v28 = vmul.f32 0.16666667, %v2426_v2  ;;  %v4601_v23 = vld [vmem:[#allocation5 + $0x74] sm:$0xf0] }
 0x553   : > { %v4480_v63 = vor.u32 %v4601_v23, %v4479_v16 }
 0x554   : > { %v2428_v53 = vmul.f32 %v2427_v28, %v6356_v9  ;;  %v4447_v9 = vld [vmem:[#allocation5 + $0x30] sm:$0xf] }
 0x555   : > { %v4448_v22 = vor.u32 %v4593_v54, %v4447_v9 }
 0x556   : > { %4420 = vmatmul.msk.f32.vlgmr.msra.gmra.mxu0 %vm536_vm9, %v2428_v53 }
 0x55e   : > { %3632 = vmatmul.bf16.vlgmr.msrb.gmra.mxu0 %v4424_v10  ;;  %v3702_v10 = vpop.f32.mrf.mxu1 }
 0x566   : > { %v3704_v13 = vpop.f32.mrf.mxu1 }
 0x56e   : > { %3637 = vmatmul.bf16.gmra.mxu0 %v4432_v44  ;;  %v3707_v3 = vpop.f32.mrf.mxu1 }
 0x576   : > { %v3709_v49 = vpop.f32.mrf.mxu1 }
 0x57e   : > { %3642 = vmatmul.bf16.gmra.mxu0 %v4440_v8  ;;  %v3712_v16 = vpop.f32.mrf.mxu1 }
 0x58e   : > { %3647 = vmatmul.bf16.gmra.mxu0 %v4448_v22 }
 0x59e   : > { %3652 = vmatmul.bf16.gmra.mxu0 %v4456_v18 }
 0x5ae   : > { %3657 = vmatmul.bf16.gmra.mxu0 %v4464_v20 }
 0x5be   : > { %3662 = vmatmul.bf16.gmra.mxu0 %v4472_v14 }
 0x5ce   : > { %3667 = vmatmul.bf16.gmra.mxu0 %v4480_v63 }
 0x5d3   : > { %v6446_v24 = vpop.f32.mrf.mxu0 }
 0x5d4   : > { %v2459_v51 = vperm.slane %v6446_v24, 0  ;;  %v6487_v30 = vrot.slane %v6446_v24, 1 }
 0x5d6   : > { %2473 = vrot.lane.b32.xlu0 %v2459_v51, %s6864_s16  ;;  %2467 = vrot.lane.b32.xlu2 %v2459_v51, %s6865_s0  ;;  %v2460_v28 = vperm.slane %v6487_v30, 0 }
 0x5d7   : > { %2461 = vrot.lane.b32.xlu1 %v2459_v51, %s6866_s1 }
 0x5db   : > { %v3633_v15 = vpop.f32.mrf.mxu0 }
 0x5dc   : > { %v6454_v34 = vadd.f32 %v3682_v6, %v3633_v15 }
 0x5de   : > { %v3754_v25 = vmul.f32 %v6452_v50, %v6454_v34 }
 0x5e0   : > { %v3776_v40 = vadd.f32 %v6456_v5, %v3754_v25  ;;  %v3714_v25 = vpop.f32.mrf.mxu1 }
 0x5e2   : > { %3800 = vrot.lane.b32.xlu1 %v3776_v40, %s6863_s15 }
 0x5e3   : > { %v3635_v58 = vpop.f32.mrf.mxu0 }
 0x5e4   : > { %v6462_v52 = vadd.f32 %v3684_v41, %v3635_v58 }
 0x5e6   : > { %v3755_v37 = vmul.f32 %v6452_v50, %v6462_v52 }
 0x5e8   : > { %v3777_v62 = vadd.f32 %v6456_v5, %v3755_v37 }
 0x5ea   : > { %3802 = vrot.lane.b32.xlu2 %v3777_v62, %s6863_s15 }
 0x5eb   : > { %v3638_v33 = vpop.f32.mrf.mxu0 }
 0x5ec   : > { %v6468_v35 = vadd.f32 %v3687_v0, %v3638_v33  ;;  %v2486_v33 = vadd.f32 3.0, %v6487_v30 }
 0x5ee   : > { %v3756_v46 = vmul.f32 %v6452_v50, %v6468_v35 }
 0x5f0   : > { %v3778_v17 = vadd.f32 %v6456_v5, %v3756_v46  ;;  %v3717_v46 = vpop.f32.mrf.mxu1 }
 0x5f2   : > { %3804 = vrot.lane.b32.xlu0 %v3778_v17, %s6863_s15 }
 0x5f3   : > { %v3640_v29 = vpop.f32.mrf.mxu0 }
 0x5f4   : > { %v6474_v38 = vadd.f32 %v3689_v32, %v3640_v29 }
 0x5f6   : > { %v3757_v59 = vmul.f32 %v6452_v50, %v6474_v38 }
 0x5f8   : > { %v3779_v60 = vadd.f32 %v6456_v5, %v3757_v59 }
 0x5fa   : > { %3806 = vrot.lane.b32.xlu1 %v3779_v60, %s6863_s15 }
 0x5fb   : > { %v3643_v12 = vpop.f32.mrf.mxu0 }
 0x5fc   : > { %v6480_v48 = vadd.f32 %v3692_v4, %v3643_v12 }
 0x5fe   : > { %v3758_v45 = vmul.f32 %v6452_v50, %v6480_v48 }
 0x600   : > { %v3780_v27 = vadd.f32 %v6456_v5, %v3758_v45 }
 0x602   : > { %3808 = vrot.lane.b32.xlu2 %v3780_v27, %s6863_s15  ;;  %v2488_v27 = vmax.f32 %v2486_v33, 0.0 }
 0x603   : > { %v3645_v55 = vpop.f32.mrf.mxu0 }
 0x604   : > { %v6489_v39 = vadd.f32 %v3694_v36, %v3645_v55 }
 0x606   : > { %v3759_v19 = vmul.f32 %v6452_v50, %v6489_v39 }
 0x608   : > { %v3781_v2 = vadd.f32 %v6456_v5, %v3759_v19  ;;  %v2485_v19 = vadd.f32 3.0, %v6446_v24 }
 0x60a   : > { %3810 = vrot.lane.b32.xlu0 %v3781_v2, %s6863_s15  ;;  %2463 = vrot.lane.b32.xlu2 %v2460_v28, %s6866_s1 }
 0x60b   : > { %v3648_v53 = vpop.f32.mrf.mxu0 }
 0x60c   : > { %v6497_v11 = vadd.f32 %v3697_v56, %v3648_v53  ;;  %v3719_v53 = vpop.f32.mrf.mxu1 }
 0x60e   : > { %v3760_v47 = vmul.f32 %v6452_v50, %v6497_v11 }
 0x610   : > { %v3782_v26 = vadd.f32 %v6456_v5, %v3760_v47 }
 0x612   : > { %2469 = vrot.lane.b32.xlu0 %v2460_v28, %s6865_s0  ;;  %3812 = vrot.lane.b32.xlu2 %v3782_v26, %s6863_s15 }
 0x613   : > { %v3650_v42 = vpop.f32.mrf.mxu0 }
 0x614   : > { %v6504_v1 = vadd.f32 %v3699_v21, %v3650_v42  ;;  %v4672_v21 = vld [vmem:[%s6827_s12] ss:$0 sm:$0xff] }
 0x616   : > { %v3761_v44 = vmul.f32 %v6452_v50, %v6504_v1 }
 0x618   : > { %v3783_v31 = vadd.f32 %v6456_v5, %v3761_v44 }
 0x61a   : > { %3814 = vrot.lane.b32.xlu1 %v3783_v31, %s6863_s15  ;;  %v4673_v31 = vld [vmem:[%s6827_s12 + $0x1] ss:$0 sm:$0xff] }
 0x61b   : > { %v3653_v8 = vpop.f32.mrf.mxu0 }
 0x61c   : > { %v6510_v9 = vadd.f32 %v3702_v10, %v3653_v8  ;;  %v2487_v10 = vmax.f32 %v2485_v19, 0.0 }
 0x61e   : > { %v3762_v54 = vmul.f32 %v6452_v50, %v6510_v9 }
 0x620   : > { %v3784_v22 = vadd.f32 %v6456_v5, %v3762_v54 }
 0x622   : > { %3884 = vrot.lane.b32.xlu0 %v3784_v22, %s6863_s15  ;;  %2475 = vrot.lane.b32.xlu1 %v2460_v28, %s6864_s16  ;;  %v2490_v28 = vmin.f32 %v2488_v27, 6.0  ;;  %s6703_s16 = scalar_lea.vmem [#allocation6], %s4273_s20 }
 0x623   : > { %v3655_v43 = vpop.f32.mrf.mxu0  ;;  %s4204_s22 = sshll.u32 %s6703_s16, 4  ;;  %s4205_s22 = int_to_ptr.vmem [resolvable:$true] %s4204_s22 }
 0x624   : > { %v6517_v18 = vadd.f32 %v3704_v13, %v3655_v43  ;;  %v2492_v44 = vmul.f32 0.16666667, %v2490_v28  ;;  %v2489_v13 = vmin.f32 %v2487_v10, 6.0 }
 0x626   : > { %v3763_v7 = vmul.f32 %v6452_v50, %v6517_v18  ;;  %v3725_v54 = vperm.slane %v2492_v44, 0  ;;  %v2491_v22 = vmul.f32 0.16666667, %v2489_v13 }
 0x628   : > { %v3785_v61 = vadd.f32 %v6456_v5, %v3763_v7  ;;  %v3724_v43 = vperm.slane %v2491_v22, 0 }
 0x62a   : > { %3886 = vrot.lane.b32.xlu1 %v3785_v61, %s6863_s15 }
 0x62b   : > { %v3658_v20 = vpop.f32.mrf.mxu0 }
 0x62c   : > { %v6523_v57 = vadd.f32 %v3707_v3, %v3658_v20 }
 0x62e   : > { %v3764_v14 = vmul.f32 %v6452_v50, %v6523_v57 }
 0x630   : > { %v3786_v6 = vadd.f32 %v6456_v5, %v3764_v14  ;;  %v2468_v36 = vpop.permute.xlu2 %2467 }
 0x632   : > { %3888 = vrot.lane.b32.xlu2 %v3786_v6, %s6863_s15 }
 0x633   : > { %v3660_v41 = vpop.f32.mrf.mxu0 }
 0x634   : > { %v6529_v23 = vadd.f32 %v3709_v49, %v3660_v41 }
 0x636   : > { %v3765_v63 = vmul.f32 %v6452_v50, %v6529_v23 }
 0x638   : > { %v3787_v0 = vadd.f32 %v6456_v5, %v3765_v63 }
 0x63a   : > { %3890 = vrot.lane.b32.xlu0 %v3787_v0, %s6863_s15 }
 0x63b   : > { %v3663_v51 = vpop.f32.mrf.mxu0 }
 0x63c   : > { %v6535_v15 = vadd.f32 %v3712_v16, %v3663_v51 }
 0x63e   : > { %v3766_v32 = vmul.f32 %v6452_v50, %v6535_v15 }
 0x640   : > { %v3788_v40 = vadd.f32 %v6456_v5, %v3766_v32 }
 0x642   : > { %3892 = vrot.lane.b32.xlu1 %v3788_v40, %s6863_s15 }
 0x643   : > { %v3665_v58 = vpop.f32.mrf.mxu0 }
 0x644   : > { %v6541_v37 = vadd.f32 %v3714_v25, %v3665_v58  ;;  %v3803_v3 = vpop.permute.xlu2 %3802 }
 0x646   : > { %v3767_v4 = vmul.f32 %v6452_v50, %v6541_v37 }
 0x648   : > { %v3789_v62 = vadd.f32 %v6456_v5, %v3767_v4  ;;  %v2474_v59 = vpop.permute.xlu0 %2473  ;;  %v4044_v4 = vld [vmem:[%s6826_s11] sm:$0x3] }
 0x649   : > { %v2462_v17 = vpop.permute.xlu1 %2461 }
 0x64a   : > { %v2479_v29 = vsel %vm618_vm14, %v6446_v24, %v2462_v17  ;;  %3894 = vrot.lane.b32.xlu2 %v3789_v62, %s6863_s15  ;;  %v4070_v62 = vsel %vm621_vm15, %v4044_v4, 0 }
 0x64b   : > { %v2481_v60 = vsel %vm621_vm15, %v2479_v29, %v2468_v36  ;;  %v3668_v56 = vpop.f32.mrf.mxu0  ;;  %4079 = vmatpush.bf16.msrb.mxu3 %v4070_v62 }
 0x64c   : > { %v6551_v12 = vadd.f32 %v3717_v46, %v3668_v56  ;;  %v2483_v45 = vsel %vm624_vm1, %v2481_v60, %v2474_v59 }
 0x64d   : > { %4529 = vmatpush.xpose.msk.msra.mxu0 %vm536_vm9, %v2483_v45  ;;  %4613 = vmatpush.xpose.msk.msra.mxu2 %vm536_vm9, %v2483_v45 }
 0x64e   : > { %v3768_v55 = vmul.f32 %v6452_v50, %v6551_v12 }
 0x650   : > { %v3790_v2 = vadd.f32 %v6456_v5, %v3768_v55 }
 0x652   : > { %3896 = vrot.lane.b32.xlu0 %v3790_v2, %s6863_s15  ;;  %3963 = vrot.lane.b32.xlu2 %v4672_v21, %s6866_s1 }
 0x653   : > { %v3670_v47 = vpop.f32.mrf.mxu0 }
 0x654   : > { %v6565_v26 = vadd.f32 %v3719_v53, %v3670_v47  ;;  %v6567_v42 = vpop.permute.xlu1 %3800 }
 0x655   : > { %4530 = vmatmul.msk.f32.vlgmr.msra.gmra.mxu0 %vm536_vm9, %v6567_v42 }
 0x656   : > { %v3769_v24 = vmul.f32 %v6452_v50, %v6565_v26 }
 0x658   : > { %v3791_v8 = vadd.f32 %v6456_v5, %v3769_v24 }
 0x65a   : > { %3728 = vrot.lane.b32.xlu2 %v3725_v54, %s6863_s15  ;;  %3898 = vrot.lane.b32.xlu1 %v3791_v8, %s6863_s15 }
 0x65b   : > { %3985 = vrot.lane.b32.xlu0 %v4673_v31, %s6866_s1  ;;  %s4694_s1 = scalar_lea.hbm %s6828_s13, 256 }
 0x65c   : > { %v3809_v7 = vpop.permute.xlu2 %3808 }
 0x65d   : > { %4531 = vmatmul.msk.f32.gmra.mxu0 %vm536_vm9, %v3803_v3 }
 0x662   : > { %3726 = vrot.lane.b32.xlu1 %v3724_v43, %s6863_s15 }
 0x663   : > { %4121 = vrot.lane.b32.xlu0 %v4672_v21, %s6865_s0 }
 0x664   : > { %v3805_v50 = vpop.permute.xlu0 %3804  ;;  %v2464_v61 = vpop.permute.xlu2 %2463 }
 0x665   : > { %4532 = vmatmul.msk.f32.gmra.mxu0 %vm536_vm9, %v3805_v50  ;;  %v2480_v41 = vsel %vm618_vm14, %v6487_v30, %v2464_v61 }
 0x66a   : > { %4140 = vrot.lane.b32.xlu1 %v4673_v31, %s6865_s0  ;;  %s4611_s0 = sshll.u32 %s4842_s29, 7  ;;  %s4192_s29 = scalar_lea.sflag [#allocation7], %s434_s24 }
 0x66b   : > { %s4203_s2 = scalar_lea.hbm %s6828_s13, %s4611_s0 }
 0x66c   : > { %v3807_v5 = vpop.permute.xlu1 %3806  ;;  %v6588_v49 = vpop.permute.xlu2 %3812  ;;  %s4206_s23 = sshll.u32 %s4203_s2, 4  ;;  %s4207_s23 = int_to_ptr.hbm [resolvable:$true] %s4206_s23 }
 0x66d   : > { %4533 = vmatmul.msk.f32.gmra.mxu0 %vm536_vm9, %v3807_v5  ;;  %s4688_s15 = sshra.s32 %s4207_s23, 4  ;;  %s4689_s15 = int_to_ptr.hbm [resolvable:$true] %s4688_s15 }
 0x66e   : > { %s4690_s30 = scalar_lea.hbm %s4689_s15, 128  ;;  %p4695_p0 = scmp.lt.s32.totalorder %s4689_s15, %s6828_s13 }
 0x66f   : > { %p4691_p11 = scmp.ne.s32.totalorder %s4689_s15, %s4690_s30  ;;  %p4696_p1 = scmp.lt.s32.totalorder %s4694_s1, %s4690_s30 }
 0x671   : > { %p4692_p12 = pnand %p4691_p11, %p4859_p5  ;;  %p4697_p2 = por %p4696_p1, %p4695_p0 }
 0x673   : > { %p4693_p13 = pneg %p4692_p12 }
 0x675   : > { %4534 = vmatmul.msk.f32.gmra.mxu0 %vm536_vm9, %v3809_v7  ;;  %p4698_p3 = pnand %p4697_p2, %p4693_p13 }
 0x67c   : > { %v3811_v20 = vpop.permute.xlu0 %3810 }
 0x67d   : > { %4535 = vmatmul.msk.f32.gmra.mxu0 %vm536_vm9, %v3811_v20 }
 0x684   : > { %v2470_v6 = vpop.permute.xlu0 %2469 }
 0x685   : > { %4536 = vmatmul.msk.f32.gmra.mxu0 %vm536_vm9, %v6588_v49  ;;  %v2482_v16 = vsel %vm621_vm15, %v2480_v41, %v2470_v6 }
 0x68c   : > { %v6592_v14 = vpop.permute.xlu1 %3814  ;;  %v6609_v25 = vpop.permute.xlu2 %3888 }
 0x68d   : > { %4537 = vmatmul.msk.f32.vlgmr.msra.gmra.mxu2 %vm536_vm9, %v6592_v14 }
 0x694   : > { %v2476_v63 = vpop.permute.xlu1 %2475  ;;  %v6601_v51 = vpop.permute.xlu0 %3884 }
 0x695   : > { %v2484_v0 = vsel %vm624_vm1, %v2482_v16, %v2476_v63 }
 0x696   : > { %4538 = vmatpush.xpose.msk.msrb.mxu2 %vm536_vm9, %v2484_v0 }
 0x699   : > { %4539 = vmatmul.msk.f32.vlgmr.msrb.gmra.mxu2 %vm536_vm9, %v6601_v51 }
 0x69c   : > { %v6605_v32 = vpop.permute.xlu1 %3886 }
 0x6a1   : > { %4540 = vmatmul.msk.f32.gmra.mxu2 %vm536_vm9, %v6605_v32 }
 0x6a4   : > { %v6621_v58 = vpop.permute.xlu2 %3894 }
 0x6a9   : > { %4541 = vmatmul.msk.f32.gmra.mxu2 %vm536_vm9, %v6609_v25 }
 0x6ac   : > { %v6613_v30 = vpop.permute.xlu0 %3890  ;;  %v6637_v36 = vpop.permute.xlu2 %3963 }
 0x6b1   : > { %4542 = vmatmul.msk.f32.gmra.mxu2 %vm536_vm9, %v6613_v30 }
 0x6b4   : > { %v6617_v40 = vpop.permute.xlu1 %3892 }
 0x6b9   : > { %4543 = vmatmul.msk.f32.gmra.mxu2 %vm536_vm9, %v6617_v40 }
 0x6c1   : > { %4544 = vmatmul.msk.f32.gmra.mxu2 %vm536_vm9, %v6621_v58 }
 0x6c4   : > { %v6629_v33 = vpop.permute.xlu0 %3896 }
 0x6c9   : > { %4545 = vmatmul.msk.f32.gmra.mxu2 %vm536_vm9, %v6629_v33 }
 0x6cc   : > { %v6633_v46 = vpop.permute.xlu1 %3898 }
 0x6cd   : > { %v6640_v59 = vpop.permute.xlu0 %3985 }
 0x6d1   : > { %4546 = vmatmul.msk.f32.gmra.mxu2 %vm536_vm9, %v6633_v46 }
 0x6d2   : > { %v3852_v17 = vpop.f32.mrf.mxu0 }
 0x6d3   : > { %v3966_v29 = vmul.f32 %v6637_v36, %v3852_v17 }
 0x6d5   : > { %v3988_v45 = vadd.f32 %v6640_v59, %v3966_v29 }
 0x6d7   : > { %v4020_v55 = vadd.f32 %v3988_v45, %v6567_v42 }
 0x6da   : > { %v3855_v60 = vpop.f32.mrf.mxu0 }
 0x6db   : > { %v3967_v56 = vmul.f32 %v6637_v36, %v3855_v60 }
 0x6dd   : > { %v3989_v27 = vadd.f32 %v6640_v59, %v3967_v56 }
 0x6df   : > { %v4021_v21 = vadd.f32 %v3989_v27, %v3803_v3 }
 0x6e1   : > { %v4036_v19 = vpack.c.bf16 %v4021_v21, %v4020_v55 }
 0x6e2   : > { %v3858_v2 = vpop.f32.mrf.mxu0 }
 0x6e3   : > { %4547 = vmatmul.msk.bf16.vlgmr.msrb.gmra.mxu3 %vm536_vm9, %v4036_v19  ;;  %v3968_v28 = vmul.f32 %v6637_v36, %v3858_v2 }
 0x6e5   : > { %v3990_v47 = vadd.f32 %v6640_v59, %v3968_v28 }
 0x6e7   : > { %v4022_v24 = vadd.f32 %v3990_v47, %v3805_v50 }
 0x6ea   : > { %v3861_v53 = vpop.f32.mrf.mxu0 }
 0x6eb   : > { %v3969_v10 = vmul.f32 %v6637_v36, %v3861_v53 }
 0x6ed   : > { %v3991_v44 = vadd.f32 %v6640_v59, %v3969_v10 }
 0x6ef   : > { %v4023_v31 = vadd.f32 %v3991_v44, %v3807_v5 }
 0x6f1   : > { %v4037_v13 = vpack.c.bf16 %v4023_v31, %v4022_v24 }
 0x6f2   : > { %v3864_v8 = vpop.f32.mrf.mxu0 }
 0x6f3   : > { %4548 = vmatmul.msk.bf16.gmra.mxu3 %vm536_vm9, %v4037_v13  ;;  %v3970_v42 = vmul.f32 %v6637_v36, %v3864_v8 }
 0x6f5   : > { %v3992_v22 = vadd.f32 %v6640_v59, %v3970_v42 }
 0x6f7   : > { %v4024_v61 = vadd.f32 %v3992_v22, %v3809_v7 }
 0x6fa   : > { %v3867_v54 = vpop.f32.mrf.mxu0 }
 0x6fb   : > { %v3971_v3 = vmul.f32 %v6637_v36, %v3867_v54 }
 0x6fd   : > { %v3993_v43 = vadd.f32 %v6640_v59, %v3971_v3 }
 0x6ff   : > { %v4025_v6 = vadd.f32 %v3993_v43, %v3811_v20 }
 0x701   : > { %v4038_v41 = vpack.c.bf16 %v4025_v6, %v4024_v61 }
 0x702   : > { %v3870_v50 = vpop.f32.mrf.mxu0 }
 0x703   : > { %4549 = vmatmul.msk.bf16.gmra.mxu3 %vm536_vm9, %v4038_v41  ;;  %v3972_v5 = vmul.f32 %v6637_v36, %v3870_v50 }
 0x705   : > { %v3994_v63 = vadd.f32 %v6640_v59, %v3972_v5  ;;  %v3727_v5 = vpop.permute.xlu1 %3726 }
 0x707   : > { %v4026_v62 = vadd.f32 %v3994_v63, %v6588_v49 }
 0x710   : > { %v3873_v16 = vpop.f32.mrf.mxu2 }
 0x711   : > { %v3973_v0 = vmul.f32 %v6637_v36, %v3873_v16  ;;  %v3732_v16 = vmul.f32 %v3727_v5, %v6454_v34 }
 0x713   : > { %v3995_v4 = vadd.f32 %v6640_v59, %v3973_v0  ;;  %v6693_v0 = vpop.permute.xlu0 %4121 }
 0x715   : > { %v4027_v17 = vadd.f32 %v3995_v4, %v6592_v14 }
 0x717   : > { %v4039_v29 = vpack.c.bf16 %v4027_v17, %v4026_v62  ;;  %v6696_v62 = vpop.permute.xlu1 %4140 }
 0x719   : > { %4550 = vmatmul.msk.bf16.gmra.mxu3 %vm536_vm9, %v4039_v29 }
 0x71c   : > { %v3936_v7 = vpop.f32.mrf.mxu2 }
 0x71d   : > { %v3974_v20 = vmul.f32 %v6637_v36, %v3936_v7 }
 0x71f   : > { %v3996_v56 = vadd.f32 %v6640_v59, %v3974_v20 }
 0x721   : > { %v4028_v55 = vadd.f32 %v3996_v56, %v6601_v51 }
 0x724   : > { %v3939_v60 = vpop.f32.mrf.mxu2 }
 0x725   : > { %v3975_v45 = vmul.f32 %v6637_v36, %v3939_v60  ;;  %v3734_v60 = vmul.f32 %v3727_v5, %v6468_v35 }
 0x727   : > { %v3997_v27 = vadd.f32 %v6640_v59, %v3975_v45 }
 0x729   : > { %v4029_v21 = vadd.f32 %v3997_v27, %v6605_v32 }
 0x72b   : > { %v4040_v49 = vpack.c.bf16 %v4029_v21, %v4028_v55  ;;  %v3735_v21 = vmul.f32 %v3727_v5, %v6474_v38 }
 0x72c   : > { %v3942_v19 = vpop.f32.mrf.mxu2 }
 0x72d   : > { %4551 = vmatmul.msk.bf16.gmra.mxu3 %vm536_vm9, %v4040_v49  ;;  %v3976_v14 = vmul.f32 %v6637_v36, %v3942_v19 }
 0x72f   : > { %v3998_v28 = vadd.f32 %v6640_v59, %v3976_v14 }
 0x731   : > { %v4030_v10 = vadd.f32 %v3998_v28, %v6609_v25  ;;  %v3736_v28 = vmul.f32 %v3727_v5, %v6480_v48 }
 0x734   : > { %v3945_v2 = vpop.f32.mrf.mxu2 }
 0x735   : > { %v3977_v53 = vmul.f32 %v6637_v36, %v3945_v2 }
 0x737   : > { %v3999_v47 = vadd.f32 %v6640_v59, %v3977_v53 }
 0x739   : > { %v4031_v44 = vadd.f32 %v3999_v47, %v6613_v30 }
 0x73b   : > { %v4041_v51 = vpack.c.bf16 %v4031_v44, %v4030_v10 }
 0x73c   : > { %v3948_v24 = vpop.f32.mrf.mxu2 }
 0x73d   : > { %4552 = vmatmul.msk.bf16.gmra.mxu3 %vm536_vm9, %v4041_v51  ;;  %v3978_v32 = vmul.f32 %v6637_v36, %v3948_v24  ;;  %v3737_v51 = vmul.f32 %v3727_v5, %v6489_v39 }
 0x73f   : > { %v4000_v13 = vadd.f32 %v6640_v59, %v3978_v32 }
 0x741   : > { %v4032_v54 = vadd.f32 %v4000_v13, %v6617_v40 }
 0x744   : > { %v3951_v31 = vpop.f32.mrf.mxu2 }
 0x745   : > { %v3979_v8 = vmul.f32 %v6637_v36, %v3951_v31 }
 0x747   : > { %v4001_v42 = vadd.f32 %v6640_v59, %v3979_v8  ;;  %v3738_v8 = vmul.f32 %v3727_v5, %v6497_v11  ;;  %v3729_v11 = vpop.permute.xlu2 %3728 }
 0x749   : > { %v4033_v22 = vadd.f32 %v4001_v42, %v6621_v58 }
 0x74b   : > { %v4042_v25 = vpack.c.bf16 %v4033_v22, %v4032_v54 }
 0x74c   : > { %v3954_v30 = vpop.f32.mrf.mxu2 }
 0x74d   : > { %4553 = vmatmul.msk.bf16.gmra.mxu3 %vm536_vm9, %v4042_v25  ;;  %v3980_v3 = vmul.f32 %v6637_v36, %v3954_v30  ;;  %v3739_v30 = vmul.f32 %v3727_v5, %v6504_v1 }
 0x74f   : > { %v4002_v61 = vadd.f32 %v6640_v59, %v3980_v3 }
 0x751   : > { %v4034_v50 = vadd.f32 %v4002_v61, %v6629_v33 }
 0x754   : > { %v3957_v43 = vpop.f32.mrf.mxu2 }
 0x755   : > { %v3981_v6 = vmul.f32 %v6637_v36, %v3957_v43 }
 0x757   : > { %v4003_v41 = vadd.f32 %v6640_v59, %v3981_v6  ;;  %v3733_v59 = vmul.f32 %v3727_v5, %v6462_v52 }
 0x759   : > { %v4035_v40 = vadd.f32 %v4003_v41, %v6633_v46 }
 0x75b   : > { %v4043_v58 = vpack.c.bf16 %v4035_v40, %v4034_v50  ;;  %v3740_v50 = vmul.f32 %v3729_v11, %v6510_v9  ;;  %v3742_v9 = vmul.f32 %v3729_v11, %v6523_v57 }
 0x75d   : > { %4554 = vmatmul.msk.bf16.gmra.mxu3 %vm536_vm9, %v4043_v58 }
 0x766   : > { %v4081_v63 = vpop.f32.mrf.mxu3 }
 0x767   : > { %v4082_v4 = vadd.f32 %v4081_v63, %v3732_v16  ;;  %v3741_v63 = vmul.f32 %v3729_v11, %v6517_v18 }
 0x769   : > { %v4124_v36 = vmul.f32 %v6693_v0, %v4082_v4 }
 0x76b   : > { %v4143_v33 = vadd.f32 %v6696_v62, %v4124_v36 }
 0x76d   : > { %v4159_v46 = vmax.f32 %v4143_v33, 0.0 }
 0x76e   : > { %v4083_v17 = vpop.f32.mrf.mxu3 }
 0x76f   : > { %4175 = vst.msk [vmem:[%s6703_s16] sm:$0xff] %vm462_vm0, %v4159_v46  ;;  %v4084_v34 = vadd.f32 %v4083_v17, %v3733_v59 }
 0x771   : > { %v4125_v29 = vmul.f32 %v6693_v0, %v4084_v34 }
 0x773   : > { %v4144_v7 = vadd.f32 %v6696_v62, %v4125_v29 }
 0x775   : > { %v4160_v20 = vmax.f32 %v4144_v7, 0.0 }
 0x776   : > { %v4086_v56 = vpop.f32.mrf.mxu3 }
 0x777   : > { %4176 = vst.msk [vmem:[%s6703_s16 + $0x8] sm:$0xff] %vm462_vm0, %v4160_v20  ;;  %v4087_v52 = vadd.f32 %v4086_v56, %v3734_v60  ;;  %v3743_v20 = vmul.f32 %v3729_v11, %v6529_v23 }
 0x779   : > { %v4126_v45 = vmul.f32 %v6693_v0, %v4087_v52 }
 0x77b   : > { %v4145_v27 = vadd.f32 %v6696_v62, %v4126_v45 }
 0x77d   : > { %v4161_v55 = vmax.f32 %v4145_v27, 0.0  ;;  %v3744_v27 = vmul.f32 %v3729_v11, %v6535_v15 }
 0x77e   : > { %v4088_v49 = vpop.f32.mrf.mxu3 }
 0x77f   : > { %4177 = vst.msk [vmem:[%s6703_s16 + $0x10] sm:$0xff] %vm462_vm0, %v4161_v55  ;;  %v4089_v19 = vadd.f32 %v4088_v49, %v3735_v21 }
 0x781   : > { %v4127_v14 = vmul.f32 %v6693_v0, %v4089_v19 }
 0x783   : > { %v4146_v35 = vadd.f32 %v6696_v62, %v4127_v14  ;;  %v3745_v14 = vmul.f32 %v3729_v11, %v6541_v37 }
 0x785   : > { %v4162_v2 = vmax.f32 %v4146_v35, 0.0 }
 0x786   : > { %v4091_v53 = vpop.f32.mrf.mxu3 }
 0x787   : > { %4178 = vst.msk [vmem:[%s6703_s16 + $0x18] sm:$0xff] %vm462_vm0, %v4162_v2  ;;  %v4092_v47 = vadd.f32 %v4091_v53, %v3736_v28 }
 0x789   : > { %v4128_v10 = vmul.f32 %v6693_v0, %v4092_v47  ;;  %v3746_v47 = vmul.f32 %v3729_v11, %v6551_v12 }
 0x78b   : > { %v4147_v38 = vadd.f32 %v6696_v62, %v4128_v10 }
 0x78d   : > { %v4163_v44 = vmax.f32 %v4147_v38, 0.0 }
 0x78e   : > { %v4093_v24 = vpop.f32.mrf.mxu3 }
 0x78f   : > { %4179 = vst.msk [vmem:[%s6703_s16 + $0x20] sm:$0xff] %vm462_vm0, %v4163_v44  ;;  %v4094_v32 = vadd.f32 %v4093_v24, %v3737_v51  ;;  %v3747_v24 = vmul.f32 %v3729_v11, %v6565_v26 }
 0x791   : > { %v4129_v31 = vmul.f32 %v6693_v0, %v4094_v32 }
 0x793   : > { %v4148_v48 = vadd.f32 %v6696_v62, %v4129_v31 }
 0x795   : > { %v4164_v13 = vmax.f32 %v4148_v48, 0.0 }
 0x797   : > { %4180 = vst.msk [vmem:[%s6703_s16 + $0x28] sm:$0xff] %vm462_vm0, %v4164_v13 }
 0x79c   : > { %v4096_v42 = vpop.f32.mrf.mxu3 }
 0x79d   : > { %v4097_v54 = vadd.f32 %v4096_v42, %v3738_v8 }
 0x79f   : > { %v4130_v22 = vmul.f32 %v6693_v0, %v4097_v54 }
 0x7a1   : > { %v4149_v39 = vadd.f32 %v6696_v62, %v4130_v22 }
 0x7a3   : > { %v4165_v25 = vmax.f32 %v4149_v39, 0.0 }
 0x7a4   : > { %v4098_v3 = vpop.f32.mrf.mxu3 }
 0x7a5   : > { %4181 = vst.msk [vmem:[%s6703_s16 + $0x30] sm:$0xff] %vm462_vm0, %v4165_v25  ;;  %v4099_v43 = vadd.f32 %v4098_v3, %v3739_v30 }
 0x7a7   : > { %v4131_v61 = vmul.f32 %v6693_v0, %v4099_v43 }
 0x7a9   : > { %v4150_v6 = vadd.f32 %v6696_v62, %v4131_v61 }
 0x7ab   : > { %v4166_v41 = vmax.f32 %v4150_v6, 0.0 }
 0x7ad   : > { %4182 = vst.msk [vmem:[%s6703_s16 + $0x38] sm:$0xff] %vm462_vm0, %v4166_v41 }
 0x7b0   : > { %v4101_v40 = vpop.f32.mrf.mxu3 }
 0x7b1   : > { %v4102_v58 = vadd.f32 %v4101_v40, %v3740_v50 }
 0x7b3   : > { %v4132_v1 = vmul.f32 %v6693_v0, %v4102_v58 }
 0x7b5   : > { %v4151_v5 = vadd.f32 %v6696_v62, %v4132_v1 }
 0x7b7   : > { %v4167_v16 = vmax.f32 %v4151_v5, 0.0 }
 0x7b8   : > { %v4103_v4 = vpop.f32.mrf.mxu3 }
 0x7b9   : > { %4183 = vst.msk [vmem:[%s6703_s16 + $0x40] sm:$0xff] %vm462_vm0, %v4167_v16  ;;  %v4104_v36 = vadd.f32 %v4103_v4, %v3741_v63 }
 0x7bb   : > { %v4133_v33 = vmul.f32 %v6693_v0, %v4104_v36 }
 0x7bd   : > { %v4152_v46 = vadd.f32 %v6696_v62, %v4133_v33 }
 0x7bf   : > { %v4168_v59 = vmax.f32 %v4152_v46, 0.0 }
 0x7c0   : > { %v4106_v17 = vpop.f32.mrf.mxu3 }
 0x7c1   : > { %4184 = vst.msk [vmem:[%s6703_s16 + $0x48] sm:$0xff] %vm462_vm0, %v4168_v59  ;;  %v4107_v34 = vadd.f32 %v4106_v17, %v3742_v9 }
 0x7c3   : > { %v4134_v29 = vmul.f32 %v6693_v0, %v4107_v34 }
 0x7c5   : > { %v4153_v18 = vadd.f32 %v6696_v62, %v4134_v29 }
 0x7c7   : > { %v4169_v7 = vmax.f32 %v4153_v18, 0.0 }
 0x7c8   : > { %v4108_v60 = vpop.f32.mrf.mxu3 }
 0x7c9   : > { %4185 = vst.msk [vmem:[%s6703_s16 + $0x50] sm:$0xff] %vm462_vm0, %v4169_v7  ;;  %v4109_v56 = vadd.f32 %v4108_v60, %v3743_v20 }
 0x7cb   : > { %v4135_v52 = vmul.f32 %v6693_v0, %v4109_v56 }
 0x7cd   : > { %v4154_v57 = vadd.f32 %v6696_v62, %v4135_v52 }
 0x7cf   : > { %v4170_v45 = vmax.f32 %v4154_v57, 0.0 }
 0x7d0   : > { %v4111_v55 = vpop.f32.mrf.mxu3 }
 0x7d1   : > { %4186 = vst.msk [vmem:[%s6703_s16 + $0x58] sm:$0xff] %vm462_vm0, %v4170_v45  ;;  %v4112_v21 = vadd.f32 %v4111_v55, %v3744_v27 }
 0x7d3   : > { %v4136_v49 = vmul.f32 %v6693_v0, %v4112_v21 }
 0x7d5   : > { %v4155_v23 = vadd.f32 %v6696_v62, %v4136_v49 }
 0x7d7   : > { %v4171_v19 = vmax.f32 %v4155_v23, 0.0 }
 0x7d8   : > { %v4113_v35 = vpop.f32.mrf.mxu3 }
 0x7d9   : > { %4187 = vst.msk [vmem:[%s6703_s16 + $0x60] sm:$0xff] %vm462_vm0, %v4171_v19  ;;  %v4114_v2 = vadd.f32 %v4113_v35, %v3745_v14 }
 0x7db   : > { %v4137_v15 = vmul.f32 %v6693_v0, %v4114_v2 }
 0x7dd   : > { %v4156_v28 = vadd.f32 %v6696_v62, %v4137_v15 }
 0x7df   : > { %v4172_v53 = vmax.f32 %v4156_v28, 0.0 }
 0x7e0   : > { %v4116_v10 = vpop.f32.mrf.mxu3 }
 0x7e1   : > { %4188 = vst.msk [vmem:[%s6703_s16 + $0x68] sm:$0xff] %vm462_vm0, %v4172_v53  ;;  %v4117_v38 = vadd.f32 %v4116_v10, %v3746_v47 }
 0x7e3   : > { %v4138_v44 = vmul.f32 %v6693_v0, %v4117_v38 }
 0x7e5   : > { %v4157_v37 = vadd.f32 %v6696_v62, %v4138_v44 }
 0x7e7   : > { %v4173_v51 = vmax.f32 %v4157_v37, 0.0 }
 0x7e8   : > { %v4118_v32 = vpop.f32.mrf.mxu3 }
 0x7e9   : > { %4189 = vst.msk [vmem:[%s6703_s16 + $0x70] sm:$0xff] %vm462_vm0, %v4173_v51  ;;  %v4119_v12 = vadd.f32 %v4118_v32, %v3747_v24 }
 0x7eb   : > { %v4139_v31 = vmul.f32 %v6693_v0, %v4119_v12 }
 0x7ed   : > { %v4158_v48 = vadd.f32 %v6696_v62, %v4139_v31 }
 0x7ef   : > { %v4174_v13 = vmax.f32 %v4158_v48, 0.0 }
 0x7f1   : > { %4190 = vst.msk [vmem:[%s6703_s16 + $0x78] sm:$0xff] %vm462_vm0, %v4174_v13 }
 0x7f2   : > { %4701 = shalt.err (!%p4698_p3)
}
 0x7f3   : > { %s4749_s24 = smov 128   ;;  %s4750_s16 = smov 8  }
 0x7f4   : > { %4614 = dma.vmem_to_hbm [thread:$0]  (%p4859_p5), %s4205_s22, 2048, %s4207_s23, %s4192_s29, %s4749_s24, %s4749_s24, %s4750_s16  }
 0x7f5 PF: > { %p4620_p4 = scmp.ge.s32.totalorder %s4736_s28, 2  ;;  %s4221_s20 = sand.u32 1, %s4724_s25  }
 0x7f6   : > { %s4222_s0 = scalar_lea.sflag [#allocation7], %s4221_s20 }
 0x7f7   : > { %p4617_p7 = pnand %p4620_p4, %p4863_p6 }
 0x7f9   : > { %p4618_p8 = pneg %p4617_p7 }
 0x7fb   : > { %4719 = dma.done.wait (%p4618_p8), %s4222_s0, 2048  }
 0x7fc   : > { %4721 = vsyncadd (%p4618_p8), %s4222_s0, 4294965248  ;;  %p23_p9 = scmp.ge.s32.totalorder %s4846_s14, 4   ;;  %s6867_s25 = smov %s4728_s26 }
 0x7fd   : > { %s6868_s26 = smov %s4732_s27  ;;  %s6869_s27 = smov %s4857_s17 }
 0x7fe   : > { %s6870_s28 = smov %s4846_s14  ;;  %25 = sbr.rel (!%p23_p9) target bundleno = 7 (0x7), region = 113 }
 0x803   :  { %4228 = vsyncpa [#allocation7], 1 }
 0x804   :  { %4230 = vsyncpa [#allocation7 + $0x1], 1 }

</bundles_post_ra>
